<compile_context>
chip_gen: v7x
topology: tpu7x:2x2x1
jax: 0.10.0
libtpu: 0.0.40
codegen_flags: <defaults>
</compile_context>

<pallas_src>
import functools

import jax
import jax.numpy as jnp
from jax import lax
from jax.experimental import pallas as pl
from jax.experimental.pallas import tpu as pltpu

D_MODEL = 320            # ESM-2 t6 8M embedding dim (encoder d_model)
FFN_DIM = 2048           # nn.TransformerEncoderLayer default dim_feedforward
LN_EPS = 1e-5            # nn.LayerNorm default eps
HEAD_PAD = 128           # per-head dim 80 zero-padded to 128 lanes
VMEM_LIMIT = 48 * 1024 * 1024   # under the v7x 64 MiB/TC budget; fine on v5e/v6e


# ----------------------------- Pallas kernels ------------------------------

def _layer_norm(z, g, b, eps):
    mean = jnp.mean(z, axis=-1, keepdims=True)
    var = jnp.mean(jnp.square(z - mean), axis=-1, keepdims=True)
    return (z - mean) * lax.rsqrt(var + eps) * g + b


def _encoder_stack_kernel(x_ref, wqkv_ref, bqkv_ref, wout_ref, bout_ref,
                          ln1g_ref, ln1b_ref, w1_ref, b1_ref, w2_ref, b2_ref,
                          ln2g_ref, ln2b_ref, o_ref, x_scr,
                          *, num_heads, eps):
    """One grid step = one (batch element, layer) pair; activation stays in VMEM."""
    l = pl.program_id(1)

    @pl.when(l == 0)
    def _():
        x_scr[...] = x_ref[0]                       # load activation once per b

    x = x_scr[...]                                  # (S, D) float32
    x_bf = x.astype(jnp.bfloat16)
    HP = num_heads * HEAD_PAD

    # --- fused QKV projection: layout [Q_heads | K_heads | V_heads] ---------
    # (1/sqrt(head_dim) already folded into the Q columns/bias on the host)
    qkv = jnp.dot(x_bf, wqkv_ref[0],
                  preferred_element_type=jnp.float32) + bqkv_ref[0]   # (S, 3*HP)

    # --- per-head attention (static, 128-lane aligned slices) ---------------
    o_heads = []
    for h in range(num_heads):                      # static unroll, tiny live set
        a = h * HEAD_PAD
        q = qkv[:, a:a + HEAD_PAD].astype(jnp.bfloat16)
        k = qkv[:, HP + a:HP + a + HEAD_PAD].astype(jnp.bfloat16)
        v = qkv[:, 2 * HP + a:2 * HP + a + HEAD_PAD].astype(jnp.bfloat16)
        s = lax.dot_general(q, k, (((1,), (1,)), ((), ())),
                            preferred_element_type=jnp.float32)       # (S, S)
        s = s - jnp.max(s, axis=-1, keepdims=True)
        p = jnp.exp(s)
        p = (p * pl.reciprocal(jnp.sum(p, axis=-1, keepdims=True), approx=True)
             ).astype(jnp.bfloat16)
        o_heads.append(jnp.dot(p, v, preferred_element_type=jnp.float32))
    # lane-aligned concat (each head is exactly 128 lanes) -> single out-proj
    o_cat = jnp.concatenate(o_heads, axis=-1).astype(jnp.bfloat16)    # (S, HP)
    sa = jnp.dot(o_cat, wout_ref[0],
                 preferred_element_type=jnp.float32) + bout_ref[0]    # (S, D)

    # --- residual + LayerNorm 1 ----------------------------------------------
    z = _layer_norm(x + sa, ln1g_ref[0], ln1b_ref[0], eps)

    # --- feed-forward (2048-wide intermediate stays in VMEM) ----------------
    hdn = jnp.dot(z.astype(jnp.bfloat16), w1_ref[0],
                  preferred_element_type=jnp.float32) + b1_ref[0]
    hdn = jnp.maximum(hdn, 0.0)
    ff = jnp.dot(hdn.astype(jnp.bfloat16), w2_ref[0],
                 preferred_element_type=jnp.float32) + b2_ref[0]

    # --- residual + LayerNorm 2 ----------------------------------------------
    y = _layer_norm(z + ff, ln2g_ref[0], ln2b_ref[0], eps)
    x_scr[...] = y                                  # carry to next layer

    @pl.when(l == pl.num_programs(1) - 1)
    def _():
        o_ref[0] = y.astype(o_ref.dtype)            # write back once per b


def encoder_stack(x, p, num_heads):
    """All L nn.TransformerEncoderLayer's (norm_first=False, relu, eval dropout)."""
    B, S, D = x.shape
    L = p["wqkv"].shape[0]

    def lspec(arr):                                  # per-layer weight block
        blk = (1,) + arr.shape[1:]
        nd = arr.ndim
        return pl.BlockSpec(blk, lambda b, l, _n=nd: (l,) + (0,) * (_n - 1))

    names = ["wqkv", "bqkv", "wout", "bout", "ln1_g", "ln1_b",
             "w1", "b1", "w2", "b2", "ln2_g", "ln2_b"]
    in_specs = ([pl.BlockSpec((1, S, D), lambda b, l: (b, 0, 0))]
                + [lspec(p[n]) for n in names])

    return pl.pallas_call(
        functools.partial(_encoder_stack_kernel, num_heads=num_heads, eps=LN_EPS),
        out_shape=jax.ShapeDtypeStruct((B, S, D), jnp.float32),
        grid=(B, L),
        in_specs=in_specs,
        out_specs=pl.BlockSpec((1, S, D), lambda b, l: (b, 0, 0)),
        scratch_shapes=[pltpu.VMEM((S, D), jnp.float32)],
        compiler_params=pltpu.CompilerParams(
            dimension_semantics=("parallel", "arbitrary"),
            vmem_limit_bytes=VMEM_LIMIT),
    )(x, *[p[n] for n in names])


def _head_kernel(x_ref, w1_ref, b1_ref, w2_ref, b2_ref, o_ref):
    """Fused fc1 -> ReLU -> mean over sequence -> fc2 (VPU multiply-reduce)."""
    x = x_ref[0].astype(jnp.bfloat16)                               # (S, D)
    h = jnp.dot(x, w1_ref[...],
                preferred_element_type=jnp.float32) + b1_ref[...]   # (S, HIDP)
    h = jnp.maximum(h, 0.0)
    hm = jnp.mean(h, axis=0, keepdims=True)                         # (1, HIDP)
    y = jnp.sum(hm * w2_ref[...], axis=-1, keepdims=True) + b2_ref[...]
    o_ref[0] = y


def head_and_mean(x, p):
    B, S, D = x.shape
    out = pl.pallas_call(
        _head_kernel,
        out_shape=jax.ShapeDtypeStruct((B, 1, 1), jnp.float32),
        grid=(B,),
        in_specs=[pl.BlockSpec((1, S, D), lambda b: (b, 0, 0)),
                  pl.BlockSpec(p["fc1_w"].shape, lambda b: (0, 0)),
                  pl.BlockSpec(p["fc1_b"].shape, lambda b: (0, 0)),
                  pl.BlockSpec(p["fc2_w"].shape, lambda b: (0, 0)),
                  pl.BlockSpec(p["fc2_b"].shape, lambda b: (0, 0))],
        out_specs=pl.BlockSpec((1, 1, 1), lambda b: (b, 0, 0)),
        compiler_params=pltpu.CompilerParams(
            dimension_semantics=("parallel",),
            vmem_limit_bytes=VMEM_LIMIT),
    )(x, p["fc1_w"], p["fc1_b"], p["fc2_w"], p["fc2_b"])
    return out.reshape(B)


# ---------------------------- model composition ----------------------------

def protein_gat_transformer_forward(esm_embeddings, params, num_heads):
    # TODO(synk): the frozen pretrained ESM-2 model + alphabet batch_converter
    # (string tokenization over an external checkpoint) have no Pallas
    # equivalent; the kernel pipeline consumes precomputed ESM embeddings.
    x = encoder_stack(esm_embeddings, params, num_heads)
    return head_and_mean(x, params)                                  # (B,)


# ---------------------------- parameter handling -----------------------------

def init_params(key, hidden_dim, num_layers):
    """PyTorch-like weights, already transposed to (in, out) layout.
    NOTE: real nn.MultiheadAttention.in_proj_weight is (3D, D) and
    nn.Linear.weight is (out, in); transpose when importing checkpoints."""
    def dense(k, shape):
        return jax.random.normal(k, shape, jnp.float32) * 0.02

    layers = []
    for layer in range(num_layers):
        k = jax.random.fold_in(key, layer)
        ks = jax.random.split(k, 4)
        layers.append(dict(
            in_proj_w=dense(ks[0], (D_MODEL, 3 * D_MODEL)),
            in_proj_b=jnp.zeros((3 * D_MODEL,), jnp.float32),
            out_proj_w=dense(ks[1], (D_MODEL, D_MODEL)),
            out_proj_b=jnp.zeros((D_MODEL,), jnp.float32),
            ffn_w1=dense(ks[2], (D_MODEL, FFN_DIM)),
            ffn_b1=jnp.zeros((FFN_DIM,), jnp.float32),
            ffn_w2=dense(ks[3], (FFN_DIM, D_MODEL)),
            ffn_b2=jnp.zeros((D_MODEL,), jnp.float32),
            ln1_g=jnp.ones((D_MODEL,), jnp.float32),
            ln1_b=jnp.zeros((D_MODEL,), jnp.float32),
            ln2_g=jnp.ones((D_MODEL,), jnp.float32),
            ln2_b=jnp.zeros((D_MODEL,), jnp.float32),
        ))
    kf1, kf2 = jax.random.split(jax.random.fold_in(key, 1000))
    return dict(
        layers=layers,
        fc1_w=dense(kf1, (D_MODEL, hidden_dim)),
        fc1_b=jnp.zeros((hidden_dim,), jnp.float32),
        fc2_w=dense(kf2, (hidden_dim, 1)),
        fc2_b=jnp.zeros((1,), jnp.float32),
    )


def prepare_params(raw, num_heads):
    """Host-side one-off repack: fuse QKV per layer into one (D, 3*H*128)
    weight (heads padded 80->128 lanes, 1/sqrt(dh) folded into Q), stack the
    per-head rows of out_proj into (H*128, D), stack everything with a leading
    L axis, pad the MLP-head hidden dim to 128 lanes (exact under ReLU), and
    cast GEMM weights to bf16.  Zero padding is numerically exact."""
    D = D_MODEL
    assert D % num_heads == 0
    dh = D // num_heads
    pad = HEAD_PAD - dh
    scale = 1.0 / float(dh) ** 0.5

    stacks = {k: [] for k in ["wqkv", "bqkv", "wout", "bout", "ln1_g", "ln1_b",
                              "w1", "b1", "w2", "b2", "ln2_g", "ln2_b"]}
    for lp in raw["layers"]:
        in_w, in_b, out_w = lp["in_proj_w"], lp["in_proj_b"], lp["out_proj_w"]
        wq_h, wk_h, wv_h, bq_h, bk_h, bv_h, wo_h = [], [], [], [], [], [], []
        for h in range(num_heads):
            sq = slice(h * dh, (h + 1) * dh)
            sk = slice(D + h * dh, D + (h + 1) * dh)
            sv = slice(2 * D + h * dh, 2 * D + (h + 1) * dh)
            wq_h.append(jnp.pad(in_w[:, sq] * scale, ((0, 0), (0, pad))))
            wk_h.append(jnp.pad(in_w[:, sk], ((0, 0), (0, pad))))
            wv_h.append(jnp.pad(in_w[:, sv], ((0, 0), (0, pad))))
            bq_h.append(jnp.pad(in_b[sq] * scale, (0, pad)))
            bk_h.append(jnp.pad(in_b[sk], (0, pad)))
            bv_h.append(jnp.pad(in_b[sv], (0, pad)))
            wo_h.append(jnp.pad(out_w[h * dh:(h + 1) * dh, :], ((0, pad), (0, 0))))
        stacks["wqkv"].append(jnp.concatenate(wq_h + wk_h + wv_h, axis=1))
        stacks["bqkv"].append(jnp.concatenate(bq_h + bk_h + bv_h).reshape(1, -1))
        stacks["wout"].append(jnp.concatenate(wo_h, axis=0))
        stacks["bout"].append(lp["out_proj_b"].reshape(1, D))
        stacks["ln1_g"].append(lp["ln1_g"].reshape(1, D))
        stacks["ln1_b"].append(lp["ln1_b"].reshape(1, D))
        stacks["w1"].append(lp["ffn_w1"])
        stacks["b1"].append(lp["ffn_b1"].reshape(1, FFN_DIM))
        stacks["w2"].append(lp["ffn_w2"])
        stacks["b2"].append(lp["ffn_b2"].reshape(1, D))
        stacks["ln2_g"].append(lp["ln2_g"].reshape(1, D))
        stacks["ln2_b"].append(lp["ln2_b"].reshape(1, D))

    bf16_keys = {"wqkv", "wout", "w1", "w2"}
    params = {k: (jnp.stack(v).astype(jnp.bfloat16) if k in bf16_keys
                  else jnp.stack(v))
              for k, v in stacks.items()}

    hidden = raw["fc1_w"].shape[1]
    hid_pad = ((hidden + 127) // 128) * 128 - hidden
    params.update(
        fc1_w=jnp.pad(raw["fc1_w"], ((0, 0), (0, hid_pad))).astype(jnp.bfloat16),
        fc1_b=jnp.pad(raw["fc1_b"], (0, hid_pad)).reshape(1, -1),
        fc2_w=jnp.pad(raw["fc2_w"][:, 0], (0, hid_pad)).reshape(1, -1),
        fc2_b=raw["fc2_b"].reshape(1, 1),
    )
    return params


# --------------------------------- main -------------------------------------

if __name__ == "__main__":
    key = jax.random.PRNGKey(0)
    B, S = 2, 8                      # small batch of sequences
    num_heads, num_layers, hidden_dim = 4, 2, 32

    k_emb, k_par = jax.random.split(key)
    esm_embeddings = jax.random.normal(k_emb, (B, S, D_MODEL), jnp.float32)
    params = prepare_params(init_params(k_par, hidden_dim, num_layers), num_heads)

    fwd = jax.jit(functools.partial(protein_gat_transformer_forward,
                                    num_heads=num_heads))
    out = fwd(esm_embeddings, params)
    jax.block_until_ready(out)
    assert out.shape == (B,) and out.dtype == jnp.float32
    print("KERNEL_OK")
</pallas_src>

<mosaic_0001>
module attributes {stable_mosaic.version = 11 : i64} {
  func.func @_encoder_stack_kernel(%arg0: i32, %arg1: i32, %arg2: memref<1x8x320xf32, #tpu.memory_space<vmem>>, %arg3: memref<1x320x1536xbf16, #tpu.memory_space<vmem>>, %arg4: memref<1x1x1536xf32, #tpu.memory_space<vmem>>, %arg5: memref<1x512x320xbf16, #tpu.memory_space<vmem>>, %arg6: memref<1x1x320xf32, #tpu.memory_space<vmem>>, %arg7: memref<1x1x320xf32, #tpu.memory_space<vmem>>, %arg8: memref<1x1x320xf32, #tpu.memory_space<vmem>>, %arg9: memref<1x320x2048xbf16, #tpu.memory_space<vmem>>, %arg10: memref<1x1x2048xf32, #tpu.memory_space<vmem>>, %arg11: memref<1x2048x320xbf16, #tpu.memory_space<vmem>>, %arg12: memref<1x1x320xf32, #tpu.memory_space<vmem>>, %arg13: memref<1x1x320xf32, #tpu.memory_space<vmem>>, %arg14: memref<1x1x320xf32, #tpu.memory_space<vmem>>, %arg15: memref<1x8x320xf32, #tpu.memory_space<vmem>>, %arg16: memref<8x320xf32, #tpu.memory_space<vmem>>) attributes {dimension_semantics = [#tpu.dimension_semantics<parallel>, #tpu.dimension_semantics<arbitrary>], iteration_bounds = array<i64: 2, 2>, scalar_prefetch = 0 : i64, scratch_operands = 1 : i64, tpu.core_type = #tpu.core_type<tc>, window_params = [{transform_indices = @transform_0, window_bounds = array<i64: 1, 8, 320>}, {transform_indices = @transform_1, window_bounds = array<i64: 1, 320, 1536>}, {transform_indices = @transform_2, window_bounds = array<i64: 1, 1, 1536>}, {transform_indices = @transform_3, window_bounds = array<i64: 1, 512, 320>}, {transform_indices = @transform_4, window_bounds = array<i64: 1, 1, 320>}, {transform_indices = @transform_5, window_bounds = array<i64: 1, 1, 320>}, {transform_indices = @transform_6, window_bounds = array<i64: 1, 1, 320>}, {transform_indices = @transform_7, window_bounds = array<i64: 1, 320, 2048>}, {transform_indices = @transform_8, window_bounds = array<i64: 1, 1, 2048>}, {transform_indices = @transform_9, window_bounds = array<i64: 1, 2048, 320>}, {transform_indices = @transform_10, window_bounds = array<i64: 1, 1, 320>}, {transform_indices = @transform_11, window_bounds = array<i64: 1, 1, 320>}, {transform_indices = @transform_12, window_bounds = array<i64: 1, 1, 320>}, {transform_indices = @transform_13, window_bounds = array<i64: 1, 8, 320>}]} {
    %c0_i32 = arith.constant 0 : i32
    %0 = arith.cmpi eq, %arg1, %c0_i32 : i32
    %1 = arith.extui %0 : i1 to i32
    %c0_i32_0 = arith.constant 0 : i32
    %2 = arith.cmpi ne, %1, %c0_i32_0 : i32
    scf.if %2 {
      %c0_71 = arith.constant 0 : index
      %c0_72 = arith.constant 0 : index
      %c0_73 = arith.constant 0 : index
      %173 = vector.load %arg2[%c0_71, %c0_72, %c0_73] : memref<1x8x320xf32, #tpu.memory_space<vmem>>, vector<1x8x320xf32>
      %174 = vector.shape_cast %173 : vector<1x8x320xf32> to vector<8x320xf32>
      %c0_74 = arith.constant 0 : index
      %c0_75 = arith.constant 0 : index
      %175 = vector.load %arg16[%c0_74, %c0_75] : memref<8x320xf32, #tpu.memory_space<vmem>>, vector<8x320xf32>
      tpu.vector_store %arg16[%c0_74, %c0_75], %174 {strides = array<i32>} : memref<8x320xf32, #tpu.memory_space<vmem>>, vector<8x320xf32>,
    } else {
    }
    %c0 = arith.constant 0 : index
    %c0_1 = arith.constant 0 : index
    %3 = vector.load %arg16[%c0, %c0_1] : memref<8x320xf32, #tpu.memory_space<vmem>>, vector<8x320xf32>
    %4 = arith.truncf %3 : vector<8x320xf32> to vector<8x320xbf16>
    %c0_2 = arith.constant 0 : index
    %c0_3 = arith.constant 0 : index
    %c0_4 = arith.constant 0 : index
    %5 = vector.load %arg3[%c0_2, %c0_3, %c0_4] : memref<1x320x1536xbf16, #tpu.memory_space<vmem>>, vector<1x320x1536xbf16>
    %6 = vector.shape_cast %5 : vector<1x320x1536xbf16> to vector<320x1536xbf16>
    %cst = arith.constant dense<0.000000e+00> : vector<8x1536xf32>
    %7 = tpu.matmul %4, %6, %cst {dimension_numbers = #tpu.dot_dimension_numbers<[1], [0], [0], [1], [0, 0, 1, 1], [], []>} : vector<8x320xbf16>, vector<320x1536xbf16>, vector<8x1536xf32> -> vector<8x1536xf32>
    %c0_5 = arith.constant 0 : index
    %c0_6 = arith.constant 0 : index
    %c0_7 = arith.constant 0 : index
    %8 = vector.load %arg4[%c0_5, %c0_6, %c0_7] : memref<1x1x1536xf32, #tpu.memory_space<vmem>>, vector<1x1x1536xf32>
    %9 = vector.shape_cast %8 : vector<1x1x1536xf32> to vector<1x1536xf32>
    %10 = vector.broadcast %9 : vector<1x1536xf32> to vector<8x1536xf32>
    %11 = arith.addf %7, %10 : vector<8x1536xf32>
    %12 = vector.extract_strided_slice %11 {offsets = [0, 0], sizes = [8, 128], strides = [1, 1]} : vector<8x1536xf32> to vector<8x128xf32>
    %13 = arith.truncf %12 : vector<8x128xf32> to vector<8x128xbf16>
    %14 = vector.extract_strided_slice %11 {offsets = [0, 512], sizes = [8, 128], strides = [1, 1]} : vector<8x1536xf32> to vector<8x128xf32>
    %15 = arith.truncf %14 : vector<8x128xf32> to vector<8x128xbf16>
    %16 = vector.extract_strided_slice %11 {offsets = [0, 1024], sizes = [8, 128], strides = [1, 1]} : vector<8x1536xf32> to vector<8x128xf32>
    %17 = arith.truncf %16 : vector<8x128xf32> to vector<8x128xbf16>
    %cst_8 = arith.constant dense<0.000000e+00> : vector<8x8xf32>
    %18 = tpu.matmul %13, %15, %cst_8 {dimension_numbers = #tpu.dot_dimension_numbers<[1], [1], [0], [0], [0, 0, 1, 0], [], []>} : vector<8x128xbf16>, vector<8x128xbf16>, vector<8x8xf32> -> vector<8x8xf32>
    %cst_9 = arith.constant dense<0xFF800000> : vector<8xf32>
    %19 = vector.multi_reduction <maximumf>, %18, %cst_9 [1] : vector<8x8xf32> to vector<8xf32>
    %20 = vector.shape_cast %19 : vector<8xf32> to vector<8x1xf32>
    %21 = vector.broadcast %20 : vector<8x1xf32> to vector<8x8xf32>
    %22 = arith.subf %18, %21 : vector<8x8xf32>
    %23 = math.exp %22 : vector<8x8xf32>
    %cst_10 = arith.constant dense<0.000000e+00> : vector<8xf32>
    %24 = vector.multi_reduction <add>, %23, %cst_10 [1] : vector<8x8xf32> to vector<8xf32>
    %25 = vector.shape_cast %24 : vector<8xf32> to vector<8x1xf32>
    %26 = tpu.reciprocal %25 {approx = true} : vector<8x1xf32> -> vector<8x1xf32>
    %27 = vector.broadcast %26 : vector<8x1xf32> to vector<8x8xf32>
    %28 = arith.mulf %23, %27 : vector<8x8xf32>
    %29 = arith.truncf %28 : vector<8x8xf32> to vector<8x8xbf16>
    %cst_11 = arith.constant dense<0.000000e+00> : vector<8x128xf32>
    %30 = tpu.matmul %29, %17, %cst_11 {dimension_numbers = #tpu.dot_dimension_numbers<[1], [0], [0], [1], [0, 0, 1, 1], [], []>} : vector<8x8xbf16>, vector<8x128xbf16>, vector<8x128xf32> -> vector<8x128xf32>
    %31 = vector.extract_strided_slice %11 {offsets = [0, 128], sizes = [8, 128], strides = [1, 1]} : vector<8x1536xf32> to vector<8x128xf32>
    %32 = arith.truncf %31 : vector<8x128xf32> to vector<8x128xbf16>
    %33 = vector.extract_strided_slice %11 {offsets = [0, 640], sizes = [8, 128], strides = [1, 1]} : vector<8x1536xf32> to vector<8x128xf32>
    %34 = arith.truncf %33 : vector<8x128xf32> to vector<8x128xbf16>
    %35 = vector.extract_strided_slice %11 {offsets = [0, 1152], sizes = [8, 128], strides = [1, 1]} : vector<8x1536xf32> to vector<8x128xf32>
    %36 = arith.truncf %35 : vector<8x128xf32> to vector<8x128xbf16>
    %cst_12 = arith.constant dense<0.000000e+00> : vector<8x8xf32>
    %37 = tpu.matmul %32, %34, %cst_12 {dimension_numbers = #tpu.dot_dimension_numbers<[1], [1], [0], [0], [0, 0, 1, 0], [], []>} : vector<8x128xbf16>, vector<8x128xbf16>, vector<8x8xf32> -> vector<8x8xf32>
    %cst_13 = arith.constant dense<0xFF800000> : vector<8xf32>
    %38 = vector.multi_reduction <maximumf>, %37, %cst_13 [1] : vector<8x8xf32> to vector<8xf32>
    %39 = vector.shape_cast %38 : vector<8xf32> to vector<8x1xf32>
    %40 = vector.broadcast %39 : vector<8x1xf32> to vector<8x8xf32>
    %41 = arith.subf %37, %40 : vector<8x8xf32>
    %42 = math.exp %41 : vector<8x8xf32>
    %cst_14 = arith.constant dense<0.000000e+00> : vector<8xf32>
    %43 = vector.multi_reduction <add>, %42, %cst_14 [1] : vector<8x8xf32> to vector<8xf32>
    %44 = vector.shape_cast %43 : vector<8xf32> to vector<8x1xf32>
    %45 = tpu.reciprocal %44 {approx = true} : vector<8x1xf32> -> vector<8x1xf32>
    %46 = vector.broadcast %45 : vector<8x1xf32> to vector<8x8xf32>
    %47 = arith.mulf %42, %46 : vector<8x8xf32>
    %48 = arith.truncf %47 : vector<8x8xf32> to vector<8x8xbf16>
    %cst_15 = arith.constant dense<0.000000e+00> : vector<8x128xf32>
    %49 = tpu.matmul %48, %36, %cst_15 {dimension_numbers = #tpu.dot_dimension_numbers<[1], [0], [0], [1], [0, 0, 1, 1], [], []>} : vector<8x8xbf16>, vector<8x128xbf16>, vector<8x128xf32> -> vector<8x128xf32>
    %50 = vector.extract_strided_slice %11 {offsets = [0, 256], sizes = [8, 128], strides = [1, 1]} : vector<8x1536xf32> to vector<8x128xf32>
    %51 = arith.truncf %50 : vector<8x128xf32> to vector<8x128xbf16>
    %52 = vector.extract_strided_slice %11 {offsets = [0, 768], sizes = [8, 128], strides = [1, 1]} : vector<8x1536xf32> to vector<8x128xf32>
    %53 = arith.truncf %52 : vector<8x128xf32> to vector<8x128xbf16>
    %54 = vector.extract_strided_slice %11 {offsets = [0, 1280], sizes = [8, 128], strides = [1, 1]} : vector<8x1536xf32> to vector<8x128xf32>
    %55 = arith.truncf %54 : vector<8x128xf32> to vector<8x128xbf16>
    %cst_16 = arith.constant dense<0.000000e+00> : vector<8x8xf32>
    %56 = tpu.matmul %51, %53, %cst_16 {dimension_numbers = #tpu.dot_dimension_numbers<[1], [1], [0], [0], [0, 0, 1, 0], [], []>} : vector<8x128xbf16>, vector<8x128xbf16>, vector<8x8xf32> -> vector<8x8xf32>
    %cst_17 = arith.constant dense<0xFF800000> : vector<8xf32>
    %57 = vector.multi_reduction <maximumf>, %56, %cst_17 [1] : vector<8x8xf32> to vector<8xf32>
    %58 = vector.shape_cast %57 : vector<8xf32> to vector<8x1xf32>
    %59 = vector.broadcast %58 : vector<8x1xf32> to vector<8x8xf32>
    %60 = arith.subf %56, %59 : vector<8x8xf32>
    %61 = math.exp %60 : vector<8x8xf32>
    %cst_18 = arith.constant dense<0.000000e+00> : vector<8xf32>
    %62 = vector.multi_reduction <add>, %61, %cst_18 [1] : vector<8x8xf32> to vector<8xf32>
    %63 = vector.shape_cast %62 : vector<8xf32> to vector<8x1xf32>
    %64 = tpu.reciprocal %63 {approx = true} : vector<8x1xf32> -> vector<8x1xf32>
    %65 = vector.broadcast %64 : vector<8x1xf32> to vector<8x8xf32>
    %66 = arith.mulf %61, %65 : vector<8x8xf32>
    %67 = arith.truncf %66 : vector<8x8xf32> to vector<8x8xbf16>
    %cst_19 = arith.constant dense<0.000000e+00> : vector<8x128xf32>
    %68 = tpu.matmul %67, %55, %cst_19 {dimension_numbers = #tpu.dot_dimension_numbers<[1], [0], [0], [1], [0, 0, 1, 1], [], []>} : vector<8x8xbf16>, vector<8x128xbf16>, vector<8x128xf32> -> vector<8x128xf32>
    %69 = vector.extract_strided_slice %11 {offsets = [0, 384], sizes = [8, 128], strides = [1, 1]} : vector<8x1536xf32> to vector<8x128xf32>
    %70 = arith.truncf %69 : vector<8x128xf32> to vector<8x128xbf16>
    %71 = vector.extract_strided_slice %11 {offsets = [0, 896], sizes = [8, 128], strides = [1, 1]} : vector<8x1536xf32> to vector<8x128xf32>
    %72 = arith.truncf %71 : vector<8x128xf32> to vector<8x128xbf16>
    %73 = vector.extract_strided_slice %11 {offsets = [0, 1408], sizes = [8, 128], strides = [1, 1]} : vector<8x1536xf32> to vector<8x128xf32>
    %74 = arith.truncf %73 : vector<8x128xf32> to vector<8x128xbf16>
    %cst_20 = arith.constant dense<0.000000e+00> : vector<8x8xf32>
    %75 = tpu.matmul %70, %72, %cst_20 {dimension_numbers = #tpu.dot_dimension_numbers<[1], [1], [0], [0], [0, 0, 1, 0], [], []>} : vector<8x128xbf16>, vector<8x128xbf16>, vector<8x8xf32> -> vector<8x8xf32>
    %cst_21 = arith.constant dense<0xFF800000> : vector<8xf32>
    %76 = vector.multi_reduction <maximumf>, %75, %cst_21 [1] : vector<8x8xf32> to vector<8xf32>
    %77 = vector.shape_cast %76 : vector<8xf32> to vector<8x1xf32>
    %78 = vector.broadcast %77 : vector<8x1xf32> to vector<8x8xf32>
    %79 = arith.subf %75, %78 : vector<8x8xf32>
    %80 = math.exp %79 : vector<8x8xf32>
    %cst_22 = arith.constant dense<0.000000e+00> : vector<8xf32>
    %81 = vector.multi_reduction <add>, %80, %cst_22 [1] : vector<8x8xf32> to vector<8xf32>
    %82 = vector.shape_cast %81 : vector<8xf32> to vector<8x1xf32>
    %83 = tpu.reciprocal %82 {approx = true} : vector<8x1xf32> -> vector<8x1xf32>
    %84 = vector.broadcast %83 : vector<8x1xf32> to vector<8x8xf32>
    %85 = arith.mulf %80, %84 : vector<8x8xf32>
    %86 = arith.truncf %85 : vector<8x8xf32> to vector<8x8xbf16>
    %cst_23 = arith.constant dense<0.000000e+00> : vector<8x128xf32>
    %87 = tpu.matmul %86, %74, %cst_23 {dimension_numbers = #tpu.dot_dimension_numbers<[1], [0], [0], [1], [0, 0, 1, 1], [], []>} : vector<8x8xbf16>, vector<8x128xbf16>, vector<8x128xf32> -> vector<8x128xf32>
    %88 = tpu.concatenate %30, %49, %68, %87 in 1 : vector<8x128xf32>, vector<8x128xf32>, vector<8x128xf32>, vector<8x128xf32> -> vector<8x512xf32>
    %89 = arith.truncf %88 : vector<8x512xf32> to vector<8x512xbf16>
    %c0_24 = arith.constant 0 : index
    %c0_25 = arith.constant 0 : index
    %c0_26 = arith.constant 0 : index
    %90 = vector.load %arg5[%c0_24, %c0_25, %c0_26] : memref<1x512x320xbf16, #tpu.memory_space<vmem>>, vector<1x512x320xbf16>
    %91 = vector.shape_cast %90 : vector<1x512x320xbf16> to vector<512x320xbf16>
    %cst_27 = arith.constant dense<0.000000e+00> : vector<8x320xf32>
    %92 = tpu.matmul %89, %91, %cst_27 {dimension_numbers = #tpu.dot_dimension_numbers<[1], [0], [0], [1], [0, 0, 1, 1], [], []>} : vector<8x512xbf16>, vector<512x320xbf16>, vector<8x320xf32> -> vector<8x320xf32>
    %c0_28 = arith.constant 0 : index
    %c0_29 = arith.constant 0 : index
    %c0_30 = arith.constant 0 : index
    %93 = vector.load %arg6[%c0_28, %c0_29, %c0_30] : memref<1x1x320xf32, #tpu.memory_space<vmem>>, vector<1x1x320xf32>
    %94 = vector.shape_cast %93 : vector<1x1x320xf32> to vector<1x320xf32>
    %95 = vector.broadcast %94 : vector<1x320xf32> to vector<8x320xf32>
    %96 = arith.addf %92, %95 : vector<8x320xf32>
    %97 = arith.addf %3, %96 : vector<8x320xf32>
    %c0_31 = arith.constant 0 : index
    %c0_32 = arith.constant 0 : index
    %c0_33 = arith.constant 0 : index
    %98 = vector.load %arg7[%c0_31, %c0_32, %c0_33] : memref<1x1x320xf32, #tpu.memory_space<vmem>>, vector<1x1x320xf32>
    %99 = vector.shape_cast %98 : vector<1x1x320xf32> to vector<1x320xf32>
    %c0_34 = arith.constant 0 : index
    %c0_35 = arith.constant 0 : index
    %c0_36 = arith.constant 0 : index
    %100 = vector.load %arg8[%c0_34, %c0_35, %c0_36] : memref<1x1x320xf32, #tpu.memory_space<vmem>>, vector<1x1x320xf32>
    %101 = vector.shape_cast %100 : vector<1x1x320xf32> to vector<1x320xf32>
    %cst_37 = arith.constant dense<0.000000e+00> : vector<8xf32>
    %102 = vector.multi_reduction <add>, %97, %cst_37 [1] : vector<8x320xf32> to vector<8xf32>
    %103 = vector.shape_cast %102 : vector<8xf32> to vector<8x1xf32>
    %cst_38 = arith.constant 3.200000e+02 : f32
    %104 = vector.broadcast %cst_38 : f32 to vector<8x1xf32>
    %105 = arith.divf %103, %104 : vector<8x1xf32>
    %106 = vector.broadcast %105 : vector<8x1xf32> to vector<8x320xf32>
    %107 = arith.subf %97, %106 : vector<8x320xf32>
    %108 = arith.mulf %107, %107 : vector<8x320xf32>
    %cst_39 = arith.constant dense<0.000000e+00> : vector<8xf32>
    %109 = vector.multi_reduction <add>, %108, %cst_39 [1] : vector<8x320xf32> to vector<8xf32>
    %110 = vector.shape_cast %109 : vector<8xf32> to vector<8x1xf32>
    %cst_40 = arith.constant 3.200000e+02 : f32
    %111 = vector.broadcast %cst_40 : f32 to vector<8x1xf32>
    %112 = arith.divf %110, %111 : vector<8x1xf32>
    %113 = vector.broadcast %105 : vector<8x1xf32> to vector<8x320xf32>
    %114 = arith.subf %97, %113 : vector<8x320xf32>
    %cst_41 = arith.constant 9.99999974E-6 : f32
    %115 = vector.broadcast %cst_41 : f32 to vector<8x1xf32>
    %116 = arith.addf %112, %115 : vector<8x1xf32>
    %117 = math.rsqrt %116 : vector<8x1xf32>
    %118 = vector.broadcast %117 : vector<8x1xf32> to vector<8x320xf32>
    %119 = arith.mulf %114, %118 : vector<8x320xf32>
    %120 = vector.broadcast %99 : vector<1x320xf32> to vector<8x320xf32>
    %121 = arith.mulf %119, %120 : vector<8x320xf32>
    %122 = vector.broadcast %101 : vector<1x320xf32> to vector<8x320xf32>
    %123 = arith.addf %121, %122 : vector<8x320xf32>
    %124 = arith.truncf %123 : vector<8x320xf32> to vector<8x320xbf16>
    %c0_42 = arith.constant 0 : index
    %c0_43 = arith.constant 0 : index
    %c0_44 = arith.constant 0 : index
    %125 = vector.load %arg9[%c0_42, %c0_43, %c0_44] : memref<1x320x2048xbf16, #tpu.memory_space<vmem>>, vector<1x320x2048xbf16>
    %126 = vector.shape_cast %125 : vector<1x320x2048xbf16> to vector<320x2048xbf16>
    %cst_45 = arith.constant dense<0.000000e+00> : vector<8x2048xf32>
    %127 = tpu.matmul %124, %126, %cst_45 {dimension_numbers = #tpu.dot_dimension_numbers<[1], [0], [0], [1], [0, 0, 1, 1], [], []>} : vector<8x320xbf16>, vector<320x2048xbf16>, vector<8x2048xf32> -> vector<8x2048xf32>
    %c0_46 = arith.constant 0 : index
    %c0_47 = arith.constant 0 : index
    %c0_48 = arith.constant 0 : index
    %128 = vector.load %arg10[%c0_46, %c0_47, %c0_48] : memref<1x1x2048xf32, #tpu.memory_space<vmem>>, vector<1x1x2048xf32>
    %129 = vector.shape_cast %128 : vector<1x1x2048xf32> to vector<1x2048xf32>
    %130 = vector.broadcast %129 : vector<1x2048xf32> to vector<8x2048xf32>
    %131 = arith.addf %127, %130 : vector<8x2048xf32>
    %cst_49 = arith.constant 0.000000e+00 : f32
    %132 = vector.broadcast %cst_49 : f32 to vector<8x2048xf32>
    %133 = arith.maximumf %131, %132 : vector<8x2048xf32>
    %134 = arith.truncf %133 : vector<8x2048xf32> to vector<8x2048xbf16>
    %c0_50 = arith.constant 0 : index
    %c0_51 = arith.constant 0 : index
    %c0_52 = arith.constant 0 : index
    %135 = vector.load %arg11[%c0_50, %c0_51, %c0_52] : memref<1x2048x320xbf16, #tpu.memory_space<vmem>>, vector<1x2048x320xbf16>
    %136 = vector.shape_cast %135 : vector<1x2048x320xbf16> to vector<2048x320xbf16>
    %cst_53 = arith.constant dense<0.000000e+00> : vector<8x320xf32>
    %137 = tpu.matmul %134, %136, %cst_53 {dimension_numbers = #tpu.dot_dimension_numbers<[1], [0], [0], [1], [0, 0, 1, 1], [], []>} : vector<8x2048xbf16>, vector<2048x320xbf16>, vector<8x320xf32> -> vector<8x320xf32>
    %c0_54 = arith.constant 0 : index
    %c0_55 = arith.constant 0 : index
    %c0_56 = arith.constant 0 : index
    %138 = vector.load %arg12[%c0_54, %c0_55, %c0_56] : memref<1x1x320xf32, #tpu.memory_space<vmem>>, vector<1x1x320xf32>
    %139 = vector.shape_cast %138 : vector<1x1x320xf32> to vector<1x320xf32>
    %140 = vector.broadcast %139 : vector<1x320xf32> to vector<8x320xf32>
    %141 = arith.addf %137, %140 : vector<8x320xf32>
    %142 = arith.addf %123, %141 : vector<8x320xf32>
    %c0_57 = arith.constant 0 : index
    %c0_58 = arith.constant 0 : index
    %c0_59 = arith.constant 0 : index
    %143 = vector.load %arg13[%c0_57, %c0_58, %c0_59] : memref<1x1x320xf32, #tpu.memory_space<vmem>>, vector<1x1x320xf32>
    %144 = vector.shape_cast %143 : vector<1x1x320xf32> to vector<1x320xf32>
    %c0_60 = arith.constant 0 : index
    %c0_61 = arith.constant 0 : index
    %c0_62 = arith.constant 0 : index
    %145 = vector.load %arg14[%c0_60, %c0_61, %c0_62] : memref<1x1x320xf32, #tpu.memory_space<vmem>>, vector<1x1x320xf32>
    %146 = vector.shape_cast %145 : vector<1x1x320xf32> to vector<1x320xf32>
    %cst_63 = arith.constant dense<0.000000e+00> : vector<8xf32>
    %147 = vector.multi_reduction <add>, %142, %cst_63 [1] : vector<8x320xf32> to vector<8xf32>
    %148 = vector.shape_cast %147 : vector<8xf32> to vector<8x1xf32>
    %cst_64 = arith.constant 3.200000e+02 : f32
    %149 = vector.broadcast %cst_64 : f32 to vector<8x1xf32>
    %150 = arith.divf %148, %149 : vector<8x1xf32>
    %151 = vector.broadcast %150 : vector<8x1xf32> to vector<8x320xf32>
    %152 = arith.subf %142, %151 : vector<8x320xf32>
    %153 = arith.mulf %152, %152 : vector<8x320xf32>
    %cst_65 = arith.constant dense<0.000000e+00> : vector<8xf32>
    %154 = vector.multi_reduction <add>, %153, %cst_65 [1] : vector<8x320xf32> to vector<8xf32>
    %155 = vector.shape_cast %154 : vector<8xf32> to vector<8x1xf32>
    %cst_66 = arith.constant 3.200000e+02 : f32
    %156 = vector.broadcast %cst_66 : f32 to vector<8x1xf32>
    %157 = arith.divf %155, %156 : vector<8x1xf32>
    %158 = vector.broadcast %150 : vector<8x1xf32> to vector<8x320xf32>
    %159 = arith.subf %142, %158 : vector<8x320xf32>
    %cst_67 = arith.constant 9.99999974E-6 : f32
    %160 = vector.broadcast %cst_67 : f32 to vector<8x1xf32>
    %161 = arith.addf %157, %160 : vector<8x1xf32>
    %162 = math.rsqrt %161 : vector<8x1xf32>
    %163 = vector.broadcast %162 : vector<8x1xf32> to vector<8x320xf32>
    %164 = arith.mulf %159, %163 : vector<8x320xf32>
    %165 = vector.broadcast %144 : vector<1x320xf32> to vector<8x320xf32>
    %166 = arith.mulf %164, %165 : vector<8x320xf32>
    %167 = vector.broadcast %146 : vector<1x320xf32> to vector<8x320xf32>
    %168 = arith.addf %166, %167 : vector<8x320xf32>
    %c0_68 = arith.constant 0 : index
    %c0_69 = arith.constant 0 : index
    %169 = vector.load %arg16[%c0_68, %c0_69] : memref<8x320xf32, #tpu.memory_space<vmem>>, vector<8x320xf32>
    tpu.vector_store %arg16[%c0_68, %c0_69], %168 {strides = array<i32>} : memref<8x320xf32, #tpu.memory_space<vmem>>, vector<8x320xf32>,
    %c1_i32 = arith.constant 1 : i32
    %170 = arith.cmpi eq, %arg1, %c1_i32 : i32
    %171 = arith.extui %170 : i1 to i32
    %c0_i32_70 = arith.constant 0 : i32
    %172 = arith.cmpi ne, %171, %c0_i32_70 : i32
    scf.if %172 {
      %c0_71 = arith.constant 0 : index
      %c0_72 = arith.constant 0 : index
      %c0_73 = arith.constant 0 : index
      %173 = vector.load %arg15[%c0_71, %c0_72, %c0_73] : memref<1x8x320xf32, #tpu.memory_space<vmem>>, vector<1x8x320xf32>
      %174 = vector.shape_cast %173 : vector<1x8x320xf32> to vector<8x320xf32>
      %175 = vector.shape_cast %168 : vector<8x320xf32> to vector<1x8x320xf32>
      tpu.vector_store %arg15[%c0_71, %c0_72, %c0_73], %175 {strides = array<i32>} : memref<1x8x320xf32, #tpu.memory_space<vmem>>, vector<1x8x320xf32>,
    } else {
    }
    return
  }
  func.func @transform_0(%arg0: i32, %arg1: i32) -> (i32, i32, i32) {
    %c0_i32 = arith.constant 0 : i32
    %c0_i32_0 = arith.constant 0 : i32
    %c0_i32_1 = arith.constant 0 : i32
    return %arg0, %c0_i32, %c0_i32_0 : i32, i32, i32
  }
  func.func @transform_1(%arg0: i32, %arg1: i32) -> (i32, i32, i32) {
    %c0_i32 = arith.constant 0 : i32
    %c0_i32_0 = arith.constant 0 : i32
    %c0_i32_1 = arith.constant 0 : i32
    return %arg1, %c0_i32, %c0_i32_0 : i32, i32, i32
  }
  func.func @transform_2(%arg0: i32, %arg1: i32) -> (i32, i32, i32) {
    %c0_i32 = arith.constant 0 : i32
    %c0_i32_0 = arith.constant 0 : i32
    %c0_i32_1 = arith.constant 0 : i32
    return %arg1, %c0_i32, %c0_i32_0 : i32, i32, i32
  }
  func.func @transform_3(%arg0: i32, %arg1: i32) -> (i32, i32, i32) {
    %c0_i32 = arith.constant 0 : i32
    %c0_i32_0 = arith.constant 0 : i32
    %c0_i32_1 = arith.constant 0 : i32
    return %arg1, %c0_i32, %c0_i32_0 : i32, i32, i32
  }
  func.func @transform_4(%arg0: i32, %arg1: i32) -> (i32, i32, i32) {
    %c0_i32 = arith.constant 0 : i32
    %c0_i32_0 = arith.constant 0 : i32
    %c0_i32_1 = arith.constant 0 : i32
    return %arg1, %c0_i32, %c0_i32_0 : i32, i32, i32
  }
  func.func @transform_5(%arg0: i32, %arg1: i32) -> (i32, i32, i32) {
    %c0_i32 = arith.constant 0 : i32
    %c0_i32_0 = arith.constant 0 : i32
    %c0_i32_1 = arith.constant 0 : i32
    return %arg1, %c0_i32, %c0_i32_0 : i32, i32, i32
  }
  func.func @transform_6(%arg0: i32, %arg1: i32) -> (i32, i32, i32) {
    %c0_i32 = arith.constant 0 : i32
    %c0_i32_0 = arith.constant 0 : i32
    %c0_i32_1 = arith.constant 0 : i32
    return %arg1, %c0_i32, %c0_i32_0 : i32, i32, i32
  }
  func.func @transform_7(%arg0: i32, %arg1: i32) -> (i32, i32, i32) {
    %c0_i32 = arith.constant 0 : i32
    %c0_i32_0 = arith.constant 0 : i32
    %c0_i32_1 = arith.constant 0 : i32
    return %arg1, %c0_i32, %c0_i32_0 : i32, i32, i32
  }
  func.func @transform_8(%arg0: i32, %arg1: i32) -> (i32, i32, i32) {
    %c0_i32 = arith.constant 0 : i32
    %c0_i32_0 = arith.constant 0 : i32
    %c0_i32_1 = arith.constant 0 : i32
    return %arg1, %c0_i32, %c0_i32_0 : i32, i32, i32
  }
  func.func @transform_9(%arg0: i32, %arg1: i32) -> (i32, i32, i32) {
    %c0_i32 = arith.constant 0 : i32
    %c0_i32_0 = arith.constant 0 : i32
    %c0_i32_1 = arith.constant 0 : i32
    return %arg1, %c0_i32, %c0_i32_0 : i32, i32, i32
  }
  func.func @transform_10(%arg0: i32, %arg1: i32) -> (i32, i32, i32) {
    %c0_i32 = arith.constant 0 : i32
    %c0_i32_0 = arith.constant 0 : i32
    %c0_i32_1 = arith.constant 0 : i32
    return %arg1, %c0_i32, %c0_i32_0 : i32, i32, i32
  }
  func.func @transform_11(%arg0: i32, %arg1: i32) -> (i32, i32, i32) {
    %c0_i32 = arith.constant 0 : i32
    %c0_i32_0 = arith.constant 0 : i32
    %c0_i32_1 = arith.constant 0 : i32
    return %arg1, %c0_i32, %c0_i32_0 : i32, i32, i32
  }
  func.func @transform_12(%arg0: i32, %arg1: i32) -> (i32, i32, i32) {
    %c0_i32 = arith.constant 0 : i32
    %c0_i32_0 = arith.constant 0 : i32
    %c0_i32_1 = arith.constant 0 : i32
    return %arg1, %c0_i32, %c0_i32_0 : i32, i32, i32
  }
  func.func @transform_13(%arg0: i32, %arg1: i32) -> (i32, i32, i32) {
    %c0_i32 = arith.constant 0 : i32
    %c0_i32_0 = arith.constant 0 : i32
    %c0_i32_1 = arith.constant 0 : i32
    return %arg0, %c0_i32, %c0_i32_0 : i32, i32, i32
  }
}

module attributes {stable_mosaic.version = 11 : i64} {
  func.func @_head_kernel(%arg0: i32, %arg1: memref<1x8x320xf32, #tpu.memory_space<vmem>>, %arg2: memref<320x128xbf16, #tpu.memory_space<vmem>>, %arg3: memref<1x128xf32, #tpu.memory_space<vmem>>, %arg4: memref<1x128xf32, #tpu.memory_space<vmem>>, %arg5: memref<1x1xf32, #tpu.memory_space<vmem>>, %arg6: memref<1x1x1xf32, #tpu.memory_space<vmem>>) attributes {dimension_semantics = [#tpu.dimension_semantics<parallel>], iteration_bounds = array<i64: 2>, scalar_prefetch = 0 : i64, scratch_operands = 0 : i64, tpu.core_type = #tpu.core_type<tc>, window_params = [{transform_indices = @transform_0, window_bounds = array<i64: 1, 8, 320>}, {pipeline_mode = #tpu.pipeline_mode<synchronous>, transform_indices = @transform_1, window_bounds = array<i64: 320, 128>}, {pipeline_mode = #tpu.pipeline_mode<synchronous>, transform_indices = @transform_2, window_bounds = array<i64: 1, 128>}, {pipeline_mode = #tpu.pipeline_mode<synchronous>, transform_indices = @transform_3, window_bounds = array<i64: 1, 128>}, {pipeline_mode = #tpu.pipeline_mode<synchronous>, transform_indices = @transform_4, window_bounds = array<i64: 1, 1>}, {transform_indices = @transform_5, window_bounds = array<i64: 1, 1, 1>}]} {
    %c0 = arith.constant 0 : index
    %c0_0 = arith.constant 0 : index
    %c0_1 = arith.constant 0 : index
    %0 = vector.load %arg1[%c0, %c0_0, %c0_1] : memref<1x8x320xf32, #tpu.memory_space<vmem>>, vector<1x8x320xf32>
    %1 = vector.shape_cast %0 : vector<1x8x320xf32> to vector<8x320xf32>
    %2 = arith.truncf %1 : vector<8x320xf32> to vector<8x320xbf16>
    %c0_2 = arith.constant 0 : index
    %c0_3 = arith.constant 0 : index
    %3 = vector.load %arg2[%c0_2, %c0_3] : memref<320x128xbf16, #tpu.memory_space<vmem>>, vector<320x128xbf16>
    %cst = arith.constant dense<0.000000e+00> : vector<8x128xf32>
    %4 = tpu.matmul %2, %3, %cst {dimension_numbers = #tpu.dot_dimension_numbers<[1], [0], [0], [1], [0, 0, 1, 1], [], []>} : vector<8x320xbf16>, vector<320x128xbf16>, vector<8x128xf32> -> vector<8x128xf32>
    %c0_4 = arith.constant 0 : index
    %c0_5 = arith.constant 0 : index
    %5 = vector.load %arg3[%c0_4, %c0_5] : memref<1x128xf32, #tpu.memory_space<vmem>>, vector<1x128xf32>
    %6 = vector.broadcast %5 : vector<1x128xf32> to vector<8x128xf32>
    %7 = arith.addf %4, %6 : vector<8x128xf32>
    %cst_6 = arith.constant 0.000000e+00 : f32
    %8 = vector.broadcast %cst_6 : f32 to vector<8x128xf32>
    %9 = arith.maximumf %7, %8 : vector<8x128xf32>
    %cst_7 = arith.constant dense<0.000000e+00> : vector<128xf32>
    %10 = vector.multi_reduction <add>, %9, %cst_7 [0] : vector<8x128xf32> to vector<128xf32>
    %11 = vector.shape_cast %10 : vector<128xf32> to vector<1x128xf32>
    %cst_8 = arith.constant 8.000000e+00 : f32
    %12 = vector.broadcast %cst_8 : f32 to vector<1x128xf32>
    %13 = arith.divf %11, %12 : vector<1x128xf32>
    %c0_9 = arith.constant 0 : index
    %c0_10 = arith.constant 0 : index
    %14 = vector.load %arg4[%c0_9, %c0_10] : memref<1x128xf32, #tpu.memory_space<vmem>>, vector<1x128xf32>
    %15 = arith.mulf %13, %14 : vector<1x128xf32>
    %cst_11 = arith.constant dense<0.000000e+00> : vector<1xf32>
    %16 = vector.multi_reduction <add>, %15, %cst_11 [1] : vector<1x128xf32> to vector<1xf32>
    %17 = vector.shape_cast %16 : vector<1xf32> to vector<1x1xf32>
    %c0_12 = arith.constant 0 : index
    %c0_13 = arith.constant 0 : index
    %18 = vector.load %arg5[%c0_12, %c0_13] : memref<1x1xf32, #tpu.memory_space<vmem>>, vector<1x1xf32>
    %19 = arith.addf %17, %18 : vector<1x1xf32>
    %c0_14 = arith.constant 0 : index
    %c0_15 = arith.constant 0 : index
    %c0_16 = arith.constant 0 : index
    %20 = vector.load %arg6[%c0_14, %c0_15, %c0_16] : memref<1x1x1xf32, #tpu.memory_space<vmem>>, vector<1x1x1xf32>
    %21 = vector.shape_cast %20 : vector<1x1x1xf32> to vector<1x1xf32>
    %22 = vector.shape_cast %19 : vector<1x1xf32> to vector<1x1x1xf32>
    tpu.vector_store %arg6[%c0_14, %c0_15, %c0_16], %22 {strides = array<i32>} : memref<1x1x1xf32, #tpu.memory_space<vmem>>, vector<1x1x1xf32>,
    return
  }
  func.func @transform_0(%arg0: i32) -> (i32, i32, i32) {
    %c0_i32 = arith.constant 0 : i32
    %c0_i32_0 = arith.constant 0 : i32
    %c0_i32_1 = arith.constant 0 : i32
    return %arg0, %c0_i32, %c0_i32_0 : i32, i32, i32
  }
  func.func @transform_1(%arg0: i32) -> (i32, i32) {
    %c0_i32 = arith.constant 0 : i32
    %c0_i32_0 = arith.constant 0 : i32
    %c0_i32_1 = arith.constant 0 : i32
    return %c0_i32, %c0_i32_0 : i32, i32
  }
  func.func @transform_2(%arg0: i32) -> (i32, i32) {
    %c0_i32 = arith.constant 0 : i32
    %c0_i32_0 = arith.constant 0 : i32
    %c0_i32_1 = arith.constant 0 : i32
    return %c0_i32, %c0_i32_0 : i32, i32
  }
  func.func @transform_3(%arg0: i32) -> (i32, i32) {
    %c0_i32 = arith.constant 0 : i32
    %c0_i32_0 = arith.constant 0 : i32
    %c0_i32_1 = arith.constant 0 : i32
    return %c0_i32, %c0_i32_0 : i32, i32
  }
  func.func @transform_4(%arg0: i32) -> (i32, i32) {
    %c0_i32 = arith.constant 0 : i32
    %c0_i32_0 = arith.constant 0 : i32
    %c0_i32_1 = arith.constant 0 : i32
    return %c0_i32, %c0_i32_0 : i32, i32
  }
  func.func @transform_5(%arg0: i32) -> (i32, i32, i32) {
    %c0_i32 = arith.constant 0 : i32
    %c0_i32_0 = arith.constant 0 : i32
    %c0_i32_1 = arith.constant 0 : i32
    return %arg0, %c0_i32, %c0_i32_0 : i32, i32, i32
  }
}

</mosaic_0001>

<bundles_post_ra>
// kernel: protein_gat_transformer_forward.3
= control target key start
LH: loop header
LB: loop body
LE: loop exit
PB: predicated region body
PF: predicated region fallthrough
CT: control target
= control target key end

     0   :  { %s690_s20 = smov 0   ;;  %s777_s0 = inlined_call_operand.vmem [shape: f32[2,8,320], index: 0, kind: input, shape index: {}]   ;;  %s778_s1 = inlined_call_operand.vmem [shape: bf16[320,128], index: 1, kind: input, shape index: {}]   ;;  %s779_s2 = inlined_call_operand.vmem [shape: f32[1,128], index: 2, kind: input, shape index: {}]   ;;  %s780_s3 = inlined_call_operand.vmem [shape: f32[1,128], index: 3, kind: input, shape index: {}]   ;;  %s781_s4 = inlined_call_operand.<no memory space> [shape: f32[1,1], index: 4, kind: input, shape index: {}]   ;;  %s782_s5 = inlined_call_operand.vmem [shape: f32[2,1,1], index: 5, kind: output, shape index: {}]  }
   0x1   :  { %v10_v0 = vstv %s781_s4 }
   0x2   :  { %11 = vst [vmem:[#allocation2] sm:$0x1] %v10_v0 }
   0x3 LB: > { %s547_s21 = sadd.s32 4294967295, %s653_s20   ;;  %p551_p0 = scmp.ge.s32.totalorder %s653_s20, 1  ;;  %s653_s20 = sphi %s690_s20, %s17_s20  }
   0x4   : > { %p189_p1 = scmp.lt.s32.totalorder %s653_s20, 3 }
   0x6   : > { %p190_p2 = pnand %p551_p0, %p189_p1 }
   0x7   : > { %v627_v1 = vld [vmem:[%s778_s1 + $0x40] sm:$0xff] (!%p190_p2)   ;;  %v655_v3 = vmov (!%p190_p2), 0.0   ;;  %v629_v4 = vld [vmem:[%s778_s1 + $0x48] sm:$0xff] (!%p190_p2)   ;;  %vm656_vm0 = vmmov (!%p190_p2), 0   ;;  %v631_v6 = vld [vmem:[%s778_s1 + $0x50] sm:$0xff] (!%p190_p2)   ;;  %p215_p3 = scmp.lt.s32.totalorder (!%p190_p2), %s547_s21, 1 }
   0x8   : > { %193 = sbr.rel (%p190_p2) target bundleno = 423 (0x1a7), region = 40  ;;  %v628_v2 = vld [vmem:[%s778_s1] sm:$0xff] (!%p190_p2)   ;;  %604 = vmatprep.subr.bf16.mxu1 (!%p190_p2), %v655_v3  ;;  %577 = vmatprep.subr.bf16.mxu0 (!%p190_p2), %v627_v1  ;;  %v630_v5 = vld [vmem:[%s778_s1 + $0x8] sm:$0xff] (!%p190_p2)   ;;  %v632_v7 = vld [vmem:[%s778_s1 + $0x10] sm:$0xff] (!%p190_p2)   ;;  %vm397_vm1 = vcmask (!%p190_p2), 523264   ;;  %vm492_vm2 = vcmask (!%p190_p2), 1040384  }
   0x9   : > { %578 = vmatpush3.bf16.msra.mxu0 (!%p190_p2), %v628_v2  ;;  %612 = vmatprep.mubr.msk.bf16.mxu1 (!%p190_p2), %vm656_vm0, %v655_v3  ;;  %v633_v8 = vld [vmem:[%s778_s1 + $0x58] sm:$0xff] (!%p190_p2)   ;;  %v637_v9 = vld [vmem:[%s778_s1 + $0x80] sm:$0xff] (!%p190_p2)   ;;  %v640_v12 = vld [vmem:[%s778_s1 + $0x88] sm:$0xff] (!%p190_p2)   ;;  %vm498_vm3 = vcmask (!%p190_p2), 0  }
   0xa   : > { %579 = vmatprep.subr.bf16.mxu0 (!%p190_p2), %v629_v4  ;;  %v634_v10 = vld [vmem:[%s778_s1 + $0x18] sm:$0xff] (!%p190_p2)   ;;  %v635_v11 = vld [vmem:[%s778_s1 + $0x60] sm:$0xff] (!%p190_p2)   ;;  %605 = vmatpush3.bf16.msra.mxu1 (!%p190_p2), %v637_v9  ;;  %v638_v14 = vld [vmem:[%s778_s1 + $0x68] sm:$0xff] (!%p190_p2)  }
   0xb   : > { %606 = vmatprep.subr.bf16.mxu1 (!%p190_p2), %v655_v3  ;;  %v636_v13 = vld [vmem:[%s778_s1 + $0x20] sm:$0xff] (!%p190_p2)   ;;  %v643_v15 = vld [vmem:[%s778_s1 + $0x90] sm:$0xff] (!%p190_p2)   ;;  %v639_v16 = vld [vmem:[%s778_s1 + $0x28] sm:$0xff] (!%p190_p2)  }
   0xc   : > { %v641_v17 = vld [vmem:[%s778_s1 + $0x70] sm:$0xff] (!%p190_p2)   ;;  %v646_v21 = vld [vmem:[%s778_s1 + $0x98] sm:$0xff] (!%p190_p2)   ;;  %v553_v34 = vld [vmem:[%s779_s2] ss:$0 sm:$0xff] (!%p190_p2) }
   0xd   : > { %580 = vmatpush3.bf16.msra.mxu0 (!%p190_p2), %v630_v5  ;;  %v642_v22 = vld [vmem:[%s778_s1 + $0x30] sm:$0xff] (!%p190_p2)   ;;  %v644_v24 = vld [vmem:[%s778_s1 + $0x78] sm:$0xff] (!%p190_p2)   ;;  %v490_v47 = vld [vmem:[%s780_s3] sm:$0x1] (!%p190_p2) }
   0xe   : > { %581 = vmatprep.subr.bf16.mxu0 (!%p190_p2), %v631_v6  ;;  %607 = vmatpush3.bf16.msra.mxu1 (!%p190_p2), %v640_v12  ;;  %v645_v25 = vld [vmem:[%s778_s1 + $0x38] sm:$0xff] (!%p190_p2)   ;;  %v496_v51 = vld [vmem:[#allocation2] sm:$0x1] (!%p190_p2) }
   0xf   : > { %s784_s21 = smov (!%p215_p3, %s547_s21), 1  ;;  %608 = vmatprep.subr.bf16.mxu1 %v655_v3 }
  0x10   : > { %s616_s16 = smul.u32 24, %s784_s21  ;;  %s222_s4 = scalar_lea.vmem %s782_s5, %s784_s21 }
  0x11   : > { %582 = vmatpush3.bf16.msra.mxu0 %v632_v7 }
  0x12   : > { %583 = vmatprep.subr.bf16.mxu0 %v633_v8  ;;  %s219_s28 = scalar_lea.vmem %s777_s0, %s616_s16  ;;  %609 = vmatpush3.bf16.msra.mxu1 %v643_v15 }
  0x13   : > { %v225_v18 = vld [vmem:[%s219_s28 + $0x8] sm:$0xff]  ;;  %v226_v19 = vld [vmem:[%s219_s28 + $0x10] sm:$0xff]  ;;  %610 = vmatprep.subr.bf16.mxu1 %v655_v3  ;;  %v224_v26 = vld [vmem:[%s219_s28] sm:$0xff] }
  0x14   : > { %v228_v20 = vpack.c.bf16 %v225_v18, %v225_v18  ;;  %v229_v23 = vpack.c.bf16 %v226_v19, %v226_v19  ;;  %v227_v27 = vpack.c.bf16 %v224_v26, %v224_v26 }
  0x15   : > { %584 = vmatpush3.bf16.msra.mxu0 %v634_v10 }
  0x16   : > { %585 = vmatprep.subr.bf16.mxu0 %v635_v11  ;;  %433 = vmatprep.mubr.bf16.mxu0 %v228_v20 }
  0x17   : > { %611 = vmatpush3.bf16.msra.mxu1 %v646_v21 }
  0x19   : > { %586 = vmatpush3.bf16.msra.mxu0 %v636_v13 }
  0x1a   : > { %587 = vmatprep.subr.bf16.mxu0 %v638_v14  ;;  %613 = vmatmul.mubr.msk.bf16.vlgmr.msra.gmra.mrb[0].mxu1 %vm397_vm1, %v229_v23 }
  0x1d   : > { %588 = vmatpush3.bf16.msra.mxu0 %v639_v16 }
  0x1e   : > { %589 = vmatprep.subr.bf16.mxu0 %v641_v17 }
  0x21   : > { %590 = vmatpush3.bf16.msra.mxu0 %v642_v22 }
  0x22   : > { %591 = vmatprep.subr.bf16.mxu0 %v644_v24 }
  0x25   : > { %592 = vmatpush3.bf16.msra.mxu0 %v645_v25 }
  0x28   : > { %434 = vmatmul.mubr.bf16.vlgmr.msra.gmra.mrb[0].mxu0 %v227_v27 }
  0xed   : > { %v475_v28 = vpop.f32.mrb[0].mxu1 }
  0xee   : > { %v614_v29 = vpop.f32.mrb[1].mxu1 }
  0xef   : > { %v478_v30 = vpop.f32.mrb[2].mxu1 }
  0xf0   : > { %v615_v31 = vpop.f32.mrb[3].mxu1 }
  0xfb   : > { %v593_v32 = vpop.f32.mrb[0].mxu0 }
  0xfc   : > { %v594_v33 = vpop.f32.mrb[1].mxu0 }
  0xfd   : > { %v595_v35 = vadd.f32 %v594_v33, %v593_v32  ;;  %v596_v36 = vpop.f32.mrb[2].mxu0 }
  0xfe   : > { %v597_v37 = vpop.f32.mrb[3].mxu0 }
  0xff   : > { %v436_v38 = vadd.f32 %v595_v35, %v553_v34 }
 0x101   : > { %v476_v39 = vadd.f32 %v475_v28, %v436_v38 }
 0x103   : > { %v481_v40 = vmax.f32 %v476_v39, 0.0 }
 0x105   : > { %v482_v41 = vrot.slane %v481_v40, 4 }
 0x107   : > { %v483_v42 = vadd.f32 %v482_v41, %v481_v40 }
 0x109   : > { %v484_v43 = vrot.slane %v483_v42, 2 }
 0x10b   : > { %v485_v44 = vadd.f32 %v484_v43, %v483_v42 }
 0x10d   : > { %v486_v45 = vrot.slane %v485_v44, 1 }
 0x10f   : > { %v487_v46 = vadd.f32 %v486_v45, %v485_v44 }
 0x111   : > { %v489_v48 = vmul.f32 0.125, %v487_v46 }
 0x113   : > { %v491_v49 = vmul.f32 %v490_v47, %v489_v48 }
 0x115   : > { %v493_v50 = vsel %vm492_vm2, %v491_v49, 0.0 }
 0x116   : > { %494 = vadd.xlane.f32.xlu0 %v493_v50 }
 0x1a3   : > { %v495_v52 = vpop.xlane.xlu0 %494 }
 0x1a4   : > { %v497_v53 = vadd.f32 %v496_v51, %v495_v52 }
 0x1a6   : > { %499 = vst.msk [vmem:[%s222_s4] sm:$0x1] %vm498_vm3, %v497_v53 }
 0x1a7 PF: > { %s17_s20 = sadd.s32 1, %s653_s20  }
 0x1a8   : > { %p14_p4 = scmp.ge.s32.totalorder %s17_s20, 4  }
 0x1aa   :  { %16 = sbr.rel (!%p14_p4) target bundleno = 3 (0x3), region = 70 }

// kernel: protein_gat_transformer_forward.2
= control target key start
LH: loop header
LB: loop body
LE: loop exit
PB: predicated region body
PF: predicated region fallthrough
CT: control target
= control target key end

     0   :  { %s12820_s25 = smov 0   ;;  %s12822_s26 = smov 0   ;;  %s14437_s0 = inlined_call_operand.vmem [shape: f32[2,8,320], index: 0, kind: input, shape index: {}]   ;;  %s14438_s1 = inlined_call_operand.vmem [shape: bf16[2,320,1536], index: 1, kind: input, shape index: {}]   ;;  %s14439_s2 = inlined_call_operand.vmem [shape: f32[2,1,1536], index: 2, kind: input, shape index: {}]   ;;  %s14440_s3 = inlined_call_operand.vmem [shape: bf16[2,512,320], index: 3, kind: input, shape index: {}]   ;;  %s14441_s4 = inlined_call_operand.vmem [shape: f32[2,1,320], index: 4, kind: input, shape index: {}]   ;;  %s14442_s5 = inlined_call_operand.vmem [shape: f32[2,1,320], index: 5, kind: input, shape index: {}]   ;;  %s14443_s6 = inlined_call_operand.vmem [shape: f32[2,1,320], index: 6, kind: input, shape index: {}]   ;;  %s14444_s7 = inlined_call_operand.vmem [shape: bf16[2,320,2048], index: 7, kind: input, shape index: {}]   ;;  %s14445_s8 = inlined_call_operand.vmem [shape: f32[2,1,2048], index: 8, kind: input, shape index: {}]   ;;  %s14446_s9 = inlined_call_operand.vmem [shape: bf16[2,2048,320], index: 9, kind: input, shape index: {}]   ;;  %s14447_s10 = inlined_call_operand.vmem [shape: f32[2,1,320], index: 10, kind: input, shape index: {}]   ;;  %s14448_s11 = inlined_call_operand.vmem [shape: f32[2,1,320], index: 11, kind: input, shape index: {}]   ;;  %s14449_s12 = inlined_call_operand.vmem [shape: f32[2,1,320], index: 12, kind: input, shape index: {}]   ;;  %s14450_s13 = inlined_call_operand.vmem [shape: f32[2,8,320], index: 13, kind: output, shape index: {}]  }
   0x1   :  { %14457 = sst [smem:[#allocation11_spill]] %s14437_s0  ;;  %s12824_s27 = smov 0  }
   0x2   :  { %14458 = sst [smem:[#allocation12_spill]] %s14438_s1  ;;  %s12826_s28 = smov 0  }
   0x3   :  { %14459 = sst [smem:[#allocation13_spill]] %s14439_s2  ;;  %s12828_s29 = smov 0  }
   0x4   :  { %14460 = sst [smem:[#allocation14_spill]] %s14440_s3 }
   0x5   :  { %14461 = sst [smem:[#allocation15_spill]] %s14444_s7 }
   0x6   :  { %14462 = sst [smem:[#allocation16_spill]] %s14450_s13 }
   0x7 LB: > { %14463 = sst [smem:[#allocation3_spill]] %s12729_s25  ;;  %s32_s30 = sadd.s32 1, %s12737_s27  ;;  %s12745_s29 = sphi %s12828_s29, %s23_s29   ;;  %s12741_s28 = sphi %s12826_s28, %s14488_s28   ;;  %s12737_s27 = sphi %s12824_s27, %s14487_s27   ;;  %s12733_s26 = sphi %s12822_s26, %s14486_s26   ;;  %s12729_s25 = sphi %s12820_s25, %s14485_s25  }
   0x8   : > { %14464 = sst [smem:[#allocation4_spill]] %s12737_s27  ;;  %s35_s14 = sadd.s32 1, %s12741_s28 }
   0x9   : > { %14465 = sst [smem:[#allocation5_spill]] %s12741_s28  ;;  %p33_p0 = scmp.ge.s32.totalorder %s32_s30, 2 }
   0xa   : > { %14466 = sst [smem:[#allocation6_spill]] %s12745_s29  ;;  %p10196_p1 = scmp.ge.s32.totalorder %s12745_s29, 1 }
   0xb   : > { %p511_p2 = scmp.lt.s32.totalorder %s12745_s29, 5  ;;  %s14490_s30 = smov (%p33_p0, %s32_s30), 0 }
   0xc   : > { %14467 = sst [smem:[#allocation7_spill]] %s14490_s30  ;;  %s14492_s14 = smov (!%p33_p0, %s35_s14), %s12741_s28 }
   0xd   : > { %p512_p3 = pnand %p10196_p1, %p511_p2  ;;  %p37_p4 = scmp.ge.s32.totalorder %s14492_s14, 2 }
   0xf   : > { %s14494_s14 = smov (%p37_p4, %s14492_s14), 0  ;;  %515 = sbr.rel (%p512_p3) target bundleno = 2957 (0xb8d), region = 72 }
  0x10   : > { %14468 = sst [smem:[#allocation8_spill]] %s14494_s14 }
  0x16   : > { %p607_p5 = scmp.lt.s32.totalorder %s12733_s26, 1  ;;  %p612_p6 = scmp.lt.s32.totalorder %s12729_s25, 1 }
  0x17   : > { %s14469_s0 = sld [smem:[#allocation11_spill]]  ;;  %s14470_s1 = sld [smem:[#allocation12_spill]] }
  0x18   : > { %s14496_s26 = smov (!%p607_p5, %s12733_s26), 1  ;;  %s14471_s2 = sld [smem:[#allocation13_spill]] }
  0x19   : > { %s613_s15 = scalar_select %p612_p6, %s12729_s25, 1 }
  0x1a   : > { %s11634_s16 = smul.u32 24, %s14496_s26  ;;  %s14473_s3 = sld [smem:[#allocation14_spill]] }
  0x1b   : > { %s11635_s17 = smul.u32 1920, %s613_s15  ;;  %s10201_s18 = sshll.u32 %s613_s15, 4 }
  0x1c   : > { %s11636_s22 = smul.u32 12, %s613_s15  ;;  %s14475_s7 = sld [smem:[#allocation15_spill]] }
  0x1d   : > { %s611_s21 = scalar_lea.vmem %s14469_s0, %s11634_s16  ;;  %s12860_s30 = scalar_lea.vmem %s14470_s1, %s11635_s17 }
  0x1e   : > { %s11637_s14 = smul.u32 768, %s613_s15  ;;  %s12865_s29 = scalar_lea.vmem %s14471_s2, %s11636_s22 }
  0x1f   : > { %14472 = sst [smem:[#allocation9_spill]] %s12865_s29  ;;  %s12867_s25 = smul.u32 3, %s613_s15 }
  0x20   : > { %s12872_s19 = scalar_lea.vmem %s14473_s3, %s11637_s14  ;;  %s11639_s17 = smul.u32 2560, %s613_s15 }
  0x21   : > { %14474 = sst [smem:[#allocation10_spill]] %s12872_s19  ;;  %s12894_s19 = scalar_lea.vmem %s14445_s8, %s10201_s18 }
  0x22   : > { %s12889_s29 = scalar_lea.vmem %s14475_s7, %s11639_s17  ;;  %s11640_s20 = smul.u32 3072, %s613_s15 }
  0x23   : > { %s655_s28 = scalar_lea.vmem %s14447_s10, %s12867_s25  ;;  %s659_s0 = scalar_lea.vmem %s14448_s11, %s12867_s25 }
  0x24   : > { %s12907_s2 = scalar_lea.vmem %s14446_s9, %s11640_s20  ;;  %s663_s3 = scalar_lea.vmem %s14449_s12, %s12867_s25 }
  0x25   : > { %s14476_s15 = sld [smem:[#allocation16_spill]]  ;;  %s14477_s27 = sld [smem:[#allocation3_spill]] }
  0x2b   : > { %s12916_s7 = scalar_lea.vmem %s14476_s15, %s11634_s16  ;;  %p10204_p7 = scmp.ne.s32.totalorder %s14477_s27, 0 }
  0x2c   : > { %v674_v0 = vld [vmem:[%s611_s21] sm:$0xff] (!%p10204_p7)  ;;  %v675_v1 = vld [vmem:[%s611_s21 + $0x8] sm:$0xff] (!%p10204_p7)  ;;  %v676_v2 = vld [vmem:[%s611_s21 + $0x10] sm:$0xff] (!%p10204_p7)  ;;  %vm679_vm0 = vcmask (!%p10204_p7), 523264  }
  0x2d   : > { %673 = sbr.rel (%p10204_p7) target bundleno = 52 (0x34), region = 76  ;;  %677 = vst [vmem:[#allocation2] sm:$0xff] (!%p10204_p7), %v674_v0  ;;  %678 = vst [vmem:[#allocation2 + $0x8] sm:$0xff] (!%p10204_p7), %v675_v1 }
  0x2e   : > { %680 = vst.msk [vmem:[#allocation2 + $0x10] sm:$0xff] (!%p10204_p7), %vm679_vm0, %v676_v2 }
  0x34 PF: > { %v11684_v3 = vld [vmem:[%s12860_s30 + $0x4] ss:$48 sps:$4 sm:$0xff]   ;;  %v11686_v4 = vld [vmem:[%s12860_s30 + $0xc] ss:$48 sps:$4 sm:$0xff]   ;;  %v11688_v5 = vld [vmem:[%s12860_s30] ss:$48 sps:$4 sm:$0xff]   ;;  %s14480_s13 = scalar_lea.vmem %s14441_s4, %s12867_s25  ;;  %s14481_s22 = scalar_lea.vmem %s14442_s5, %s12867_s25 }
  0x35   : > { %2195 = vmatprep.subr.bf16.mxu0 %v11684_v3  ;;  %v11689_v6 = vld [vmem:[%s12860_s30 + $0x8] ss:$48 sps:$4 sm:$0xff]   ;;  %2277 = vmatprep.subr.bf16.mxu1 %v11686_v4  ;;  %v11690_v7 = vld [vmem:[%s12860_s30 + $0x64] ss:$48 sps:$4 sm:$0xff]   ;;  %v11692_v8 = vld [vmem:[%s12860_s30 + $0x6c] ss:$48 sps:$4 sm:$0xff]   ;;  %s14482_s26 = scalar_lea.vmem %s14443_s6, %s12867_s25 }
  0x36   : > { %2196 = vmatpush1.bf16.msra.mxu0 %v11688_v5  ;;  %2278 = vmatpush1.bf16.msra.mxu1 %v11689_v6  ;;  %v11694_v9 = vld [vmem:[%s12860_s30 + $0x60] ss:$48 sps:$4 sm:$0xff]   ;;  %v11695_v10 = vld [vmem:[%s12860_s30 + $0x68] ss:$48 sps:$4 sm:$0xff]   ;;  %v11696_v11 = vld [vmem:[%s12860_s30 + $0xc4] ss:$48 sps:$4 sm:$0xff]  }
  0x37   : > { %2197 = vmatprep.subr.bf16.mxu0 %v11690_v7  ;;  %2279 = vmatprep.subr.bf16.mxu1 %v11692_v8  ;;  %v11698_v12 = vld [vmem:[%s12860_s30 + $0xcc] ss:$48 sps:$4 sm:$0xff]   ;;  %v11700_v13 = vld [vmem:[%s12860_s30 + $0xc0] ss:$48 sps:$4 sm:$0xff]   ;;  %v11701_v14 = vld [vmem:[%s12860_s30 + $0xc8] ss:$48 sps:$4 sm:$0xff]  }
  0x38   : > { %v11702_v15 = vld [vmem:[%s12860_s30 + $0x124] ss:$48 sps:$4 sm:$0xff]   ;;  %v11704_v16 = vld [vmem:[%s12860_s30 + $0x12c] ss:$48 sps:$4 sm:$0xff]   ;;  %v11706_v17 = vld [vmem:[%s12860_s30 + $0x120] ss:$48 sps:$4 sm:$0xff]  }
  0x39   : > { %v11707_v18 = vld [vmem:[%s12860_s30 + $0x128] ss:$48 sps:$4 sm:$0xff]   ;;  %v11708_v19 = vld [vmem:[%s12860_s30 + $0x184] ss:$48 sps:$4 sm:$0xff]   ;;  %v11710_v20 = vld [vmem:[%s12860_s30 + $0x18c] ss:$48 sps:$4 sm:$0xff]  }
  0x3a   : > { %2198 = vmatpush1.bf16.msra.mxu0 %v11694_v9  ;;  %2280 = vmatpush1.bf16.msra.mxu1 %v11695_v10  ;;  %v11712_v21 = vld [vmem:[%s12860_s30 + $0x180] ss:$48 sps:$4 sm:$0xff]   ;;  %v11713_v22 = vld [vmem:[%s12860_s30 + $0x188] ss:$48 sps:$4 sm:$0xff]   ;;  %v11714_v23 = vld [vmem:[%s12860_s30 + $0x1e4] ss:$48 sps:$4 sm:$0xff]  }
  0x3b   : > { %2199 = vmatprep.subr.bf16.mxu0 %v11696_v11  ;;  %2281 = vmatprep.subr.bf16.mxu1 %v11698_v12  ;;  %v11716_v24 = vld [vmem:[%s12860_s30 + $0x1ec] ss:$48 sps:$4 sm:$0xff]   ;;  %v11718_v25 = vld [vmem:[%s12860_s30 + $0x1e0] ss:$48 sps:$4 sm:$0xff]   ;;  %v11719_v26 = vld [vmem:[%s12860_s30 + $0x1e8] ss:$48 sps:$4 sm:$0xff]  }
  0x3c   : > { %v11720_v27 = vld [vmem:[%s12860_s30 + $0x244] ss:$48 sps:$4 sm:$0xff]   ;;  %v11722_v28 = vld [vmem:[%s12860_s30 + $0x24c] ss:$48 sps:$4 sm:$0xff]   ;;  %v11724_v29 = vld [vmem:[%s12860_s30 + $0x240] ss:$48 sps:$4 sm:$0xff]  }
  0x3d   : > { %v11725_v30 = vld [vmem:[%s12860_s30 + $0x248] ss:$48 sps:$4 sm:$0xff]   ;;  %v11726_v31 = vld [vmem:[%s12860_s30 + $0x2a4] ss:$48 sps:$4 sm:$0xff]   ;;  %v11728_v32 = vld [vmem:[%s12860_s30 + $0x2ac] ss:$48 sps:$4 sm:$0xff]  }
  0x3e   : > { %2200 = vmatpush1.bf16.msra.mxu0 %v11700_v13  ;;  %2282 = vmatpush1.bf16.msra.mxu1 %v11701_v14  ;;  %v11730_v33 = vld [vmem:[%s12860_s30 + $0x2a0] ss:$48 sps:$4 sm:$0xff]   ;;  %v11731_v34 = vld [vmem:[%s12860_s30 + $0x2a8] ss:$48 sps:$4 sm:$0xff]   ;;  %v11732_v35 = vld [vmem:[%s12860_s30 + $0x304] ss:$48 sps:$4 sm:$0xff]  }
  0x3f   : > { %2201 = vmatprep.subr.bf16.mxu0 %v11702_v15  ;;  %2283 = vmatprep.subr.bf16.mxu1 %v11704_v16  ;;  %v11734_v36 = vld [vmem:[%s12860_s30 + $0x30c] ss:$48 sps:$4 sm:$0xff]   ;;  %v11736_v37 = vld [vmem:[%s12860_s30 + $0x300] ss:$48 sps:$4 sm:$0xff]   ;;  %v11737_v38 = vld [vmem:[%s12860_s30 + $0x308] ss:$48 sps:$4 sm:$0xff]  }
  0x40   : > { %v11738_v39 = vld [vmem:[%s12860_s30 + $0x364] ss:$48 sps:$4 sm:$0xff]   ;;  %v11740_v40 = vld [vmem:[%s12860_s30 + $0x36c] ss:$48 sps:$4 sm:$0xff]   ;;  %v11742_v41 = vld [vmem:[%s12860_s30 + $0x360] ss:$48 sps:$4 sm:$0xff]  }
  0x41   : > { %v11743_v42 = vld [vmem:[%s12860_s30 + $0x368] ss:$48 sps:$4 sm:$0xff]   ;;  %v11744_v43 = vld [vmem:[%s12860_s30 + $0x3c4] ss:$48 sps:$4 sm:$0xff]   ;;  %v11746_v44 = vld [vmem:[%s12860_s30 + $0x3cc] ss:$48 sps:$4 sm:$0xff]  }
  0x42   : > { %2202 = vmatpush1.bf16.msra.mxu0 %v11706_v17  ;;  %2284 = vmatpush1.bf16.msra.mxu1 %v11707_v18  ;;  %v11748_v45 = vld [vmem:[%s12860_s30 + $0x3c0] ss:$48 sps:$4 sm:$0xff]   ;;  %v11749_v46 = vld [vmem:[%s12860_s30 + $0x3c8] ss:$48 sps:$4 sm:$0xff]   ;;  %v11750_v47 = vld [vmem:[%s12860_s30 + $0x424] ss:$48 sps:$4 sm:$0xff]  }
  0x43   : > { %2203 = vmatprep.subr.bf16.mxu0 %v11708_v19  ;;  %2285 = vmatprep.subr.bf16.mxu1 %v11710_v20  ;;  %v11752_v48 = vld [vmem:[%s12860_s30 + $0x42c] ss:$48 sps:$4 sm:$0xff]   ;;  %v11754_v50 = vld [vmem:[%s12860_s30 + $0x420] ss:$48 sps:$4 sm:$0xff]   ;;  %v11755_v52 = vld [vmem:[%s12860_s30 + $0x428] ss:$48 sps:$4 sm:$0xff]  }
  0x44   : > { %v682_v49 = vld [vmem:[#allocation2 + $0x8] sm:$0xff]  ;;  %v11756_v53 = vld [vmem:[%s12860_s30 + $0x484] ss:$48 sps:$4 sm:$0xff]   ;;  %v11760_v55 = vld [vmem:[%s12860_s30 + $0x480] ss:$48 sps:$4 sm:$0xff]   ;;  %v12747_v17 = vmov 0  }
  0x45   : > { %v12966_v51 = vpack.c.bf16 %v682_v49, %v682_v49  ;;  %v11758_v54 = vld [vmem:[%s12860_s30 + $0x48c] ss:$48 sps:$4 sm:$0xff]   ;;  %v11761_v56 = vld [vmem:[%s12860_s30 + $0x488] ss:$48 sps:$4 sm:$0xff]   ;;  %v11762_v57 = vld [vmem:[%s12860_s30 + $0x4e4] ss:$48 sps:$4 sm:$0xff]  }
  0x46   : > { %2204 = vmatpush1.bf16.msra.mxu0 %v11712_v21  ;;  %2286 = vmatpush1.bf16.msra.mxu1 %v11713_v22  ;;  %v11764_v58 = vld [vmem:[%s12860_s30 + $0x4ec] ss:$48 sps:$4 sm:$0xff]   ;;  %v11766_v59 = vld [vmem:[%s12860_s30 + $0x4e0] ss:$48 sps:$4 sm:$0xff]   ;;  %v11767_v60 = vld [vmem:[%s12860_s30 + $0x4e8] ss:$48 sps:$4 sm:$0xff]  }
  0x47   : > { %2205 = vmatprep.subr.bf16.mxu0 %v11714_v23  ;;  %2287 = vmatprep.subr.bf16.mxu1 %v11716_v24  ;;  %v11768_v61 = vld [vmem:[%s12860_s30 + $0x544] ss:$48 sps:$4 sm:$0xff]   ;;  %v11770_v62 = vld [vmem:[%s12860_s30 + $0x54c] ss:$48 sps:$4 sm:$0xff]   ;;  %v11772_v63 = vld [vmem:[%s12860_s30 + $0x540] ss:$48 sps:$4 sm:$0xff]  }
  0x48   : > { %2227 = vmatprep.mubr.bf16.mxu0 %v12966_v51  ;;  %2309 = vmatprep.mubr.bf16.mxu1 %v12966_v51  ;;  %v11773_v0 = vld [vmem:[%s12860_s30 + $0x548] ss:$48 sps:$4 sm:$0xff]   ;;  %v11774_v1 = vld [vmem:[%s12860_s30 + $0x5a4] ss:$48 sps:$4 sm:$0xff]   ;;  %v11776_v2 = vld [vmem:[%s12860_s30 + $0x5ac] ss:$48 sps:$4 sm:$0xff]  }
  0x49   : > { %v11778_v3 = vld [vmem:[%s12860_s30 + $0x5a0] ss:$48 sps:$4 sm:$0xff]   ;;  %v11779_v4 = vld [vmem:[%s12860_s30 + $0x5a8] ss:$48 sps:$4 sm:$0xff]   ;;  %v11782_v5 = vld [vmem:[%s12860_s30 + $0x604] ss:$48 sps:$4 sm:$0xff]  }
  0x4a   : > { %2206 = vmatpush1.bf16.msra.mxu0 %v11718_v25  ;;  %2288 = vmatpush1.bf16.msra.mxu1 %v11719_v26  ;;  %v681_v6 = vld [vmem:[#allocation2] sm:$0xff]  ;;  %v11785_v7 = vld [vmem:[%s12860_s30 + $0x60c] ss:$48 sps:$4 sm:$0xff]   ;;  %v11783_v10 = vld [vmem:[%s12860_s30 + $0x608] ss:$48 sps:$4 sm:$0xff]   ;;  %vm2191_vm1 = vcmask 523264  }
  0x4b   : > { %2207 = vmatprep.subr.bf16.mxu0 %v11720_v27  ;;  %2289 = vmatprep.subr.bf16.mxu1 %v11722_v28  ;;  %v11780_v8 = vld [vmem:[%s12860_s30 + $0x600] ss:$48 sps:$4 sm:$0xff]   ;;  %v12990_v9 = vpack.c.bf16 %v681_v6, %v681_v6  ;;  %v11788_v11 = vld [vmem:[%s12860_s30 + $0x664] ss:$48 sps:$4 sm:$0xff]   ;;  %v11791_v12 = vld [vmem:[%s12860_s30 + $0x66c] ss:$48 sps:$4 sm:$0xff]  }
  0x4c   : > { %v11786_v13 = vld [vmem:[%s12860_s30 + $0x660] ss:$48 sps:$4 sm:$0xff]   ;;  %v11789_v14 = vld [vmem:[%s12860_s30 + $0x668] ss:$48 sps:$4 sm:$0xff]   ;;  %v11794_v15 = vld [vmem:[%s12860_s30 + $0x6c4] ss:$48 sps:$4 sm:$0xff]  }
  0x4d   : > { %v11797_v16 = vld [vmem:[%s12860_s30 + $0x6cc] ss:$48 sps:$4 sm:$0xff]   ;;  %v11792_v18 = vld [vmem:[%s12860_s30 + $0x6c0] ss:$48 sps:$4 sm:$0xff]   ;;  %v11795_v19 = vld [vmem:[%s12860_s30 + $0x6c8] ss:$48 sps:$4 sm:$0xff]  }
  0x4e   : > { %2208 = vmatpush1.bf16.msra.mxu0 %v11724_v29  ;;  %2290 = vmatpush1.bf16.msra.mxu1 %v11725_v30  ;;  %v11800_v20 = vld [vmem:[%s12860_s30 + $0x724] ss:$48 sps:$4 sm:$0xff]   ;;  %v11803_v21 = vld [vmem:[%s12860_s30 + $0x72c] ss:$48 sps:$4 sm:$0xff]   ;;  %v11798_v22 = vld [vmem:[%s12860_s30 + $0x720] ss:$48 sps:$4 sm:$0xff]  }
  0x4f   : > { %2209 = vmatprep.subr.bf16.mxu0 %v11726_v31  ;;  %2291 = vmatprep.subr.bf16.mxu1 %v11728_v32  ;;  %v11801_v23 = vld [vmem:[%s12860_s30 + $0x728] ss:$48 sps:$4 sm:$0xff]   ;;  %v683_v24 = vld [vmem:[#allocation2 + $0x10] sm:$0xff]  ;;  %v11809_v26 = vld [vmem:[%s12860_s30 + $0x1c] ss:$48 sps:$4 sm:$0xff]   ;;  %vm12749_vm2 = vmmov 0  }
  0x50   : > { %v11806_v25 = vld [vmem:[%s12860_s30 + $0x14] ss:$48 sps:$4 sm:$0xff]   ;;  %v13011_v27 = vpack.c.bf16 %v683_v24, %v683_v24  ;;  %v11804_v28 = vld [vmem:[%s12860_s30 + $0x10] ss:$48 sps:$4 sm:$0xff]   ;;  %v11807_v29 = vld [vmem:[%s12860_s30 + $0x18] ss:$48 sps:$4 sm:$0xff]  }
  0x51   : > { %v11812_v30 = vld [vmem:[%s12860_s30 + $0x74] ss:$48 sps:$4 sm:$0xff]   ;;  %v11815_v31 = vld [vmem:[%s12860_s30 + $0x7c] ss:$48 sps:$4 sm:$0xff]   ;;  %v11810_v32 = vld [vmem:[%s12860_s30 + $0x70] ss:$48 sps:$4 sm:$0xff]  }
  0x52   : > { %2210 = vmatpush1.bf16.msra.mxu0 %v11730_v33  ;;  %2292 = vmatpush1.bf16.msra.mxu1 %v11731_v34  ;;  %v11813_v33 = vld [vmem:[%s12860_s30 + $0x78] ss:$48 sps:$4 sm:$0xff]   ;;  %v11818_v34 = vld [vmem:[%s12860_s30 + $0xd4] ss:$48 sps:$4 sm:$0xff]   ;;  %s14478_s16 = sld [smem:[#allocation9_spill]]  ;;  %vm2746_vm3 = vcmask 1043456  }
  0x53   : > { %2211 = vmatprep.subr.bf16.mxu0 %v11732_v35  ;;  %2293 = vmatprep.subr.bf16.mxu1 %v11734_v36  ;;  %v11821_v35 = vld [vmem:[%s12860_s30 + $0xdc] ss:$48 sps:$4 sm:$0xff]   ;;  %v11816_v36 = vld [vmem:[%s12860_s30 + $0xd0] ss:$48 sps:$4 sm:$0xff]   ;;  %v11837_v49 = vld [vmem:[%s12860_s30 + $0x1f8] ss:$48 sps:$4 sm:$0xff]  }
  0x54   : > { %v11867_v6 = vld [vmem:[%s12860_s30 + $0x3d8] ss:$48 sps:$4 sm:$0xff]   ;;  %vm2730_vm4 = vcmask 64512   ;;  %s14483_s25 = sld [smem:[#allocation3_spill]] }
  0x55   : > { %v11891_v24 = vld [vmem:[%s12860_s30 + $0x558] ss:$48 sps:$4 sm:$0xff]  }
  0x56   : > { %2212 = vmatpush1.bf16.msra.mxu0 %v11736_v37  ;;  %2294 = vmatpush1.bf16.msra.mxu1 %v11737_v38  ;;  %v11819_v37 = vld [vmem:[%s12860_s30 + $0xd8] ss:$48 sps:$4 sm:$0xff]   ;;  %v11824_v38 = vld [vmem:[%s12860_s30 + $0x134] ss:$48 sps:$4 sm:$0xff]  }
  0x57   : > { %2213 = vmatprep.subr.bf16.mxu0 %v11738_v39  ;;  %2295 = vmatprep.subr.bf16.mxu1 %v11740_v40  ;;  %v11827_v39 = vld [vmem:[%s12860_s30 + $0x13c] ss:$48 sps:$4 sm:$0xff]   ;;  %v11822_v40 = vld [vmem:[%s12860_s30 + $0x130] ss:$48 sps:$4 sm:$0xff]  }
  0x5a   : > { %2214 = vmatpush1.bf16.msra.mxu0 %v11742_v41  ;;  %2296 = vmatpush1.bf16.msra.mxu1 %v11743_v42  ;;  %v11825_v41 = vld [vmem:[%s12860_s30 + $0x138] ss:$48 sps:$4 sm:$0xff]   ;;  %v11830_v42 = vld [vmem:[%s12860_s30 + $0x194] ss:$48 sps:$4 sm:$0xff]   ;;  %p11263_p8 = scmp.ne.s32.totalorder %s14483_s25, 1 }
  0x5b   : > { %2215 = vmatprep.subr.bf16.mxu0 %v11744_v43  ;;  %2297 = vmatprep.subr.bf16.mxu1 %v11746_v44  ;;  %v11833_v43 = vld [vmem:[%s12860_s30 + $0x19c] ss:$48 sps:$4 sm:$0xff]   ;;  %v11828_v44 = vld [vmem:[%s12860_s30 + $0x190] ss:$48 sps:$4 sm:$0xff]  }
  0x5e   : > { %2216 = vmatpush1.bf16.msra.mxu0 %v11748_v45  ;;  %2298 = vmatpush1.bf16.msra.mxu1 %v11749_v46  ;;  %v11831_v45 = vld [vmem:[%s12860_s30 + $0x198] ss:$48 sps:$4 sm:$0xff]   ;;  %v11836_v46 = vld [vmem:[%s12860_s30 + $0x1f4] ss:$48 sps:$4 sm:$0xff]  }
  0x5f   : > { %2217 = vmatprep.subr.bf16.mxu0 %v11750_v47  ;;  %2299 = vmatprep.subr.bf16.mxu1 %v11752_v48  ;;  %v11839_v47 = vld [vmem:[%s12860_s30 + $0x1fc] ss:$48 sps:$4 sm:$0xff]   ;;  %v11834_v48 = vld [vmem:[%s12860_s30 + $0x1f0] ss:$48 sps:$4 sm:$0xff]  }
  0x62   : > { %2218 = vmatpush1.bf16.msra.mxu0 %v11754_v50  ;;  %2300 = vmatpush1.bf16.msra.mxu1 %v11755_v52  ;;  %v11842_v50 = vld [vmem:[%s12860_s30 + $0x254] ss:$48 sps:$4 sm:$0xff]   ;;  %v11845_v52 = vld [vmem:[%s12860_s30 + $0x25c] ss:$48 sps:$4 sm:$0xff]  }
  0x63   : > { %2219 = vmatprep.subr.bf16.mxu0 %v11756_v53  ;;  %2301 = vmatprep.subr.bf16.mxu1 %v11758_v54  ;;  %v11840_v53 = vld [vmem:[%s12860_s30 + $0x250] ss:$48 sps:$4 sm:$0xff]   ;;  %v11843_v54 = vld [vmem:[%s12860_s30 + $0x258] ss:$48 sps:$4 sm:$0xff]  }
  0x66   : > { %2220 = vmatpush1.bf16.msra.mxu0 %v11760_v55  ;;  %2302 = vmatpush1.bf16.msra.mxu1 %v11761_v56  ;;  %v11848_v55 = vld [vmem:[%s12860_s30 + $0x2b4] ss:$48 sps:$4 sm:$0xff]   ;;  %v11851_v56 = vld [vmem:[%s12860_s30 + $0x2bc] ss:$48 sps:$4 sm:$0xff]  }
  0x67   : > { %2221 = vmatprep.subr.bf16.mxu0 %v11762_v57  ;;  %2303 = vmatprep.subr.bf16.mxu1 %v11764_v58  ;;  %v11846_v57 = vld [vmem:[%s12860_s30 + $0x2b0] ss:$48 sps:$4 sm:$0xff]   ;;  %v11849_v58 = vld [vmem:[%s12860_s30 + $0x2b8] ss:$48 sps:$4 sm:$0xff]  }
  0x6a   : > { %2222 = vmatpush1.bf16.msra.mxu0 %v11766_v59  ;;  %2304 = vmatpush1.bf16.msra.mxu1 %v11767_v60  ;;  %v11854_v59 = vld [vmem:[%s12860_s30 + $0x314] ss:$48 sps:$4 sm:$0xff]   ;;  %v11857_v60 = vld [vmem:[%s12860_s30 + $0x31c] ss:$48 sps:$4 sm:$0xff]  }
  0x6b   : > { %2223 = vmatprep.subr.bf16.mxu0 %v11768_v61  ;;  %2305 = vmatprep.subr.bf16.mxu1 %v11770_v62  ;;  %v11852_v61 = vld [vmem:[%s12860_s30 + $0x310] ss:$48 sps:$4 sm:$0xff]   ;;  %v11855_v62 = vld [vmem:[%s12860_s30 + $0x318] ss:$48 sps:$4 sm:$0xff]  }
  0x6e   : > { %2224 = vmatpush1.bf16.msra.mxu0 %v11772_v63  ;;  %2306 = vmatpush1.bf16.msra.mxu1 %v11773_v0  ;;  %v11860_v63 = vld [vmem:[%s12860_s30 + $0x374] ss:$48 sps:$4 sm:$0xff]   ;;  %v11863_v0 = vld [vmem:[%s12860_s30 + $0x37c] ss:$48 sps:$4 sm:$0xff]  }
  0x6f   : > { %2225 = vmatprep.subr.bf16.mxu0 %v11774_v1  ;;  %2307 = vmatprep.subr.bf16.mxu1 %v11776_v2  ;;  %v11858_v1 = vld [vmem:[%s12860_s30 + $0x370] ss:$48 sps:$4 sm:$0xff]   ;;  %v11861_v2 = vld [vmem:[%s12860_s30 + $0x378] ss:$48 sps:$4 sm:$0xff]  }
  0x72   : > { %2226 = vmatpush1.bf16.msra.mxu0 %v11778_v3  ;;  %2308 = vmatpush1.bf16.msra.mxu1 %v11779_v4  ;;  %v11866_v3 = vld [vmem:[%s12860_s30 + $0x3d4] ss:$48 sps:$4 sm:$0xff]   ;;  %v11869_v4 = vld [vmem:[%s12860_s30 + $0x3dc] ss:$48 sps:$4 sm:$0xff]  }
  0x73   : > { %2236 = vmatprep.subr.bf16.mxu0 %v11782_v5  ;;  %2318 = vmatprep.subr.bf16.mxu1 %v11785_v7  ;;  %v11864_v5 = vld [vmem:[%s12860_s30 + $0x3d0] ss:$48 sps:$4 sm:$0xff]   ;;  %v11872_v7 = vld [vmem:[%s12860_s30 + $0x434] ss:$48 sps:$4 sm:$0xff]  }
  0x75   : > { %2228 = vmatmul.mubr.bf16.vlgmr.msra.gmra.mrb[0].mxu0 %v12990_v9  ;;  %2310 = vmatmul.mubr.bf16.vlgmr.msra.gmra.mrb[0].mxu1 %v12990_v9 }
  0x76   : > { %2237 = vmatpush1.bf16.msra.mxu0 %v11780_v8  ;;  %2319 = vmatpush1.bf16.msra.mxu1 %v11783_v10  ;;  %v11875_v8 = vld [vmem:[%s12860_s30 + $0x43c] ss:$48 sps:$4 sm:$0xff]   ;;  %v11870_v10 = vld [vmem:[%s12860_s30 + $0x430] ss:$48 sps:$4 sm:$0xff]  }
  0x77   : > { %2238 = vmatprep.subr.bf16.mxu0 %v11788_v11  ;;  %2320 = vmatprep.subr.bf16.mxu1 %v11791_v12  ;;  %v11873_v11 = vld [vmem:[%s12860_s30 + $0x438] ss:$48 sps:$4 sm:$0xff]   ;;  %v11878_v12 = vld [vmem:[%s12860_s30 + $0x494] ss:$48 sps:$4 sm:$0xff]  }
  0x78   : > { %2268 = vmatprep.mubr.bf16.mxu0 %v12747_v17  ;;  %2350 = vmatprep.mubr.bf16.mxu1 %v12747_v17 }
  0x7a   : > { %2239 = vmatpush1.bf16.msra.mxu0 %v11786_v13  ;;  %2321 = vmatpush1.bf16.msra.mxu1 %v11789_v14  ;;  %v11881_v13 = vld [vmem:[%s12860_s30 + $0x49c] ss:$48 sps:$4 sm:$0xff]   ;;  %v11876_v14 = vld [vmem:[%s12860_s30 + $0x490] ss:$48 sps:$4 sm:$0xff]  }
  0x7b   : > { %2240 = vmatprep.subr.bf16.mxu0 %v11794_v15  ;;  %2322 = vmatprep.subr.bf16.mxu1 %v11797_v16  ;;  %v11879_v15 = vld [vmem:[%s12860_s30 + $0x498] ss:$48 sps:$4 sm:$0xff]   ;;  %v11884_v16 = vld [vmem:[%s12860_s30 + $0x4f4] ss:$48 sps:$4 sm:$0xff]  }
  0x7e   : > { %2241 = vmatpush1.bf16.msra.mxu0 %v11792_v18  ;;  %2323 = vmatpush1.bf16.msra.mxu1 %v11795_v19  ;;  %v11887_v18 = vld [vmem:[%s12860_s30 + $0x4fc] ss:$48 sps:$4 sm:$0xff]   ;;  %v11882_v19 = vld [vmem:[%s12860_s30 + $0x4f0] ss:$48 sps:$4 sm:$0xff]  }
  0x7f   : > { %2242 = vmatprep.subr.bf16.mxu0 %v11800_v20  ;;  %2324 = vmatprep.subr.bf16.mxu1 %v11803_v21  ;;  %v11885_v20 = vld [vmem:[%s12860_s30 + $0x4f8] ss:$48 sps:$4 sm:$0xff]   ;;  %v11890_v21 = vld [vmem:[%s12860_s30 + $0x554] ss:$48 sps:$4 sm:$0xff]  }
  0x82   : > { %2243 = vmatpush1.bf16.msra.mxu0 %v11798_v22  ;;  %2325 = vmatpush1.bf16.msra.mxu1 %v11801_v23  ;;  %v11893_v22 = vld [vmem:[%s12860_s30 + $0x55c] ss:$48 sps:$4 sm:$0xff]   ;;  %v11888_v23 = vld [vmem:[%s12860_s30 + $0x550] ss:$48 sps:$4 sm:$0xff]  }
  0x83   : > { %2359 = vmatprep.subr.bf16.mxu0 %v11806_v25  ;;  %2441 = vmatprep.subr.bf16.mxu1 %v11809_v26  ;;  %v11896_v25 = vld [vmem:[%s12860_s30 + $0x5b4] ss:$48 sps:$4 sm:$0xff]   ;;  %v11899_v26 = vld [vmem:[%s12860_s30 + $0x5bc] ss:$48 sps:$4 sm:$0xff]  }
  0x85   : > { %10445 = vmatmul.mubr.msk.bf16.vlgmr.msra.gmra.mrb[0].mxu0 %vm2191_vm1, %v13011_v27  ;;  %10446 = vmatmul.mubr.msk.bf16.vlgmr.msra.gmra.mrb[0].mxu1 %vm2191_vm1, %v13011_v27 }
  0x86   : > { %2360 = vmatpush1.bf16.msra.mxu0 %v11804_v28  ;;  %2442 = vmatpush1.bf16.msra.mxu1 %v11807_v29  ;;  %v11894_v28 = vld [vmem:[%s12860_s30 + $0x5b0] ss:$48 sps:$4 sm:$0xff]   ;;  %v11897_v29 = vld [vmem:[%s12860_s30 + $0x5b8] ss:$48 sps:$4 sm:$0xff]  }
  0x87   : > { %2361 = vmatprep.subr.bf16.mxu0 %v11812_v30  ;;  %2443 = vmatprep.subr.bf16.mxu1 %v11815_v31  ;;  %v11902_v30 = vld [vmem:[%s12860_s30 + $0x614] ss:$48 sps:$4 sm:$0xff]   ;;  %v11905_v31 = vld [vmem:[%s12860_s30 + $0x61c] ss:$48 sps:$4 sm:$0xff]  }
  0x88   : > { %2391 = vmatprep.mubr.bf16.mxu0 %v12966_v51  ;;  %2473 = vmatprep.mubr.bf16.mxu1 %v12966_v51 }
  0x8a   : > { %2362 = vmatpush1.bf16.msra.mxu0 %v11810_v32  ;;  %2444 = vmatpush1.bf16.msra.mxu1 %v11813_v33  ;;  %v11900_v32 = vld [vmem:[%s12860_s30 + $0x610] ss:$48 sps:$4 sm:$0xff]   ;;  %v11903_v33 = vld [vmem:[%s12860_s30 + $0x618] ss:$48 sps:$4 sm:$0xff]  }
  0x8b   : > { %2363 = vmatprep.subr.bf16.mxu0 %v11818_v34  ;;  %2445 = vmatprep.subr.bf16.mxu1 %v11821_v35  ;;  %v11908_v34 = vld [vmem:[%s12860_s30 + $0x674] ss:$48 sps:$4 sm:$0xff]   ;;  %v11911_v35 = vld [vmem:[%s12860_s30 + $0x67c] ss:$48 sps:$4 sm:$0xff]  }
  0x8e   : > { %2364 = vmatpush1.bf16.msra.mxu0 %v11816_v36  ;;  %2446 = vmatpush1.bf16.msra.mxu1 %v11819_v37  ;;  %v11906_v36 = vld [vmem:[%s12860_s30 + $0x670] ss:$48 sps:$4 sm:$0xff]   ;;  %v11909_v37 = vld [vmem:[%s12860_s30 + $0x678] ss:$48 sps:$4 sm:$0xff]  }
  0x8f   : > { %2365 = vmatprep.subr.bf16.mxu0 %v11824_v38  ;;  %2447 = vmatprep.subr.bf16.mxu1 %v11827_v39  ;;  %v11914_v38 = vld [vmem:[%s12860_s30 + $0x6d4] ss:$48 sps:$4 sm:$0xff]   ;;  %v11917_v39 = vld [vmem:[%s12860_s30 + $0x6dc] ss:$48 sps:$4 sm:$0xff]  }
  0x92   : > { %2366 = vmatpush1.bf16.msra.mxu0 %v11822_v40  ;;  %2448 = vmatpush1.bf16.msra.mxu1 %v11825_v41  ;;  %v11912_v40 = vld [vmem:[%s12860_s30 + $0x6d0] ss:$48 sps:$4 sm:$0xff]   ;;  %v11915_v41 = vld [vmem:[%s12860_s30 + $0x6d8] ss:$48 sps:$4 sm:$0xff]  }
  0x93   : > { %2367 = vmatprep.subr.bf16.mxu0 %v11830_v42  ;;  %2449 = vmatprep.subr.bf16.mxu1 %v11833_v43  ;;  %v11920_v42 = vld [vmem:[%s12860_s30 + $0x734] ss:$48 sps:$4 sm:$0xff]   ;;  %v11923_v43 = vld [vmem:[%s12860_s30 + $0x73c] ss:$48 sps:$4 sm:$0xff]  }
  0x96   : > { %2368 = vmatpush1.bf16.msra.mxu0 %v11828_v44  ;;  %2450 = vmatpush1.bf16.msra.mxu1 %v11831_v45  ;;  %v11918_v44 = vld [vmem:[%s12860_s30 + $0x730] ss:$48 sps:$4 sm:$0xff]   ;;  %v11921_v45 = vld [vmem:[%s12860_s30 + $0x738] ss:$48 sps:$4 sm:$0xff]  }
  0x97   : > { %2369 = vmatprep.subr.bf16.mxu0 %v11836_v46  ;;  %2451 = vmatprep.subr.bf16.mxu1 %v11839_v47  ;;  %v11926_v46 = vld [vmem:[%s12860_s30 + $0x24] ss:$48 sps:$4 sm:$0xff]   ;;  %v11924_v47 = vld [vmem:[%s12860_s30 + $0x20] ss:$48 sps:$4 sm:$0xff]  }
  0x9a   : > { %2370 = vmatpush1.bf16.msra.mxu0 %v11834_v48  ;;  %2452 = vmatpush1.bf16.msra.mxu1 %v11837_v49  ;;  %v11929_v48 = vld [vmem:[%s12860_s30 + $0x84] ss:$48 sps:$4 sm:$0xff]   ;;  %v11927_v49 = vld [vmem:[%s12860_s30 + $0x80] ss:$48 sps:$4 sm:$0xff]  }
  0x9b   : > { %2371 = vmatprep.subr.bf16.mxu0 %v11842_v50  ;;  %2453 = vmatprep.subr.bf16.mxu1 %v11845_v52  ;;  %v11932_v50 = vld [vmem:[%s12860_s30 + $0xe4] ss:$48 sps:$4 sm:$0xff]   ;;  %v11930_v52 = vld [vmem:[%s12860_s30 + $0xe0] ss:$48 sps:$4 sm:$0xff]  }
  0x9e   : > { %2372 = vmatpush1.bf16.msra.mxu0 %v11840_v53  ;;  %2454 = vmatpush1.bf16.msra.mxu1 %v11843_v54  ;;  %v11935_v53 = vld [vmem:[%s12860_s30 + $0x144] ss:$48 sps:$4 sm:$0xff]   ;;  %v11933_v54 = vld [vmem:[%s12860_s30 + $0x140] ss:$48 sps:$4 sm:$0xff]  }
  0x9f   : > { %2373 = vmatprep.subr.bf16.mxu0 %v11848_v55  ;;  %2455 = vmatprep.subr.bf16.mxu1 %v11851_v56  ;;  %v11938_v55 = vld [vmem:[%s12860_s30 + $0x1a4] ss:$48 sps:$4 sm:$0xff]   ;;  %v11936_v56 = vld [vmem:[%s12860_s30 + $0x1a0] ss:$48 sps:$4 sm:$0xff]  }
  0xa2   : > { %2374 = vmatpush1.bf16.msra.mxu0 %v11846_v57  ;;  %2456 = vmatpush1.bf16.msra.mxu1 %v11849_v58  ;;  %v11941_v57 = vld [vmem:[%s12860_s30 + $0x204] ss:$48 sps:$4 sm:$0xff]   ;;  %v11939_v58 = vld [vmem:[%s12860_s30 + $0x200] ss:$48 sps:$4 sm:$0xff]  }
  0xa3   : > { %2375 = vmatprep.subr.bf16.mxu0 %v11854_v59  ;;  %2457 = vmatprep.subr.bf16.mxu1 %v11857_v60  ;;  %v11942_v59 = vld [vmem:[%s12860_s30 + $0x260] ss:$48 sps:$4 sm:$0xff]   ;;  %v11947_v60 = vld [vmem:[%s12860_s30 + $0x2c4] ss:$48 sps:$4 sm:$0xff]  }
  0xa6   : > { %2376 = vmatpush1.bf16.msra.mxu0 %v11852_v61  ;;  %2458 = vmatpush1.bf16.msra.mxu1 %v11855_v62  ;;  %v11945_v61 = vld [vmem:[%s12860_s30 + $0x2c0] ss:$48 sps:$4 sm:$0xff]   ;;  %v11950_v62 = vld [vmem:[%s12860_s30 + $0x324] ss:$48 sps:$4 sm:$0xff]  }
  0xa7   : > { %2377 = vmatprep.subr.bf16.mxu0 %v11860_v63  ;;  %2459 = vmatprep.subr.bf16.mxu1 %v11863_v0  ;;  %v11948_v63 = vld [vmem:[%s12860_s30 + $0x320] ss:$48 sps:$4 sm:$0xff]   ;;  %v11953_v0 = vld [vmem:[%s12860_s30 + $0x384] ss:$48 sps:$4 sm:$0xff]  }
  0xaa   : > { %2378 = vmatpush1.bf16.msra.mxu0 %v11858_v1  ;;  %2460 = vmatpush1.bf16.msra.mxu1 %v11861_v2  ;;  %v11951_v1 = vld [vmem:[%s12860_s30 + $0x380] ss:$48 sps:$4 sm:$0xff]   ;;  %v11956_v2 = vld [vmem:[%s12860_s30 + $0x3e4] ss:$48 sps:$4 sm:$0xff]  }
  0xab   : > { %2379 = vmatprep.subr.bf16.mxu0 %v11866_v3  ;;  %2461 = vmatprep.subr.bf16.mxu1 %v11869_v4  ;;  %v11954_v3 = vld [vmem:[%s12860_s30 + $0x3e0] ss:$48 sps:$4 sm:$0xff]   ;;  %v11959_v4 = vld [vmem:[%s12860_s30 + $0x444] ss:$48 sps:$4 sm:$0xff]  }
  0xae   : > { %2380 = vmatpush1.bf16.msra.mxu0 %v11864_v5  ;;  %2462 = vmatpush1.bf16.msra.mxu1 %v11867_v6  ;;  %v11957_v5 = vld [vmem:[%s12860_s30 + $0x440] ss:$48 sps:$4 sm:$0xff]   ;;  %v11962_v6 = vld [vmem:[%s12860_s30 + $0x4a4] ss:$48 sps:$4 sm:$0xff]  }
  0xaf   : > { %2381 = vmatprep.subr.bf16.mxu0 %v11872_v7  ;;  %2463 = vmatprep.subr.bf16.mxu1 %v11875_v8  ;;  %v11960_v7 = vld [vmem:[%s12860_s30 + $0x4a0] ss:$48 sps:$4 sm:$0xff]   ;;  %v11965_v8 = vld [vmem:[%s12860_s30 + $0x504] ss:$48 sps:$4 sm:$0xff]  }
  0xb2   : > { %2382 = vmatpush1.bf16.msra.mxu0 %v11870_v10  ;;  %2464 = vmatpush1.bf16.msra.mxu1 %v11873_v11  ;;  %v11963_v10 = vld [vmem:[%s12860_s30 + $0x500] ss:$48 sps:$4 sm:$0xff]   ;;  %v11968_v11 = vld [vmem:[%s12860_s30 + $0x564] ss:$48 sps:$4 sm:$0xff]  }
  0xb3   : > { %2383 = vmatprep.subr.bf16.mxu0 %v11878_v12  ;;  %2465 = vmatprep.subr.bf16.mxu1 %v11881_v13  ;;  %v11966_v12 = vld [vmem:[%s12860_s30 + $0x560] ss:$48 sps:$4 sm:$0xff]   ;;  %v11971_v13 = vld [vmem:[%s12860_s30 + $0x5c4] ss:$48 sps:$4 sm:$0xff]  }
  0xb6   : > { %2384 = vmatpush1.bf16.msra.mxu0 %v11876_v14  ;;  %2466 = vmatpush1.bf16.msra.mxu1 %v11879_v15  ;;  %v11969_v14 = vld [vmem:[%s12860_s30 + $0x5c0] ss:$48 sps:$4 sm:$0xff]   ;;  %v11974_v15 = vld [vmem:[%s12860_s30 + $0x624] ss:$48 sps:$4 sm:$0xff]  }
  0xb7   : > { %2385 = vmatprep.subr.bf16.mxu0 %v11884_v16  ;;  %2467 = vmatprep.subr.bf16.mxu1 %v11887_v18  ;;  %v11972_v16 = vld [vmem:[%s12860_s30 + $0x620] ss:$48 sps:$4 sm:$0xff]   ;;  %v11977_v18 = vld [vmem:[%s12860_s30 + $0x684] ss:$48 sps:$4 sm:$0xff]  }
  0xba   : > { %2386 = vmatpush1.bf16.msra.mxu0 %v11882_v19  ;;  %2468 = vmatpush1.bf16.msra.mxu1 %v11885_v20  ;;  %v11975_v19 = vld [vmem:[%s12860_s30 + $0x680] ss:$48 sps:$4 sm:$0xff]   ;;  %v11980_v20 = vld [vmem:[%s12860_s30 + $0x6e4] ss:$48 sps:$4 sm:$0xff]  }
  0xbb   : > { %2387 = vmatprep.subr.bf16.mxu0 %v11890_v21  ;;  %2469 = vmatprep.subr.bf16.mxu1 %v11893_v22  ;;  %v11978_v21 = vld [vmem:[%s12860_s30 + $0x6e0] ss:$48 sps:$4 sm:$0xff]   ;;  %v11983_v22 = vld [vmem:[%s12860_s30 + $0x744] ss:$48 sps:$4 sm:$0xff]  }
  0xbe   : > { %2388 = vmatpush1.bf16.msra.mxu0 %v11888_v23  ;;  %2470 = vmatpush1.bf16.msra.mxu1 %v11891_v24  ;;  %v11981_v23 = vld [vmem:[%s12860_s30 + $0x740] ss:$48 sps:$4 sm:$0xff]   ;;  %v12748_v24 = vmov 0.0  }
  0xbf   : > { %2389 = vmatprep.subr.bf16.mxu0 %v11896_v25  ;;  %2471 = vmatprep.subr.bf16.mxu1 %v11899_v26  ;;  %v11984_v25 = vld [vmem:[%s12860_s30 + $0x28] ss:$48 sps:$4 sm:$0xff]   ;;  %v11986_v26 = vld [vmem:[%s12860_s30 + $0x2c] ss:$48 sps:$4 sm:$0xff]  }
  0xc2   : > { %2390 = vmatpush1.bf16.msra.mxu0 %v11894_v28  ;;  %2472 = vmatpush1.bf16.msra.mxu1 %v11897_v29  ;;  %v11989_v28 = vld [vmem:[%s12860_s30 + $0x8c] ss:$48 sps:$4 sm:$0xff]   ;;  %v11987_v29 = vld [vmem:[%s12860_s30 + $0x88] ss:$48 sps:$4 sm:$0xff]  }
  0xc3   : > { %2400 = vmatprep.subr.bf16.mxu0 %v11902_v30  ;;  %2482 = vmatprep.subr.bf16.mxu1 %v11905_v31  ;;  %v11992_v30 = vld [vmem:[%s12860_s30 + $0xec] ss:$48 sps:$4 sm:$0xff]   ;;  %v931_v31 = vlaneseq }
  0xc5   : > { %2392 = vmatmul.mubr.bf16.vlgmr.msra.gmra.mrb[4].mxu0 %v12990_v9  ;;  %2474 = vmatmul.mubr.bf16.vlgmr.msra.gmra.mrb[4].mxu1 %v12990_v9 }
  0xc6   : > { %2401 = vmatpush1.bf16.msra.mxu0 %v11900_v32  ;;  %2483 = vmatpush1.bf16.msra.mxu1 %v11903_v33  ;;  %v11990_v32 = vld [vmem:[%s12860_s30 + $0xe8] ss:$48 sps:$4 sm:$0xff]   ;;  %v11995_v33 = vld [vmem:[%s12860_s30 + $0x14c] ss:$48 sps:$4 sm:$0xff]  }
  0xc7   : > { %2402 = vmatprep.subr.bf16.mxu0 %v11908_v34  ;;  %2484 = vmatprep.subr.bf16.mxu1 %v11911_v35  ;;  %v13161_v34 = vshrl.u32 %v931_v31, 7  ;;  %v11993_v35 = vld [vmem:[%s12860_s30 + $0x148] ss:$48 sps:$4 sm:$0xff]  }
  0xc8   : > { %2432 = vmatprep.mubr.bf16.mxu0 %v12747_v17  ;;  %2514 = vmatprep.mubr.bf16.mxu1 %v12747_v17 }
  0xca   : > { %2403 = vmatpush1.bf16.msra.mxu0 %v11906_v36  ;;  %2485 = vmatpush1.bf16.msra.mxu1 %v11909_v37 }
  0xcb   : > { %2404 = vmatprep.subr.bf16.mxu0 %v11914_v38  ;;  %2486 = vmatprep.subr.bf16.mxu1 %v11917_v39  ;;  %v11998_v38 = vld [vmem:[%s12860_s30 + $0x1ac] ss:$48 sps:$4 sm:$0xff]  }
  0xce   : > { %2405 = vmatpush1.bf16.msra.mxu0 %v11912_v40  ;;  %2487 = vmatpush1.bf16.msra.mxu1 %v11915_v41  ;;  %v11996_v41 = vld [vmem:[%s12860_s30 + $0x1a8] ss:$48 sps:$4 sm:$0xff]  }
  0xcf   : > { %2406 = vmatprep.subr.bf16.mxu0 %v11920_v42  ;;  %2488 = vmatprep.subr.bf16.mxu1 %v11923_v43 }
  0xd2   : > { %2407 = vmatpush1.bf16.msra.mxu0 %v11918_v44  ;;  %2489 = vmatpush1.bf16.msra.mxu1 %v11921_v45  ;;  %v12001_v44 = vld [vmem:[%s12860_s30 + $0x20c] ss:$48 sps:$4 sm:$0xff]  }
  0xd3   : > { %2523 = vmatprep.subr.bf16.mxu0 %v11926_v46  ;;  %2605 = vmatprep.subr.bf16.mxu1 %v11986_v26 }
  0xd5   : > { %10447 = vmatmul.mubr.msk.bf16.vlgmr.msra.gmra.mrb[4].mxu0 %vm2191_vm1, %v13011_v27  ;;  %10448 = vmatmul.mubr.msk.bf16.vlgmr.msra.gmra.mrb[4].mxu1 %vm2191_vm1, %v13011_v27 }
  0xd6   : > { %2524 = vmatpush1.bf16.msra.mxu0 %v11924_v47  ;;  %2555 = vmatprep.mubr.bf16.mxu0 %v12966_v51  ;;  %v11999_v47 = vld [vmem:[%s12860_s30 + $0x208] ss:$48 sps:$4 sm:$0xff]  }
  0xd7   : > { %2525 = vmatprep.subr.bf16.mxu0 %v11929_v48  ;;  %2637 = vmatprep.mubr.bf16.mxu1 %v12966_v51  ;;  %v11944_v51 = vld [vmem:[%s12860_s30 + $0x264] ss:$48 sps:$4 sm:$0xff]   ;;  %v12004_v48 = vld [vmem:[%s12860_s30 + $0x26c] ss:$48 sps:$4 sm:$0xff]  }
  0xd8   : > { %2606 = vmatpush1.bf16.msra.mxu1 %v11984_v25 }
  0xd9   : > { %2607 = vmatprep.subr.bf16.mxu1 %v11989_v28 }
  0xda   : > { %2526 = vmatpush1.bf16.msra.mxu0 %v11927_v49  ;;  %v12002_v49 = vld [vmem:[%s12860_s30 + $0x268] ss:$48 sps:$4 sm:$0xff]  }
  0xdb   : > { %2527 = vmatprep.subr.bf16.mxu0 %v11932_v50  ;;  %v12007_v50 = vld [vmem:[%s12860_s30 + $0x2cc] ss:$48 sps:$4 sm:$0xff]  }
  0xdc   : > { %2608 = vmatpush1.bf16.msra.mxu1 %v11987_v29 }
  0xdd   : > { %2609 = vmatprep.subr.bf16.mxu1 %v11992_v30 }
  0xde   : > { %2528 = vmatpush1.bf16.msra.mxu0 %v11930_v52  ;;  %v12005_v52 = vld [vmem:[%s12860_s30 + $0x2c8] ss:$48 sps:$4 sm:$0xff]  }
  0xdf   : > { %2529 = vmatprep.subr.bf16.mxu0 %v11935_v53  ;;  %v12010_v53 = vld [vmem:[%s12860_s30 + $0x32c] ss:$48 sps:$4 sm:$0xff]  }
  0xe0   : > { %2610 = vmatpush1.bf16.msra.mxu1 %v11990_v32  ;;  %v13226_v32 = vsub.s32 1, %v13161_v34 }
  0xe1   : > { %2611 = vmatprep.subr.bf16.mxu1 %v11995_v33  ;;  %v13230_v33 = vsub.s32 6, %v13161_v34 }
  0xe2   : > { %2530 = vmatpush1.bf16.msra.mxu0 %v11933_v54  ;;  %v12008_v54 = vld [vmem:[%s12860_s30 + $0x328] ss:$48 sps:$4 sm:$0xff]  }
  0xe3   : > { %2531 = vmatprep.subr.bf16.mxu0 %v11938_v55  ;;  %v12013_v55 = vld [vmem:[%s12860_s30 + $0x38c] ss:$48 sps:$4 sm:$0xff]  }
  0xe4   : > { %2612 = vmatpush1.bf16.msra.mxu1 %v11993_v35 }
  0xe5   : > { %2613 = vmatprep.subr.bf16.mxu1 %v11998_v38 }
  0xe6   : > { %2532 = vmatpush1.bf16.msra.mxu0 %v11936_v56  ;;  %v12011_v56 = vld [vmem:[%s12860_s30 + $0x388] ss:$48 sps:$4 sm:$0xff]  }
  0xe7   : > { %2533 = vmatprep.subr.bf16.mxu0 %v11941_v57  ;;  %v12016_v57 = vld [vmem:[%s12860_s30 + $0x3ec] ss:$48 sps:$4 sm:$0xff]  }
  0xe8   : > { %2614 = vmatpush1.bf16.msra.mxu1 %v11996_v41 }
  0xe9   : > { %2615 = vmatprep.subr.bf16.mxu1 %v12001_v44 }
  0xea   : > { %2534 = vmatpush1.bf16.msra.mxu0 %v11939_v58  ;;  %v12014_v58 = vld [vmem:[%s12860_s30 + $0x3e8] ss:$48 sps:$4 sm:$0xff]  }
  0xeb   : > { %2535 = vmatprep.subr.bf16.mxu0 %v11944_v51  ;;  %v12019_v51 = vld [vmem:[%s12860_s30 + $0x44c] ss:$48 sps:$4 sm:$0xff]  }
  0xec   : > { %2616 = vmatpush1.bf16.msra.mxu1 %v11999_v47 }
  0xed   : > { %2617 = vmatprep.subr.bf16.mxu1 %v12004_v48 }
  0xee   : > { %2536 = vmatpush1.bf16.msra.mxu0 %v11942_v59  ;;  %v12017_v59 = vld [vmem:[%s12860_s30 + $0x448] ss:$48 sps:$4 sm:$0xff]  }
  0xef   : > { %2537 = vmatprep.subr.bf16.mxu0 %v11947_v60  ;;  %v12022_v60 = vld [vmem:[%s12860_s30 + $0x4ac] ss:$48 sps:$4 sm:$0xff]  }
  0xf0   : > { %2618 = vmatpush1.bf16.msra.mxu1 %v12002_v49 }
  0xf1   : > { %2619 = vmatprep.subr.bf16.mxu1 %v12007_v50 }
  0xf2   : > { %2538 = vmatpush1.bf16.msra.mxu0 %v11945_v61  ;;  %v12020_v61 = vld [vmem:[%s12860_s30 + $0x4a8] ss:$48 sps:$4 sm:$0xff]  }
  0xf3   : > { %2539 = vmatprep.subr.bf16.mxu0 %v11950_v62  ;;  %v12025_v62 = vld [vmem:[%s12860_s30 + $0x50c] ss:$48 sps:$4 sm:$0xff]  }
  0xf4   : > { %2620 = vmatpush1.bf16.msra.mxu1 %v12005_v52  ;;  %v13250_v52 = vsub.s32 3, %v13161_v34 }
  0xf5   : > { %2621 = vmatprep.subr.bf16.mxu1 %v12010_v53 }
  0xf6   : > { %2540 = vmatpush1.bf16.msra.mxu0 %v11948_v63  ;;  %v13192_v63 = vsub.s32 0, %v13161_v34 }
  0xf7   : > { %2541 = vmatprep.subr.bf16.mxu0 %v11953_v0  ;;  %v13195_v0 = vsub.s32 4, %v13161_v34 }
  0xf8   : > { %2622 = vmatpush1.bf16.msra.mxu1 %v12008_v54 }
  0xf9   : > { %2623 = vmatprep.subr.bf16.mxu1 %v12013_v55 }
  0xfa   : > { %2542 = vmatpush1.bf16.msra.mxu0 %v11951_v1  ;;  %v13198_v1 = vsub.s32 5, %v13161_v34 }
  0xfb   : > { %2543 = vmatprep.subr.bf16.mxu0 %v11956_v2  ;;  %v12023_v2 = vld [vmem:[%s12860_s30 + $0x508] ss:$48 sps:$4 sm:$0xff]  }
  0xfc   : > { %2624 = vmatpush1.bf16.msra.mxu1 %v12011_v56 }
  0xfd   : > { %2625 = vmatprep.subr.bf16.mxu1 %v12016_v57 }
  0xfe   : > { %2544 = vmatpush1.bf16.msra.mxu0 %v11954_v3  ;;  %v12028_v3 = vld [vmem:[%s12860_s30 + $0x56c] ss:$48 sps:$4 sm:$0xff]  }
  0xff   : > { %2545 = vmatprep.subr.bf16.mxu0 %v11959_v4  ;;  %v12026_v4 = vld [vmem:[%s12860_s30 + $0x568] ss:$48 sps:$4 sm:$0xff]  }
 0x100   : > { %2626 = vmatpush1.bf16.msra.mxu1 %v12014_v58 }
 0x101   : > { %2627 = vmatprep.subr.bf16.mxu1 %v12019_v51 }
 0x102   : > { %2546 = vmatpush1.bf16.msra.mxu0 %v11957_v5  ;;  %v12031_v5 = vld [vmem:[%s12860_s30 + $0x5cc] ss:$48 sps:$4 sm:$0xff]  }
 0x103   : > { %2547 = vmatprep.subr.bf16.mxu0 %v11962_v6  ;;  %v12029_v6 = vld [vmem:[%s12860_s30 + $0x5c8] ss:$48 sps:$4 sm:$0xff]  }
 0x104   : > { %2628 = vmatpush1.bf16.msra.mxu1 %v12017_v59 }
 0x105   : > { %2629 = vmatprep.subr.bf16.mxu1 %v12022_v60 }
 0x106   : > { %2548 = vmatpush1.bf16.msra.mxu0 %v11960_v7  ;;  %v12034_v7 = vld [vmem:[%s12860_s30 + $0x62c] ss:$48 sps:$4 sm:$0xff]  }
 0x107   : > { %2549 = vmatprep.subr.bf16.mxu0 %v11965_v8  ;;  %v12032_v8 = vld [vmem:[%s12860_s30 + $0x628] ss:$48 sps:$4 sm:$0xff]  }
 0x108   : > { %2630 = vmatpush1.bf16.msra.mxu1 %v12020_v61 }
 0x109   : > { %2631 = vmatprep.subr.bf16.mxu1 %v12025_v62 }
 0x10a   : > { %2550 = vmatpush1.bf16.msra.mxu0 %v11963_v10  ;;  %v12037_v10 = vld [vmem:[%s12860_s30 + $0x68c] ss:$48 sps:$4 sm:$0xff]  }
 0x10b   : > { %2551 = vmatprep.subr.bf16.mxu0 %v11968_v11  ;;  %v12035_v11 = vld [vmem:[%s12860_s30 + $0x688] ss:$48 sps:$4 sm:$0xff]  }
 0x10c   : > { %2632 = vmatpush1.bf16.msra.mxu1 %v12023_v2 }
 0x10d   : > { %2633 = vmatprep.subr.bf16.mxu1 %v12028_v3 }
 0x10e   : > { %2552 = vmatpush1.bf16.msra.mxu0 %v11966_v12  ;;  %v12040_v12 = vld [vmem:[%s12860_s30 + $0x6ec] ss:$48 sps:$4 sm:$0xff]  }
 0x10f   : > { %2553 = vmatprep.subr.bf16.mxu0 %v11971_v13  ;;  %v12038_v13 = vld [vmem:[%s12860_s30 + $0x6e8] ss:$48 sps:$4 sm:$0xff]  }
 0x110   : > { %2634 = vmatpush1.bf16.msra.mxu1 %v12026_v4 }
 0x111   : > { %2635 = vmatprep.subr.bf16.mxu1 %v12031_v5 }
 0x112   : > { %2554 = vmatpush1.bf16.msra.mxu0 %v11969_v14  ;;  %v12043_v14 = vld [vmem:[%s12860_s30 + $0x74c] ss:$48 sps:$4 sm:$0xff]  }
 0x113   : > { %2564 = vmatprep.subr.bf16.mxu0 %v11974_v15  ;;  %v12041_v15 = vld [vmem:[%s12860_s30 + $0x748] ss:$48 sps:$4 sm:$0xff]   ;;  %s14479_s30 = sld [smem:[#allocation10_spill]] }
 0x114   : > { %2636 = vmatpush1.bf16.msra.mxu1 %v12029_v6 }
 0x115   : > { %2556 = vmatmul.mubr.bf16.vlgmr.msra.gmra.mrb[8].mxu0 %v12990_v9  ;;  %2646 = vmatprep.subr.bf16.mxu1 %v12034_v7 }
 0x116   : > { %2565 = vmatpush1.bf16.msra.mxu0 %v11972_v16  ;;  %2596 = vmatprep.mubr.bf16.mxu0 %v12747_v17 }
 0x117   : > { %2566 = vmatprep.subr.bf16.mxu0 %v11977_v18  ;;  %2638 = vmatmul.mubr.bf16.vlgmr.msra.gmra.mrb[8].mxu1 %v12990_v9  ;;  %v927_v9 = vld [vmem:[%s14478_s16] sm:$0xff] }
 0x118   : > { %2647 = vmatpush1.bf16.msra.mxu1 %v12032_v8  ;;  %2678 = vmatprep.mubr.bf16.mxu1 %v12747_v17  ;;  %v950_v16 = vrot.slane %v927_v9, %v13195_v0  ;;  %v954_v29 = vrot.slane %v927_v9, %v13198_v1  ;;  %v938_v41 = vrot.slane %v927_v9, %v13226_v32 }
 0x119   : > { %2648 = vmatprep.subr.bf16.mxu1 %v12037_v10  ;;  %v946_v55 = vrot.slane %v927_v9, %v13250_v52 }
 0x11a   : > { %2567 = vmatpush1.bf16.msra.mxu0 %v11975_v19 }
 0x11b   : > { %2568 = vmatprep.subr.bf16.mxu0 %v11980_v20 }
 0x11c   : > { %2649 = vmatpush1.bf16.msra.mxu1 %v12035_v11 }
 0x11d   : > { %2650 = vmatprep.subr.bf16.mxu1 %v12040_v12 }
 0x11e   : > { %2569 = vmatpush1.bf16.msra.mxu0 %v11978_v21 }
 0x11f   : > { %2570 = vmatprep.subr.bf16.mxu0 %v11983_v22 }
 0x120   : > { %2651 = vmatpush1.bf16.msra.mxu1 %v12038_v13 }
 0x121   : > { %2652 = vmatprep.subr.bf16.mxu1 %v12043_v14 }
 0x122   : > { %2571 = vmatpush1.bf16.msra.mxu0 %v11981_v23  ;;  %v934_v23 = vrot.slane %v927_v9, %v13192_v63 }
 0x123   : > { %11502 = vmatprep.subr.bf16.mxu0 %v12748_v24 }
 0x124   : > { %2653 = vmatpush1.bf16.msra.mxu1 %v12041_v15 }
 0x125   : > { %10449 = vmatmul.mubr.msk.bf16.vlgmr.msra.gmra.mrb[8].mxu0 %vm2191_vm1, %v13011_v27  ;;  %11508 = vmatprep.subr.bf16.mxu1 %v12748_v24 }
 0x126   : > { %11504 = vmatprep.mubr.msk.bf16.mxu0 %vm12749_vm2, %v12748_v24 }
 0x127   : > { %10450 = vmatmul.mubr.msk.bf16.vlgmr.msra.gmra.mrb[8].mxu1 %vm2191_vm1, %v13011_v27 }
 0x128   : > { %11510 = vmatprep.mubr.msk.bf16.mxu1 %vm12749_vm2, %v12748_v24 }
 0x158   : > { %v13164_v36 = vpop.f32.mrb[0].mxu0  ;;  %v13166_v37 = vpop.f32.mrb[0].mxu1 }
 0x159   : > { %v13169_v39 = vpop.f32.mrb[1].mxu0  ;;  %v13171_v40 = vpop.f32.mrb[1].mxu1  ;;  %v11550_v31 = vadd.f32 %v13164_v36, %v934_v23  ;;  %v13237_v36 = vsub.s32 2, %v13161_v34 }
 0x15a   : > { %v2274_v42 = vpop.f32.mrb[2].mxu0  ;;  %v2356_v43 = vpop.f32.mrb[2].mxu1  ;;  %v11551_v44 = vadd.f32 %v13169_v39, %v938_v41  ;;  %v11553_v57 = vadd.f32 %v13171_v40, %v946_v55 }
 0x15b   : > { %v2275_v45 = vpop.f32.mrb[3].mxu0  ;;  %v2357_v46 = vpop.f32.mrb[3].mxu1  ;;  %v2687_v38 = vpack.c.bf16 %v11550_v31, %v11550_v31  ;;  %v958_v42 = vrot.slane %v927_v9, %v13230_v33  ;;  %v942_v47 = vrot.slane %v927_v9, %v13237_v36 }
 0x15c   : > { %v13242_v46 = vsub.s32 7, %v13161_v34  ;;  %v2790_v48 = vpack.c.bf16 %v11551_v44, %v11551_v44  ;;  %v2992_v58 = vpack.c.bf16 %v11553_v57, %v11553_v57 }
 0x15d   : > { %v11552_v39 = vadd.f32 %v13166_v37, %v942_v47  ;;  %v13258_v37 = vld [vmem:[%s14478_s16 + $0x8] sm:$0xf] }
 0x15e   : > { %v962_v50 = vrot.slane %v927_v9, %v13242_v46  ;;  %v966_v34 = vrot.slane %v13258_v37, %v13192_v63 }
 0x15f   : > { %v2891_v54 = vpack.c.bf16 %v11552_v39, %v11552_v39 }
 0x1a8   : > { %v2434_v18 = vpop.f32.mrb[4].mxu0  ;;  %v2516_v19 = vpop.f32.mrb[4].mxu1 }
 0x1a9   : > { %v11554_v20 = vadd.f32 %v2434_v18, %v950_v16  ;;  %v2436_v21 = vpop.f32.mrb[5].mxu0  ;;  %v2518_v22 = vpop.f32.mrb[5].mxu1  ;;  %v11556_v45 = vadd.f32 %v2516_v19, %v958_v42 }
 0x1aa   : > { %v2438_v25 = vpop.f32.mrb[6].mxu0  ;;  %v2520_v26 = vpop.f32.mrb[6].mxu1  ;;  %v11555_v35 = vadd.f32 %v2436_v21, %v954_v29  ;;  %v11557_v53 = vadd.f32 %v2518_v22, %v962_v50 }
 0x1ab   : > { %v2688_v28 = vpack.c.bf16 %v11554_v20, %v11554_v20  ;;  %v2439_v30 = vpop.f32.mrb[7].mxu0  ;;  %v2521_v27 = vpop.f32.mrb[7].mxu1  ;;  %v2892_v49 = vpack.c.bf16 %v11556_v45, %v11556_v45 }
 0x1ac   : > { %v2791_v43 = vpack.c.bf16 %v11555_v35, %v11555_v35  ;;  %v2993_v56 = vpack.c.bf16 %v11557_v53, %v11557_v53 }
 0x1ad   : > { %11503 = vmatpush3.bf16.xpose.msra.mxu0 %v2688_v28 }
 0x1ae   : > { %11514 = vmatprep.subr.bf16.mxu0 %v12748_v24 }
 0x1b4   : > { %11505 = vmatmul.mubr.bf16.vlgmr.msra.gmra.mrb[12].mxu0 %v2687_v38 }
 0x1b5   : > { %11515 = vmatpush3.bf16.xpose.msra.mxu0 %v2791_v43  ;;  %11516 = vmatprep.mubr.msk.bf16.mxu0 %vm12749_vm2, %v12748_v24 }
 0x1b6   : > { %11526 = vmatprep.subr.bf16.mxu0 %v12748_v24 }
 0x1bc   : > { %11517 = vmatmul.mubr.bf16.vlgmr.msra.gmra.mrb[16].mxu0 %v2790_v48 }
 0x1bd   : > { %11527 = vmatpush3.bf16.xpose.msra.mxu0 %v2892_v49  ;;  %11528 = vmatprep.mubr.msk.bf16.mxu0 %vm12749_vm2, %v12748_v24 }
 0x1be   : > { %11538 = vmatprep.subr.bf16.mxu0 %v12748_v24 }
 0x1c4   : > { %11529 = vmatmul.mubr.bf16.vlgmr.msra.gmra.mrb[20].mxu0 %v2891_v54 }
 0x1c5   : > { %11539 = vmatpush3.bf16.xpose.msra.mxu0 %v2993_v56  ;;  %11540 = vmatprep.mubr.msk.bf16.mxu0 %vm12749_vm2, %v12748_v24 }
 0x1cc   : > { %11541 = vmatmul.mubr.bf16.vlgmr.msra.gmra.mrb[24].mxu0 %v2992_v58  ;;  %v12044_v58 = vld [vmem:[%s14479_s30] ss:$12 sps:$4 sm:$0xff]  }
 0x1f8   : > { %v2598_v51 = vpop.f32.mrb[8].mxu0 }
 0x1f9   : > { %v11558_v59 = vadd.f32 %v2598_v51, %v966_v34  ;;  %v13262_v60 = vpop.f32.mrb[9].mxu0  ;;  %v12046_v34 = vld [vmem:[%s14479_s30 + $0x4] ss:$12 sps:$4 sm:$0xff]   ;;  %v12049_v51 = vld [vmem:[%s14479_s30 + $0x1c] ss:$12 sps:$4 sm:$0xff]  }
 0x1fa   : > { %v2602_v61 = vpop.f32.mrb[10].mxu0  ;;  %v13282_v39 = vpop.f32.mrb[8].mxu1  ;;  %3754 = vmatprep.subr.bf16.mxu0 %v12046_v34 }
 0x1fb   : > { %v2689_v62 = vpack.c.bf16 %v11558_v59, %v11558_v59  ;;  %v2603_v2 = vpop.f32.mrb[11].mxu0  ;;  %v13284_v53 = vpop.f32.mrb[9].mxu1  ;;  %3755 = vmatpush1.bf16.msra.mxu0 %v12044_v58  ;;  %v12047_v59 = vld [vmem:[%s14479_s30 + $0x18] ss:$12 sps:$4 sm:$0xff]   ;;  %v12052_v61 = vld [vmem:[%s14479_s30 + $0x34] ss:$12 sps:$4 sm:$0xff]  }
 0x1fc   : > { %v2684_v54 = vpop.f32.mrb[10].mxu1  ;;  %3756 = vmatprep.subr.bf16.mxu0 %v12049_v51  ;;  %v12055_v2 = vld [vmem:[%s14479_s30 + $0x4c] ss:$12 sps:$4 sm:$0xff]  }
 0x1fd   : > { %v2748_v3 = vsel %vm2746_vm3, %v2689_v62, 0  ;;  %v2685_v55 = vpop.f32.mrb[11].mxu1  ;;  %v12050_v62 = vld [vmem:[%s14479_s30 + $0x30] ss:$12 sps:$4 sm:$0xff]  }
 0x1fe   : > { %11509 = vmatpush3.bf16.msra.mxu1 %v2748_v3  ;;  %v12053_v3 = vld [vmem:[%s14479_s30 + $0x48] ss:$12 sps:$4 sm:$0xff]  }
 0x1ff   : > { %11520 = vmatprep.subr.bf16.mxu1 %v12748_v24  ;;  %3757 = vmatpush1.bf16.msra.mxu0 %v12047_v59 }
 0x200   : > { %3758 = vmatprep.subr.bf16.mxu0 %v12052_v61 }
 0x203   : > { %3759 = vmatpush1.bf16.msra.mxu0 %v12050_v62  ;;  %v12067_v62 = vld [vmem:[%s14479_s30 + $0x19c] ss:$12 sps:$4 sm:$0xff]  }
 0x204   : > { %3760 = vmatprep.subr.bf16.mxu0 %v12055_v2  ;;  %v12065_v2 = vld [vmem:[%s14479_s30 + $0x198] ss:$12 sps:$4 sm:$0xff]  }
 0x207   : > { %3761 = vmatpush1.bf16.msra.mxu0 %v12053_v3  ;;  %v12073_v3 = vld [vmem:[%s14479_s30 + $0x1b4] ss:$12 sps:$4 sm:$0xff]  }
 0x287   : > { %v2724_v40 = vpop.f32.mrb[12].mxu0 }
 0x288   : > { %v11506_v4 = vpop.f32.mrb[13].mxu0  ;;  %v2731_v5 = vsel %vm2730_vm4, %v2724_v40, -inf }
 0x289   : > { %2732 = vmax.xlane.f32.xlu0 %v2731_v5  ;;  %v2727_v6 = vpop.f32.mrb[14].mxu0  ;;  %v12056_v4 = vld [vmem:[%s14479_s30 + $0x60] ss:$12 sps:$4 sm:$0xff]   ;;  %v12064_v5 = vld [vmem:[%s14479_s30 + $0x7c] ss:$12 sps:$4 sm:$0xff]  }
 0x28a   : > { %v11507_v7 = vpop.f32.mrb[15].mxu0  ;;  %v12062_v6 = vld [vmem:[%s14479_s30 + $0x78] ss:$12 sps:$4 sm:$0xff]  }
 0x28b   : > { %v12070_v7 = vld [vmem:[%s14479_s30 + $0x94] ss:$12 sps:$4 sm:$0xff]  }
 0x28f   : > { %v2827_v8 = vpop.f32.mrb[16].mxu0 }
 0x290   : > { %v11518_v10 = vpop.f32.mrb[17].mxu0  ;;  %v2833_v11 = vsel %vm2730_vm4, %v2827_v8, -inf }
 0x291   : > { %2834 = vmax.xlane.f32.xlu0 %v2833_v11  ;;  %v2830_v12 = vpop.f32.mrb[18].mxu0  ;;  %v12076_v10 = vld [vmem:[%s14479_s30 + $0xac] ss:$12 sps:$4 sm:$0xff]   ;;  %v12074_v11 = vld [vmem:[%s14479_s30 + $0xa8] ss:$12 sps:$4 sm:$0xff]  }
 0x292   : > { %v11519_v13 = vpop.f32.mrb[19].mxu0  ;;  %v12082_v12 = vld [vmem:[%s14479_s30 + $0xc4] ss:$12 sps:$4 sm:$0xff]  }
 0x293   : > { %v12080_v13 = vld [vmem:[%s14479_s30 + $0xc0] ss:$12 sps:$4 sm:$0xff]  }
 0x297   : > { %v2928_v14 = vpop.f32.mrb[20].mxu0 }
 0x298   : > { %v11530_v15 = vpop.f32.mrb[21].mxu0  ;;  %v2934_v9 = vsel %vm2730_vm4, %v2928_v14, -inf }
 0x299   : > { %2935 = vmax.xlane.f32.xlu1 %v2934_v9  ;;  %v2931_v16 = vpop.f32.mrb[22].mxu0  ;;  %v12086_v15 = vld [vmem:[%s14479_s30 + $0xd8] ss:$12 sps:$4 sm:$0xff]   ;;  %v12094_v9 = vld [vmem:[%s14479_s30 + $0xf4] ss:$12 sps:$4 sm:$0xff]  }
 0x29a   : > { %v11531_v18 = vpop.f32.mrb[23].mxu0  ;;  %v12092_v16 = vld [vmem:[%s14479_s30 + $0xf0] ss:$12 sps:$4 sm:$0xff]  }
 0x29b   : > { %v12100_v18 = vld [vmem:[%s14479_s30 + $0x10c] ss:$12 sps:$4 sm:$0xff]  }
 0x29f   : > { %v3029_v19 = vpop.f32.mrb[24].mxu0 }
 0x2a0   : > { %v11542_v20 = vpop.f32.mrb[25].mxu0  ;;  %v3035_v21 = vsel %vm2730_vm4, %v3029_v19, -inf }
 0x2a1   : > { %3036 = vmax.xlane.f32.xlu1 %v3035_v21  ;;  %v3032_v22 = vpop.f32.mrb[26].mxu0  ;;  %v12106_v20 = vld [vmem:[%s14479_s30 + $0x124] ss:$12 sps:$4 sm:$0xff]   ;;  %v12104_v21 = vld [vmem:[%s14479_s30 + $0x120] ss:$12 sps:$4 sm:$0xff]  }
 0x2a2   : > { %v11543_v23 = vpop.f32.mrb[27].mxu0  ;;  %v12112_v22 = vld [vmem:[%s14479_s30 + $0x13c] ss:$12 sps:$4 sm:$0xff]  }
 0x2a3   : > { %v12110_v23 = vld [vmem:[%s14479_s30 + $0x138] ss:$12 sps:$4 sm:$0xff]  }
 0x316   : > { %v2733_v25 = vpop.xlane.xlu0 %2732 }
 0x317   : > { %v2734_v26 = vsub.f32 %v2724_v40, %v2733_v25  ;;  %v12058_v40 = vld [vmem:[%s14479_s30 + $0x64] ss:$12 sps:$4 sm:$0xff]  }
 0x318   : > { %3762 = vmatprep.subr.bf16.mxu0 %v12058_v40  ;;  %v12079_v40 = vld [vmem:[%s14479_s30 + $0x1cc] ss:$12 sps:$4 sm:$0xff]  }
 0x319   : > { %v2735_v28 = vmul.f32 1.442695, %v2734_v26  ;;  %3763 = vmatpush1.bf16.msra.mxu0 %v12056_v4  ;;  %v970_v26 = vrot.slane %v13258_v37, %v13226_v32  ;;  %v12085_v4 = vld [vmem:[%s14479_s30 + $0x1e4] ss:$12 sps:$4 sm:$0xff]  }
 0x31a   : > { %3764 = vmatprep.subr.bf16.mxu0 %v12064_v5  ;;  %v12083_v5 = vld [vmem:[%s14479_s30 + $0x1e0] ss:$12 sps:$4 sm:$0xff]  }
 0x31b   : > { %12684 = vpow2.f32 %v2735_v28  ;;  %v11559_v28 = vadd.f32 %v13262_v60, %v970_v26  ;;  %v12130_v26 = vld [vmem:[%s14479_s30 + $0x2a4] ss:$12 sps:$4 sm:$0xff]  }
 0x31d   : > { %3765 = vmatpush1.bf16.msra.mxu0 %v12062_v6  ;;  %v12091_v6 = vld [vmem:[%s14479_s30 + $0x1fc] ss:$12 sps:$4 sm:$0xff]  }
 0x31e   : > { %v2835_v29 = vpop.xlane.xlu0 %2834  ;;  %3766 = vmatprep.subr.bf16.mxu0 %v12070_v7  ;;  %v12089_v7 = vld [vmem:[%s14479_s30 + $0x1f8] ss:$12 sps:$4 sm:$0xff]  }
 0x31f   : > { %v2836_v30 = vsub.f32 %v2827_v8, %v2835_v29  ;;  %v12068_v8 = vld [vmem:[%s14479_s30 + $0x90] ss:$12 sps:$4 sm:$0xff]  }
 0x321   : > { %v2837_v27 = vmul.f32 1.442695, %v2836_v30  ;;  %3767 = vmatpush1.bf16.msra.mxu0 %v12068_v8  ;;  %v12097_v8 = vld [vmem:[%s14479_s30 + $0x214] ss:$12 sps:$4 sm:$0xff]  }
 0x322   : > { %3768 = vmatprep.subr.bf16.mxu0 %v12076_v10  ;;  %v12095_v10 = vld [vmem:[%s14479_s30 + $0x210] ss:$12 sps:$4 sm:$0xff]  }
 0x323   : > { %12686 = vpow2.f32 %v2837_v27  ;;  %v2792_v27 = vpack.c.bf16 %v11559_v28, %v11559_v28  ;;  %v12131_v28 = vld [vmem:[%s14479_s30 + $0xc8] ss:$12 sps:$4 sm:$0xff]  }
 0x325   : > { %v13270_v31 = vpop.eup %12684  ;;  %3769 = vmatpush1.bf16.msra.mxu0 %v12074_v11  ;;  %v12103_v11 = vld [vmem:[%s14479_s30 + $0x22c] ss:$12 sps:$4 sm:$0xff]  }
 0x326   : > { %v2936_v35 = vpop.xlane.xlu1 %2935  ;;  %v2737_v38 = vsel %vm2730_vm4, %v13270_v31, 0.0  ;;  %3770 = vmatprep.subr.bf16.mxu0 %v12082_v12  ;;  %v12101_v12 = vld [vmem:[%s14479_s30 + $0x228] ss:$12 sps:$4 sm:$0xff]  }
 0x327   : > { %v2937_v41 = vsub.f32 %v2928_v14, %v2936_v35  ;;  %2738 = vadd.xlane.f32.xlu0 %v2737_v38  ;;  %v12088_v14 = vld [vmem:[%s14479_s30 + $0xdc] ss:$12 sps:$4 sm:$0xff]   ;;  %v974_v38 = vrot.slane %v13258_v37, %v13237_v36 }
 0x329   : > { %v2938_v42 = vmul.f32 1.442695, %v2937_v41  ;;  %3771 = vmatpush1.bf16.msra.mxu0 %v12080_v13  ;;  %v12109_v13 = vld [vmem:[%s14479_s30 + $0x244] ss:$12 sps:$4 sm:$0xff]  }
 0x32a   : > { %3772 = vmatprep.subr.bf16.mxu0 %v12088_v14  ;;  %v12107_v14 = vld [vmem:[%s14479_s30 + $0x240] ss:$12 sps:$4 sm:$0xff]  }
 0x32b   : > { %12688 = vpow2.f32 %v2938_v42  ;;  %v2849_v42 = vsel %vm2746_vm3, %v2792_v27, 0  ;;  %v12135_v27 = vld [vmem:[%s14479_s30 + $0x2bc] ss:$12 sps:$4 sm:$0xff]  }
 0x32d   : > { %v13274_v43 = vpop.eup %12686  ;;  %3773 = vmatpush1.bf16.msra.mxu0 %v12086_v15  ;;  %v12115_v15 = vld [vmem:[%s14479_s30 + $0x25c] ss:$12 sps:$4 sm:$0xff]  }
 0x32e   : > { %v3037_v44 = vpop.xlane.xlu1 %3036  ;;  %v2839_v45 = vsel %vm2730_vm4, %v13274_v43, 0.0  ;;  %3774 = vmatprep.subr.bf16.mxu0 %v12094_v9  ;;  %v12113_v9 = vld [vmem:[%s14479_s30 + $0x258] ss:$12 sps:$4 sm:$0xff]  }
 0x32f   : > { %v3038_v47 = vsub.f32 %v3029_v19, %v3037_v44  ;;  %2840 = vadd.xlane.f32.xlu1 %v2839_v45  ;;  %v12098_v19 = vld [vmem:[%s14479_s30 + $0x108] ss:$12 sps:$4 sm:$0xff]   ;;  %v11560_v44 = vadd.f32 %v13282_v39, %v974_v38  ;;  %v12138_v38 = vld [vmem:[%s14479_s30 + $0x2d0] ss:$12 sps:$4 sm:$0xff]  }
 0x331   : > { %v3039_v48 = vmul.f32 1.442695, %v3038_v47  ;;  %3775 = vmatpush1.bf16.msra.mxu0 %v12092_v16  ;;  %v978_v47 = vrot.slane %v13258_v37, %v13250_v52  ;;  %v12118_v16 = vld [vmem:[%s14479_s30 + $0x154] ss:$12 sps:$4 sm:$0xff]  }
 0x332   : > { %3776 = vmatprep.subr.bf16.mxu0 %v12100_v18  ;;  %v12121_v18 = vld [vmem:[%s14479_s30 + $0x274] ss:$12 sps:$4 sm:$0xff]  }
 0x333   : > { %12690 = vpow2.f32 %v3039_v48  ;;  %v11561_v54 = vadd.f32 %v13284_v53, %v978_v47  ;;  %v12061_v53 = vld [vmem:[%s14479_s30 + $0x184] ss:$12 sps:$4 sm:$0xff]  }
 0x335   : > { %v13278_v49 = vpop.eup %12688  ;;  %3777 = vmatpush1.bf16.msra.mxu0 %v12098_v19  ;;  %v12116_v19 = vld [vmem:[%s14479_s30 + $0x150] ss:$12 sps:$4 sm:$0xff]  }
 0x336   : > { %v2940_v50 = vsel %vm2730_vm4, %v13278_v49, 0.0  ;;  %3778 = vmatprep.subr.bf16.mxu0 %v12106_v20  ;;  %v12119_v20 = vld [vmem:[%s14479_s30 + $0x270] ss:$12 sps:$4 sm:$0xff]  }
 0x337   : > { %2941 = vadd.xlane.f32.xlu0 %v2940_v50 }
 0x339   : > { %3779 = vmatpush1.bf16.msra.mxu0 %v12104_v21  ;;  %v12124_v21 = vld [vmem:[%s14479_s30 + $0x16c] ss:$12 sps:$4 sm:$0xff]  }
 0x33a   : > { %3780 = vmatprep.subr.bf16.mxu0 %v12112_v22  ;;  %v12127_v22 = vld [vmem:[%s14479_s30 + $0x28c] ss:$12 sps:$4 sm:$0xff]  }
 0x33d   : > { %v13286_v56 = vpop.eup %12690  ;;  %3781 = vmatpush1.bf16.msra.mxu0 %v12110_v23  ;;  %v12122_v23 = vld [vmem:[%s14479_s30 + $0x168] ss:$12 sps:$4 sm:$0xff]  }
 0x33e   : > { %v3041_v57 = vsel %vm2730_vm4, %v13286_v56, 0.0  ;;  %3782 = vmatprep.subr.bf16.mxu0 %v12118_v16  ;;  %v12159_v16 = vld [vmem:[%s14479_s30 + $0x1b8] ss:$12 sps:$4 sm:$0xff]  }
 0x33f   : > { %3042 = vadd.xlane.f32.xlu1 %v3041_v57  ;;  %v2994_v57 = vpack.c.bf16 %v11561_v54, %v11561_v54  ;;  %v12132_v54 = vld [vmem:[%s14479_s30 + $0x8] ss:$12 sps:$4 sm:$0xff]  }
 0x341   : > { %v3051_v34 = vsel %vm2746_vm3, %v2994_v57, 0  ;;  %3783 = vmatpush1.bf16.msra.mxu0 %v12116_v19  ;;  %v12136_v57 = vld [vmem:[%s14479_s30 + $0xe0] ss:$12 sps:$4 sm:$0xff]   ;;  %v12161_v19 = vld [vmem:[%s14479_s30 + $0x290] ss:$12 sps:$4 sm:$0xff]  }
 0x342   : > { %3784 = vmatprep.subr.bf16.mxu0 %v12124_v21  ;;  %v12163_v21 = vld [vmem:[%s14479_s30 + $0x1d0] ss:$12 sps:$4 sm:$0xff]  }
 0x345   : > { %3785 = vmatpush1.bf16.msra.mxu0 %v12122_v23  ;;  %v12165_v23 = vld [vmem:[%s14479_s30 + $0x1e8] ss:$12 sps:$4 sm:$0xff]  }
 0x346   : > { %11282 = vmatprep.subr.bf16.mxu0 %v12131_v28  ;;  %v12168_v28 = vld [vmem:[%s14479_s30 + $0x2d8] ss:$12 sps:$4 sm:$0xff]  }
 0x3b4   : > { %v2739_v25 = vpop.xlane.xlu0 %2738 }
 0x3b5   : > { %12692 = vrcp.f32 %v2739_v25  ;;  %v12125_v25 = vld [vmem:[%s14479_s30 + $0x288] ss:$12 sps:$4 sm:$0xff]  }
 0x3bc   : > { %v2841_v29 = vpop.xlane.xlu1 %2840 }
 0x3bd   : > { %12694 = vrcp.f32 %v2841_v29  ;;  %v12128_v29 = vld [vmem:[%s14479_s30 + $0x2a0] ss:$12 sps:$4 sm:$0xff]  }
 0x3bf   : > { %v12693_v30 = vpop.eup %12692 }
 0x3c0   : > { %v2741_v35 = vmul.f32 %v12693_v30, %v13270_v31  ;;  %v2893_v31 = vpack.c.bf16 %v11560_v44, %v11560_v44  ;;  %v12133_v30 = vld [vmem:[%s14479_s30 + $0x2b8] ss:$12 sps:$4 sm:$0xff]   ;;  %v12149_v44 = vld [vmem:[%s14479_s30 + $0x248] ss:$12 sps:$4 sm:$0xff]  }
 0x3c2   : > { %v2742_v41 = vpack.c.bf16 %v2741_v35, %v2741_v35  ;;  %v2950_v39 = vsel %vm2746_vm3, %v2893_v31, 0  ;;  %v12140_v35 = vld [vmem:[%s14479_s30 + $0x2d4] ss:$12 sps:$4 sm:$0xff]  }
 0x3c4   : > { %11511 = vmatmul.mubr.msk.bf16.vlgmr.msra.gmra.mrb[12].mxu1 %vm2730_vm4, %v2742_v41  ;;  %v2942_v45 = vpop.xlane.xlu0 %2941  ;;  %v12143_v41 = vld [vmem:[%s14479_s30 + $0x2e8] ss:$12 sps:$4 sm:$0xff]  }
 0x3c5   : > { %11521 = vmatpush3.bf16.msra.mxu1 %v2849_v42  ;;  %12696 = vrcp.f32 %v2942_v45  ;;  %11522 = vmatprep.mubr.msk.bf16.mxu1 %vm12749_vm2, %v12748_v24  ;;  %v12145_v42 = vld [vmem:[%s14479_s30 + $0x2ec] ss:$12 sps:$4 sm:$0xff]  }
 0x3c6   : > { %11532 = vmatprep.subr.bf16.mxu1 %v12748_v24 }
 0x3c7   : > { %v12695_v60 = vpop.eup %12694 }
 0x3c8   : > { %v2843_v48 = vmul.f32 %v12695_v60, %v13274_v43 }
 0x3ca   : > { %v2844_v50 = vpack.c.bf16 %v2843_v48, %v2843_v48 }
 0x3cc   : > { %11523 = vmatmul.mubr.msk.bf16.vlgmr.msra.gmra.mrb[16].mxu1 %vm2730_vm4, %v2844_v50  ;;  %v3043_v55 = vpop.xlane.xlu1 %3042 }
 0x3cd   : > { %11533 = vmatpush3.bf16.msra.mxu1 %v2950_v39  ;;  %12698 = vrcp.f32 %v3043_v55  ;;  %11534 = vmatprep.mubr.msk.bf16.mxu1 %vm12749_vm2, %v12748_v24 }
 0x3ce   : > { %11544 = vmatprep.subr.bf16.mxu1 %v12748_v24 }
 0x3cf   : > { %v12697_v37 = vpop.eup %12696 }
 0x3d0   : > { %v2944_v43 = vmul.f32 %v12697_v37, %v13278_v49  ;;  %v12059_v49 = vld [vmem:[%s14479_s30 + $0x180] ss:$12 sps:$4 sm:$0xff]  }
 0x3d2   : > { %v2945_v58 = vpack.c.bf16 %v2944_v43, %v2944_v43 }
 0x3d4   : > { %11535 = vmatmul.mubr.msk.bf16.vlgmr.msra.gmra.mrb[20].mxu1 %vm2730_vm4, %v2945_v58  ;;  %v12137_v58 = vld [vmem:[%s14479_s30 + $0x20] ss:$12 sps:$4 sm:$0xff]  }
 0x3d5   : > { %11545 = vmatpush3.bf16.msra.mxu1 %v3051_v34  ;;  %11546 = vmatprep.mubr.msk.bf16.mxu1 %vm12749_vm2, %v12748_v24  ;;  %v12071_v24 = vld [vmem:[%s14479_s30 + $0x1b0] ss:$12 sps:$4 sm:$0xff]  }
 0x3d6   : > { %3795 = vmatprep.subr.bf16.mxu1 %v12061_v53  ;;  %v12141_v53 = vld [vmem:[%s14479_s30 + $0xf8] ss:$12 sps:$4 sm:$0xff]  }
 0x3d7   : > { %v12699_v51 = vpop.eup %12698 }
 0x3d8   : > { %v3045_v59 = vmul.f32 %v12699_v51, %v13286_v56  ;;  %v12077_v56 = vld [vmem:[%s14479_s30 + $0x1c8] ss:$12 sps:$4 sm:$0xff]  }
 0x3da   : > { %v3046_v61 = vpack.c.bf16 %v3045_v59, %v3045_v59  ;;  %v12142_v59 = vld [vmem:[%s14479_s30 + $0x38] ss:$12 sps:$4 sm:$0xff]  }
 0x3dc   : > { %11547 = vmatmul.mubr.msk.bf16.vlgmr.msra.gmra.mrb[24].mxu1 %vm2730_vm4, %v3046_v61  ;;  %v12146_v61 = vld [vmem:[%s14479_s30 + $0x110] ss:$12 sps:$4 sm:$0xff]  }
 0x3dd   : > { %3796 = vmatpush1.bf16.msra.mxu1 %v12059_v49 }
 0x3de   : > { %3797 = vmatprep.subr.bf16.mxu1 %v12067_v62 }
 0x3e1   : > { %3798 = vmatpush1.bf16.msra.mxu1 %v12065_v2  ;;  %v12147_v2 = vld [vmem:[%s14479_s30 + $0x50] ss:$12 sps:$4 sm:$0xff]  }
 0x3e2   : > { %3799 = vmatprep.subr.bf16.mxu1 %v12073_v3  ;;  %v12148_v3 = vld [vmem:[%s14479_s30 + $0x128] ss:$12 sps:$4 sm:$0xff]  }
 0x3e5   : > { %3800 = vmatpush1.bf16.msra.mxu1 %v12071_v24 }
 0x3e6   : > { %3801 = vmatprep.subr.bf16.mxu1 %v12079_v40 }
 0x3e9   : > { %3802 = vmatpush1.bf16.msra.mxu1 %v12077_v56 }
 0x3ea   : > { %3803 = vmatprep.subr.bf16.mxu1 %v12085_v4  ;;  %v12150_v4 = vld [vmem:[%s14479_s30 + $0x68] ss:$12 sps:$4 sm:$0xff]  }
 0x3ed   : > { %3804 = vmatpush1.bf16.msra.mxu1 %v12083_v5  ;;  %v12151_v5 = vld [vmem:[%s14479_s30 + $0x188] ss:$12 sps:$4 sm:$0xff]  }
 0x3ee   : > { %3805 = vmatprep.subr.bf16.mxu1 %v12091_v6 }
 0x3f1   : > { %3806 = vmatpush1.bf16.msra.mxu1 %v12089_v7 }
 0x3f2   : > { %3807 = vmatprep.subr.bf16.mxu1 %v12097_v8  ;;  %v12152_v8 = vld [vmem:[%s14479_s30 + $0x140] ss:$12 sps:$4 sm:$0xff]  }
 0x3f5   : > { %3808 = vmatpush1.bf16.msra.mxu1 %v12095_v10 }
 0x3f6   : > { %3809 = vmatprep.subr.bf16.mxu1 %v12103_v11  ;;  %v12153_v11 = vld [vmem:[%s14479_s30 + $0x260] ss:$12 sps:$4 sm:$0xff]  }
 0x3f9   : > { %3810 = vmatpush1.bf16.msra.mxu1 %v12101_v12  ;;  %v12154_v12 = vld [vmem:[%s14479_s30 + $0x80] ss:$12 sps:$4 sm:$0xff]  }
 0x3fa   : > { %3811 = vmatprep.subr.bf16.mxu1 %v12109_v13  ;;  %v12155_v13 = vld [vmem:[%s14479_s30 + $0x1a0] ss:$12 sps:$4 sm:$0xff]  }
 0x3fd   : > { %3812 = vmatpush1.bf16.msra.mxu1 %v12107_v14  ;;  %v12156_v14 = vld [vmem:[%s14479_s30 + $0x158] ss:$12 sps:$4 sm:$0xff]  }
 0x3fe   : > { %3813 = vmatprep.subr.bf16.mxu1 %v12115_v15  ;;  %v12157_v15 = vld [vmem:[%s14479_s30 + $0x278] ss:$12 sps:$4 sm:$0xff]  }
 0x401   : > { %3814 = vmatpush1.bf16.msra.mxu1 %v12113_v9  ;;  %v12158_v9 = vld [vmem:[%s14479_s30 + $0x98] ss:$12 sps:$4 sm:$0xff]  }
 0x402   : > { %3815 = vmatprep.subr.bf16.mxu1 %v12121_v18  ;;  %v12160_v18 = vld [vmem:[%s14479_s30 + $0x170] ss:$12 sps:$4 sm:$0xff]  }
 0x405   : > { %3816 = vmatpush1.bf16.msra.mxu1 %v12119_v20  ;;  %v12162_v20 = vld [vmem:[%s14479_s30 + $0xb0] ss:$12 sps:$4 sm:$0xff]  }
 0x406   : > { %3817 = vmatprep.subr.bf16.mxu1 %v12127_v22  ;;  %v12164_v22 = vld [vmem:[%s14479_s30 + $0x2a8] ss:$12 sps:$4 sm:$0xff]  }
 0x409   : > { %3818 = vmatpush1.bf16.msra.mxu1 %v12125_v25  ;;  %v12166_v25 = vld [vmem:[%s14479_s30 + $0x2c0] ss:$12 sps:$4 sm:$0xff]  }
 0x40a   : > { %3819 = vmatprep.subr.bf16.mxu1 %v12130_v26  ;;  %v12167_v26 = vld [vmem:[%s14479_s30 + $0x200] ss:$12 sps:$4 sm:$0xff]  }
 0x40d   : > { %3820 = vmatpush1.bf16.msra.mxu1 %v12128_v29  ;;  %v12169_v29 = vld [vmem:[%s14479_s30 + $0x218] ss:$12 sps:$4 sm:$0xff]  }
 0x40e   : > { %3821 = vmatprep.subr.bf16.mxu1 %v12135_v27  ;;  %v12171_v27 = vld [vmem:[%s14479_s30 + $0x230] ss:$12 sps:$4 sm:$0xff]  }
 0x411   : > { %3822 = vmatpush1.bf16.msra.mxu1 %v12133_v30  ;;  %v12170_v30 = vld [vmem:[%s14479_s30 + $0x2f0] ss:$12 sps:$4 sm:$0xff]  }
 0x412   : > { %3823 = vmatprep.subr.bf16.mxu1 %v12140_v35 }
 0x415   : > { %3824 = vmatpush1.bf16.msra.mxu1 %v12138_v38 }
 0x416   : > { %3825 = vmatprep.subr.bf16.mxu1 %v12145_v42 }
 0x419   : > { %3826 = vmatpush1.bf16.msra.mxu1 %v12143_v41 }
 0x41a   : > { %11304 = vmatprep.subr.bf16.mxu1 %v12149_v44  ;;  %v3225_v44 = vld [vmem:[%s14480_s13] sm:$0x7] }
 0x497   : > { %v2784_v45 = vpop.f32.mrb[12].mxu1 }
 0x498   : > { %v11512_v60 = vpop.f32.mrb[13].mxu1  ;;  %v13385_v55 = vpack.c.bf16 %v2784_v45, %v2784_v45  ;;  %v3230_v45 = vrot.slane %v3225_v44, %v13192_v63 }
 0x499   : > { %v2787_v31 = vpop.f32.mrb[14].mxu1  ;;  %v3234_v60 = vrot.slane %v3225_v44, %v13226_v32 }
 0x49a   : > { %v11513_v47 = vpop.f32.mrb[15].mxu1 }
 0x49f   : > { %v2885_v48 = vpop.f32.mrb[16].mxu1 }
 0x4a0   : > { %v3094_v50 = vpack.c.bf16 %v2885_v48, %v2885_v48  ;;  %v11524_v39 = vpop.f32.mrb[17].mxu1 }
 0x4a1   : > { %v2888_v37 = vpop.f32.mrb[18].mxu1 }
 0x4a2   : > { %v11525_v43 = vpop.f32.mrb[19].mxu1  ;;  %3786 = vmatprep.mubr.bf16.mxu0 %v3094_v50 }
 0x4a3   : > { %3787 = vmatmul.mubr.bf16.vlgmr.msra.gmra.mrb[28].mxu0 %v13385_v55 }
 0x4a4   : > { %11283 = vmatpush3.bf16.msra.mxu0 %v12132_v54  ;;  %3868 = vmatprep.mubr.bf16.mxu0 %v3094_v50 }
 0x4a5   : > { %11284 = vmatprep.subr.bf16.mxu0 %v12136_v57 }
 0x4a7   : > { %v2986_v34 = vpop.f32.mrb[20].mxu1 }
 0x4a8   : > { %11285 = vmatpush3.bf16.msra.mxu0 %v12137_v58  ;;  %v11536_v51 = vpop.f32.mrb[21].mxu1  ;;  %v3095_v6 = vpack.c.bf16 %v2986_v34, %v2986_v34 }
 0x4a9   : > { %v2989_v49 = vpop.f32.mrb[22].mxu1  ;;  %11286 = vmatprep.subr.bf16.mxu0 %v12141_v53  ;;  %v3238_v51 = vrot.slane %v3225_v44, %v13237_v36  ;;  %v4034_v44 = vld [vmem:[%s12889_s29 + $0x180] sm:$0xff] }
 0x4aa   : > { %v11537_v62 = vpop.f32.mrb[23].mxu1 }
 0x4ac   : > { %11287 = vmatpush3.bf16.msra.mxu0 %v12142_v59 }
 0x4ad   : > { %11288 = vmatprep.subr.bf16.mxu0 %v12146_v61 }
 0x4af   : > { %v3087_v24 = vpop.f32.mrb[24].mxu1 }
 0x4b0   : > { %v3096_v40 = vpack.c.bf16 %v3087_v24, %v3087_v24  ;;  %11289 = vmatpush3.bf16.msra.mxu0 %v12147_v2  ;;  %v11548_v56 = vpop.f32.mrb[25].mxu1 }
 0x4b1   : > { %v3090_v7 = vpop.f32.mrb[26].mxu1  ;;  %11290 = vmatprep.subr.bf16.mxu0 %v12148_v3  ;;  %v12704_v3 = vld [vmem:[#allocation2] sm:$0xff] }
 0x4b2   : > { %v11549_v10 = vpop.f32.mrb[27].mxu1  ;;  %3827 = vmatprep.mubr.bf16.mxu1 %v3096_v40 }
 0x4b3   : > { %3828 = vmatmul.mubr.bf16.vlgmr.msra.gmra.mrb[28].mxu1 %v3095_v6 }
 0x4b4   : > { %11291 = vmatpush3.bf16.msra.mxu0 %v12150_v4  ;;  %11305 = vmatpush3.bf16.msra.mxu1 %v12151_v5 }
 0x4b5   : > { %3908 = vmatprep.mubr.bf16.mxu1 %v3096_v40  ;;  %11292 = vmatprep.subr.bf16.mxu0 %v12152_v8  ;;  %v12705_v40 = vld [vmem:[#allocation2 + $0x8] sm:$0xff] }
 0x4b6   : > { %11306 = vmatprep.subr.bf16.mxu1 %v12153_v11 }
 0x4b8   : > { %11293 = vmatpush3.bf16.msra.mxu0 %v12154_v12  ;;  %11307 = vmatpush3.bf16.msra.mxu1 %v12155_v13  ;;  %v3986_v12 = vld [vmem:[%s12889_s29] sm:$0xff] }
 0x4b9   : > { %11294 = vmatprep.subr.bf16.mxu0 %v12156_v14  ;;  %11308 = vmatprep.subr.bf16.mxu1 %v12157_v15  ;;  %v3994_v13 = vld [vmem:[%s12889_s29 + $0x40] sm:$0xff]  ;;  %v3987_v14 = vld [vmem:[%s12889_s29 + $0x8] sm:$0xff] }
 0x4ba   : > { %v10551_v15 = vcombine.low %v3986_v12, %v3994_v13 }
 0x4bc   : > { %11295 = vmatpush3.bf16.msra.mxu0 %v12158_v9  ;;  %11309 = vmatpush3.bf16.msra.mxu1 %v12159_v16  ;;  %v10552_v9 = vcombine.high %v3986_v12, %v3994_v13  ;;  %v3995_v16 = vld [vmem:[%s12889_s29 + $0x48] sm:$0xff] }
 0x4bd   : > { %11296 = vmatprep.subr.bf16.mxu0 %v12160_v18  ;;  %11310 = vmatprep.subr.bf16.mxu1 %v12161_v19  ;;  %v4002_v18 = vld [vmem:[%s12889_s29 + $0x80] sm:$0xff] }
 0x4be   : > { %v4010_v19 = vld [vmem:[%s12889_s29 + $0xc0] sm:$0xff] }
 0x4c0   : > { %11297 = vmatpush3.bf16.msra.mxu0 %v12162_v20  ;;  %11311 = vmatpush3.bf16.msra.mxu1 %v12163_v21  ;;  %v10553_v20 = vcombine.low %v3987_v14, %v3995_v16  ;;  %v10554_v21 = vcombine.high %v3987_v14, %v3995_v16  ;;  %v4098_v14 = vld [vmem:[%s12889_s29 + $0x380] sm:$0xff]  ;;  %v4107_v16 = vld [vmem:[%s12889_s29 + $0x3c8] sm:$0xff] }
 0x4c1   : > { %11312 = vmatprep.subr.bf16.mxu1 %v12164_v22  ;;  %v10568_v22 = vcombine.high %v4002_v18, %v4010_v19  ;;  %5993 = vmatprep.subr.bf16.mxu0 %v10552_v9  ;;  %v4099_v9 = vld [vmem:[%s12889_s29 + $0x388] sm:$0xff] }
 0x4c3   : > { %3869 = vmatmul.mubr.bf16.vlgmr.msra.gmra.mrb[32].mxu0 %v13385_v55 }
 0x4c4   : > { %11313 = vmatpush3.bf16.msra.mxu1 %v12165_v23  ;;  %v4003_v23 = vld [vmem:[%s12889_s29 + $0x88] sm:$0xff]  ;;  %5994 = vmatpush1.bf16.msra.mxu0 %v10551_v15  ;;  %v4106_v15 = vld [vmem:[%s12889_s29 + $0x3c0] sm:$0xff] }
 0x4c5   : > { %11314 = vmatprep.subr.bf16.mxu1 %v12166_v25  ;;  %v4011_v25 = vld [vmem:[%s12889_s29 + $0xc8] sm:$0xff]  ;;  %5995 = vmatprep.subr.bf16.mxu0 %v10568_v22  ;;  %v4114_v22 = vld [vmem:[%s12889_s29 + $0x400] sm:$0xff] }
 0x4c8   : > { %11315 = vmatpush3.bf16.msra.mxu1 %v12167_v26  ;;  %v4018_v26 = vld [vmem:[%s12889_s29 + $0x100] sm:$0xff] }
 0x4c9   : > { %11316 = vmatprep.subr.bf16.mxu1 %v12168_v28  ;;  %v10570_v28 = vcombine.high %v4003_v23, %v4011_v25 }
 0x4cc   : > { %11317 = vmatpush3.bf16.msra.mxu1 %v12169_v29  ;;  %v4026_v29 = vld [vmem:[%s12889_s29 + $0x140] sm:$0xff] }
 0x4cd   : > { %11318 = vmatprep.subr.bf16.mxu1 %v12170_v30  ;;  %v4019_v30 = vld [vmem:[%s12889_s29 + $0x108] sm:$0xff] }
 0x4d0   : > { %11319 = vmatpush3.bf16.msra.mxu1 %v12171_v27  ;;  %v4027_v27 = vld [vmem:[%s12889_s29 + $0x148] sm:$0xff] }
 0x4d1   : > { %6075 = vmatprep.subr.bf16.mxu1 %v10554_v21  ;;  %v10666_v21 = vcombine.high %v4099_v9, %v4107_v16 }
 0x4d3   : > { %3909 = vmatmul.mubr.bf16.vlgmr.msra.gmra.mrb[32].mxu1 %v3095_v6  ;;  %v12706_v6 = vld [vmem:[#allocation2 + $0x10] sm:$0xff] }
 0x4d4   : > { %6076 = vmatpush1.bf16.msra.mxu1 %v10553_v20  ;;  %v10664_v20 = vcombine.high %v4098_v14, %v4106_v15 }
 0x4d5   : > { %6077 = vmatprep.subr.bf16.mxu1 %v10570_v28  ;;  %v10663_v28 = vcombine.low %v4098_v14, %v4106_v15  ;;  %v4179_v14 = vld [vmem:[%s12889_s29 + $0x608] sm:$0xff] }
 0x576   : > { %v3788_v35 = vpop.f32.mrb[28].mxu0 }
 0x577   : > { %v3790_v38 = vpop.f32.mrb[29].mxu0  ;;  %v3789_v31 = vadd.f32 %v3788_v35, %v3230_v45  ;;  %v10567_v35 = vcombine.low %v4002_v18, %v4010_v19  ;;  %v4042_v45 = vld [vmem:[%s12889_s29 + $0x1c0] sm:$0xff] }
 0x578   : > { %v3792_v41 = vpop.f32.mrb[30].mxu0  ;;  %v3791_v47 = vadd.f32 %v3790_v38, %v3234_v60  ;;  %v10569_v38 = vcombine.low %v4003_v23, %v4011_v25  ;;  %v4035_v60 = vld [vmem:[%s12889_s29 + $0x188] sm:$0xff]  ;;  %v4122_v23 = vld [vmem:[%s12889_s29 + $0x440] sm:$0xff] }
 0x579   : > { %v3793_v42 = vpop.f32.mrb[31].mxu0  ;;  %v10584_v41 = vcombine.high %v4018_v26, %v4026_v29  ;;  %5996 = vmatpush1.bf16.msra.mxu0 %v10567_v35  ;;  %v4115_v25 = vld [vmem:[%s12889_s29 + $0x408] sm:$0xff]  ;;  %v4130_v35 = vld [vmem:[%s12889_s29 + $0x480] sm:$0xff] }
 0x57a   : > { %v10586_v42 = vcombine.high %v4019_v30, %v4027_v27  ;;  %6078 = vmatpush1.bf16.msra.mxu1 %v10569_v38  ;;  %v4138_v38 = vld [vmem:[%s12889_s29 + $0x4c0] sm:$0xff] }
 0x57b   : > { %5997 = vmatprep.subr.bf16.mxu0 %v10584_v41  ;;  %v4131_v41 = vld [vmem:[%s12889_s29 + $0x488] sm:$0xff] }
 0x57c   : > { %6079 = vmatprep.subr.bf16.mxu1 %v10586_v42  ;;  %v4139_v42 = vld [vmem:[%s12889_s29 + $0x4c8] sm:$0xff] }
 0x586   : > { %v3829_v48 = vpop.f32.mrb[28].mxu1 }
 0x587   : > { %v3830_v50 = vadd.f32 %v3829_v48, %v3789_v31  ;;  %v3831_v39 = vpop.f32.mrb[29].mxu1  ;;  %v4043_v31 = vld [vmem:[%s12889_s29 + $0x1c8] sm:$0xff]  ;;  %v10585_v48 = vcombine.low %v4019_v30, %v4027_v27  ;;  %v10680_v30 = vcombine.high %v4114_v22, %v4122_v23 }
 0x588   : > { %v3832_v54 = vadd.f32 %v3831_v39, %v3791_v47  ;;  %v3833_v55 = vpop.f32.mrb[30].mxu1  ;;  %v10583_v47 = vcombine.low %v4018_v26, %v4026_v29  ;;  %v10602_v39 = vcombine.high %v4035_v60, %v4043_v31  ;;  %v4123_v26 = vld [vmem:[%s12889_s29 + $0x448] sm:$0xff]  ;;  %v10665_v29 = vcombine.low %v4099_v9, %v4107_v16 }
 0x589   : > { %v3834_v37 = vpop.f32.mrb[31].mxu1  ;;  %v13426_v24 = vadd.f32 %v12704_v3, %v3830_v50  ;;  %v10600_v50 = vcombine.high %v4034_v44, %v4042_v45  ;;  %v4058_v55 = vld [vmem:[%s12889_s29 + $0x240] sm:$0xff]  ;;  %6080 = vmatpush1.bf16.msra.mxu1 %v10585_v48  ;;  %v10682_v27 = vcombine.high %v4115_v25, %v4123_v26  ;;  %v4187_v9 = vld [vmem:[%s12889_s29 + $0x648] sm:$0xff] }
 0x58a   : > { %v13428_v56 = vadd.f32 %v12705_v40, %v3832_v54  ;;  %v4050_v54 = vld [vmem:[%s12889_s29 + $0x200] sm:$0xff]  ;;  %v4051_v37 = vld [vmem:[%s12889_s29 + $0x208] sm:$0xff]  ;;  %5998 = vmatpush1.bf16.msra.mxu0 %v10583_v47  ;;  %6081 = vmatprep.subr.bf16.mxu1 %v10602_v39 }
 0x58b   : > { %5999 = vmatprep.subr.bf16.mxu0 %v10600_v50  ;;  %v4146_v47 = vld [vmem:[%s12889_s29 + $0x500] sm:$0xff]  ;;  %v4147_v50 = vld [vmem:[%s12889_s29 + $0x508] sm:$0xff] }
 0x58c   : > { %v3921_v8 = vadd.f32 %v13428_v56, %v13426_v24  ;;  %v4154_v48 = vld [vmem:[%s12889_s29 + $0x540] sm:$0xff]  ;;  %v4155_v39 = vld [vmem:[%s12889_s29 + $0x548] sm:$0xff] }
 0x596   : > { %v11298_v57 = vpop.f32.mrb[32].mxu0 }
 0x597   : > { %v11299_v43 = vpop.f32.mrb[33].mxu0 }
 0x598   : > { %v11300_v58 = vadd.f32 %v11299_v43, %v11298_v57  ;;  %v11301_v53 = vpop.f32.mrb[34].mxu0  ;;  %v4059_v57 = vld [vmem:[%s12889_s29 + $0x248] sm:$0xff]  ;;  %v10599_v43 = vcombine.low %v4034_v44, %v4042_v45  ;;  %v10679_v44 = vcombine.low %v4114_v22, %v4122_v23  ;;  %v10681_v45 = vcombine.low %v4115_v25, %v4123_v26 }
 0x599   : > { %v11302_v34 = vpop.f32.mrb[35].mxu0  ;;  %v10616_v53 = vcombine.high %v4050_v54, %v4058_v55  ;;  %v4195_v22 = vld [vmem:[%s12889_s29 + $0x688] sm:$0xff] }
 0x59a   : > { %v3871_v61 = vadd.f32 %v11300_v58, %v3238_v51  ;;  %v10601_v58 = vcombine.low %v4035_v60, %v4043_v31  ;;  %v10618_v34 = vcombine.high %v4051_v37, %v4059_v57  ;;  %v4066_v51 = vld [vmem:[%s12889_s29 + $0x280] sm:$0xff]  ;;  %6000 = vmatpush1.bf16.msra.mxu0 %v10599_v43  ;;  %v10696_v60 = vcombine.high %v4130_v35, %v4138_v38  ;;  %v4203_v25 = vld [vmem:[%s12889_s29 + $0x6c8] sm:$0xff] }
 0x59b   : > { %6001 = vmatprep.subr.bf16.mxu0 %v10616_v53  ;;  %v10698_v31 = vcombine.high %v4131_v41, %v4139_v42  ;;  %v10711_v43 = vcombine.low %v4146_v47, %v4154_v48 }
 0x59c   : > { %6082 = vmatpush1.bf16.msra.mxu1 %v10601_v58  ;;  %v10713_v58 = vcombine.low %v4147_v50, %v4155_v39 }
 0x59d   : > { %6083 = vmatprep.subr.bf16.mxu1 %v10618_v34 }
 0x5a6   : > { %v11320_v59 = vpop.f32.mrb[32].mxu1 }
 0x5a7   : > { %v11321_v49 = vpop.f32.mrb[33].mxu1 }
 0x5a8   : > { %v11322_v62 = vadd.f32 %v11321_v49, %v11320_v59  ;;  %v11323_v2 = vpop.f32.mrb[34].mxu1  ;;  %v4074_v59 = vld [vmem:[%s12889_s29 + $0x2c0] sm:$0xff]  ;;  %v4067_v49 = vld [vmem:[%s12889_s29 + $0x288] sm:$0xff] }
 0x5a9   : > { %v11324_v4 = vpop.f32.mrb[35].mxu1  ;;  %v10617_v2 = vcombine.low %v4051_v37, %v4059_v57  ;;  %v10632_v3 = vcombine.high %v4066_v51, %v4074_v59  ;;  %v10712_v37 = vcombine.high %v4146_v47, %v4154_v48  ;;  %v10714_v57 = vcombine.high %v4147_v50, %v4155_v39  ;;  %v4227_v47 = vld [vmem:[%s12889_s29 + $0x788] sm:$0xff] }
 0x5aa   : > { %v3911_v5 = vadd.f32 %v11322_v62, %v3871_v61  ;;  %v4075_v61 = vld [vmem:[%s12889_s29 + $0x2c8] sm:$0xff]  ;;  %v10615_v62 = vcombine.low %v4050_v54, %v4058_v55  ;;  %v4082_v4 = vld [vmem:[%s12889_s29 + $0x300] sm:$0xff]  ;;  %v10695_v54 = vcombine.low %v4130_v35, %v4138_v38  ;;  %v10697_v55 = vcombine.low %v4131_v41, %v4139_v42 }
 0x5ab   : > { %v10634_v40 = vcombine.high %v4067_v49, %v4075_v61  ;;  %6084 = vmatpush1.bf16.msra.mxu1 %v10617_v2  ;;  %v4211_v35 = vld [vmem:[%s12889_s29 + $0x708] sm:$0xff] }
 0x5ac   : > { %v13430_v7 = vadd.f32 %v12706_v6, %v3911_v5  ;;  %v4090_v5 = vld [vmem:[%s12889_s29 + $0x340] sm:$0xff]  ;;  %v4083_v6 = vld [vmem:[%s12889_s29 + $0x308] sm:$0xff]  ;;  %6002 = vmatpush1.bf16.msra.mxu0 %v10615_v62 }
 0x5ad   : > { %6003 = vmatprep.subr.bf16.mxu0 %v10632_v3  ;;  %v10648_v12 = vcombine.high %v4082_v4, %v4090_v5  ;;  %6085 = vmatprep.subr.bf16.mxu1 %v10634_v40  ;;  %v10647_v18 = vcombine.low %v4082_v4, %v4090_v5  ;;  %v4162_v40 = vld [vmem:[%s12889_s29 + $0x580] sm:$0xff]  ;;  %v4163_v4 = vld [vmem:[%s12889_s29 + $0x588] sm:$0xff] }
 0x5ae   : > { %v3922_v10 = vsel %vm2191_vm1, %v13430_v7, 0.0  ;;  %v4219_v41 = vld [vmem:[%s12889_s29 + $0x748] sm:$0xff] }
 0x5af   : > { %v3923_v11 = vadd.f32 %v3922_v10, %v3921_v8  ;;  %v4091_v8 = vld [vmem:[%s12889_s29 + $0x348] sm:$0xff]  ;;  %v10631_v10 = vcombine.low %v4066_v51, %v4074_v59 }
 0x5b0   : > { %v10650_v13 = vcombine.high %v4083_v6, %v4091_v8  ;;  %v10649_v19 = vcombine.low %v4083_v6, %v4091_v8  ;;  %v4171_v6 = vld [vmem:[%s12889_s29 + $0x5c8] sm:$0xff] }
 0x5b1   : > { %3924 = vadd.xlane.f32.xlu0 %v3923_v11  ;;  %v10633_v11 = vcombine.low %v4067_v49, %v4075_v61  ;;  %6004 = vmatpush1.bf16.msra.mxu0 %v10631_v10  ;;  %v10729_v10 = vcombine.low %v4163_v4, %v4171_v6  ;;  %v4235_v50 = vld [vmem:[%s12889_s29 + $0x7c8] sm:$0xff] }
 0x5b2   : > { %6005 = vmatprep.subr.bf16.mxu0 %v10648_v12  ;;  %v4178_v12 = vld [vmem:[%s12889_s29 + $0x600] sm:$0xff] }
 0x5b3   : > { %6086 = vmatpush1.bf16.msra.mxu1 %v10633_v11  ;;  %v10730_v11 = vcombine.high %v4163_v4, %v4171_v6 }
 0x5b4   : > { %6087 = vmatprep.subr.bf16.mxu1 %v10650_v13  ;;  %v4186_v13 = vld [vmem:[%s12889_s29 + $0x640] sm:$0xff] }
 0x5b5   : > { %6006 = vmatpush1.bf16.msra.mxu0 %v10647_v18  ;;  %v10744_v15 = vcombine.high %v4178_v12, %v4186_v13  ;;  %v10743_v16 = vcombine.low %v4178_v12, %v4186_v13  ;;  %v10745_v18 = vcombine.low %v4179_v14, %v4187_v9 }
 0x5b6   : > { %6007 = vmatprep.subr.bf16.mxu0 %v10664_v20  ;;  %v4194_v20 = vld [vmem:[%s12889_s29 + $0x680] sm:$0xff] }
 0x5b7   : > { %6088 = vmatpush1.bf16.msra.mxu1 %v10649_v19  ;;  %v10746_v19 = vcombine.high %v4179_v14, %v4187_v9  ;;  %v4258_v14 = vld [vmem:[%s12889_s29 + $0x880] sm:$0xff] }
 0x5b8   : > { %6089 = vmatprep.subr.bf16.mxu1 %v10666_v21  ;;  %v4202_v21 = vld [vmem:[%s12889_s29 + $0x6c0] sm:$0xff] }
 0x5b9   : > { %6008 = vmatpush1.bf16.msra.mxu0 %v10663_v28  ;;  %v10760_v23 = vcombine.high %v4194_v20, %v4202_v21  ;;  %v10759_v26 = vcombine.low %v4194_v20, %v4202_v21  ;;  %v10761_v28 = vcombine.low %v4195_v22, %v4203_v25 }
 0x5ba   : > { %6009 = vmatprep.subr.bf16.mxu0 %v10680_v30  ;;  %v4210_v30 = vld [vmem:[%s12889_s29 + $0x700] sm:$0xff] }
 0x5bb   : > { %6090 = vmatpush1.bf16.msra.mxu1 %v10665_v29  ;;  %v10762_v29 = vcombine.high %v4195_v22, %v4203_v25  ;;  %v4274_v22 = vld [vmem:[%s12889_s29 + $0x900] sm:$0xff]  ;;  %v4275_v25 = vld [vmem:[%s12889_s29 + $0x908] sm:$0xff] }
 0x5bc   : > { %6091 = vmatprep.subr.bf16.mxu1 %v10682_v27  ;;  %v4218_v27 = vld [vmem:[%s12889_s29 + $0x740] sm:$0xff] }
 0x5bd   : > { %6010 = vmatpush1.bf16.msra.mxu0 %v10679_v44  ;;  %v10776_v38 = vcombine.high %v4210_v30, %v4218_v27  ;;  %v10775_v42 = vcombine.low %v4210_v30, %v4218_v27  ;;  %v10777_v44 = vcombine.low %v4211_v35, %v4219_v41 }
 0x5be   : > { %6011 = vmatprep.subr.bf16.mxu0 %v10696_v60  ;;  %v4226_v60 = vld [vmem:[%s12889_s29 + $0x780] sm:$0xff] }
 0x5bf   : > { %6092 = vmatpush1.bf16.msra.mxu1 %v10681_v45  ;;  %v10778_v45 = vcombine.high %v4211_v35, %v4219_v41  ;;  %v4290_v41 = vld [vmem:[%s12889_s29 + $0x980] sm:$0xff] }
 0x5c0   : > { %6093 = vmatprep.subr.bf16.mxu1 %v10698_v31  ;;  %v4234_v31 = vld [vmem:[%s12889_s29 + $0x7c0] sm:$0xff] }
 0x5c1   : > { %6012 = vmatpush1.bf16.msra.mxu0 %v10695_v54  ;;  %v10792_v48 = vcombine.high %v4226_v60, %v4234_v31  ;;  %v10791_v39 = vcombine.low %v4226_v60, %v4234_v31  ;;  %v10793_v54 = vcombine.low %v4227_v47, %v4235_v50 }
 0x5c2   : > { %6013 = vmatprep.subr.bf16.mxu0 %v10712_v37  ;;  %v4242_v37 = vld [vmem:[%s12889_s29 + $0x800] sm:$0xff] }
 0x5c3   : > { %6094 = vmatpush1.bf16.msra.mxu1 %v10697_v55  ;;  %v10794_v55 = vcombine.high %v4227_v47, %v4235_v50 }
 0x5c4   : > { %6095 = vmatprep.subr.bf16.mxu1 %v10714_v57  ;;  %v4250_v57 = vld [vmem:[%s12889_s29 + $0x840] sm:$0xff] }
 0x5c5   : > { %6014 = vmatpush1.bf16.msra.mxu0 %v10711_v43  ;;  %v4243_v43 = vld [vmem:[%s12889_s29 + $0x808] sm:$0xff] }
 0x5c7   : > { %6096 = vmatpush1.bf16.msra.mxu1 %v10713_v58  ;;  %v10808_v58 = vcombine.high %v4242_v37, %v4250_v57 }
 0x5c8   : > { %6097 = vmatprep.subr.bf16.mxu1 %v10730_v11 }
 0x5cb   : > { %6098 = vmatpush1.bf16.msra.mxu1 %v10729_v10 }
 0x5cc   : > { %6099 = vmatprep.subr.bf16.mxu1 %v10746_v19  ;;  %v4267_v19 = vld [vmem:[%s12889_s29 + $0x8c8] sm:$0xff] }
 0x5cf   : > { %6100 = vmatpush1.bf16.msra.mxu1 %v10745_v18  ;;  %v4259_v18 = vld [vmem:[%s12889_s29 + $0x888] sm:$0xff] }
 0x5d0   : > { %6101 = vmatprep.subr.bf16.mxu1 %v10762_v29  ;;  %v10826_v21 = vcombine.high %v4259_v18, %v4267_v19  ;;  %v10825_v30 = vcombine.low %v4259_v18, %v4267_v19  ;;  %v4044_v18 = vld [vmem:[%s12889_s29 + $0x1d0] sm:$0xff]  ;;  %v4037_v19 = vld [vmem:[%s12889_s29 + $0x198] sm:$0xff] }
 0x5d3   : > { %6102 = vmatpush1.bf16.msra.mxu1 %v10761_v28 }
 0x5d4   : > { %6103 = vmatprep.subr.bf16.mxu1 %v10778_v45  ;;  %v4299_v45 = vld [vmem:[%s12889_s29 + $0x9c8] sm:$0xff] }
 0x5d7   : > { %6104 = vmatpush1.bf16.msra.mxu1 %v10777_v44  ;;  %v4291_v44 = vld [vmem:[%s12889_s29 + $0x988] sm:$0xff] }
 0x5d8   : > { %6105 = vmatprep.subr.bf16.mxu1 %v10794_v55  ;;  %v10858_v50 = vcombine.high %v4291_v44, %v4299_v45  ;;  %v3989_v55 = vld [vmem:[%s12889_s29 + $0x18] sm:$0xff] }
 0x5db   : > { %6106 = vmatpush1.bf16.msra.mxu1 %v10793_v54  ;;  %v3996_v54 = vld [vmem:[%s12889_s29 + $0x50] sm:$0xff] }
 0x63e   : > { %v3925_v53 = vpop.xlane.xlu0 %3924 }
 0x63f   : > { %v3927_v34 = vmul.f32 0.003125, %v3925_v53  ;;  %v4251_v53 = vld [vmem:[%s12889_s29 + $0x848] sm:$0xff] }
 0x641   : > { %v13481_v51 = vsub.f32 %v13426_v24, %v3927_v34  ;;  %v13484_v59 = vsub.f32 %v13428_v56, %v3927_v34  ;;  %v13487_v49 = vsub.f32 %v13430_v7, %v3927_v34  ;;  %v4170_v7 = vld [vmem:[%s12889_s29 + $0x5c0] sm:$0xff]  ;;  %v10807_v34 = vcombine.low %v4242_v37, %v4250_v57  ;;  %v3997_v37 = vld [vmem:[%s12889_s29 + $0x58] sm:$0xff] }
 0x642   : > { %v10728_v5 = vcombine.high %v4162_v40, %v4170_v7  ;;  %v10727_v8 = vcombine.low %v4162_v40, %v4170_v7  ;;  %v13530_v40 = vld [vmem:[%s14482_s26] sm:$0x7] }
 0x643   : > { %v3931_v61 = vmul.f32 %v13481_v51, %v13481_v51  ;;  %v3932_v62 = vmul.f32 %v13484_v59, %v13484_v59  ;;  %v3933_v2 = vmul.f32 %v13487_v49, %v13487_v49  ;;  %v3968_v6 = vrot.slane %v13530_v40, %v13192_v63 }
 0x644   : > { %6015 = vmatprep.subr.bf16.mxu0 %v10728_v5  ;;  %v3976_v60 = vrot.slane %v13530_v40, %v13237_v36 }
 0x645   : > { %v3934_v3 = vadd.f32 %v3932_v62, %v3931_v61  ;;  %v3935_v24 = vsel %vm2191_vm1, %v3933_v2, 0.0  ;;  %6016 = vmatpush1.bf16.msra.mxu0 %v10727_v8  ;;  %v10809_v61 = vcombine.low %v4243_v43, %v4251_v53  ;;  %v10810_v62 = vcombine.high %v4243_v43, %v4251_v53 }
 0x646   : > { %6017 = vmatprep.subr.bf16.mxu0 %v10744_v15  ;;  %v3972_v8 = vrot.slane %v13530_v40, %v13226_v32  ;;  %v10857_v43 = vcombine.low %v4291_v44, %v4299_v45  ;;  %v10557_v40 = vcombine.low %v3989_v55, %v3997_v37  ;;  %v4076_v44 = vld [vmem:[%s12889_s29 + $0x2d0] sm:$0xff]  ;;  %v4069_v45 = vld [vmem:[%s12889_s29 + $0x298] sm:$0xff] }
 0x647   : > { %v3936_v56 = vadd.f32 %v3935_v24, %v3934_v3  ;;  %6116 = vmatprep.subr.bf16.mxu1 %v10810_v62  ;;  %v4012_v62 = vld [vmem:[%s12889_s29 + $0xd0] sm:$0xff] }
 0x649   : > { %3937 = vadd.xlane.f32.xlu1 %v3936_v56  ;;  %6018 = vmatpush1.bf16.msra.mxu0 %v10743_v16  ;;  %v3919_v56 = vld [vmem:[%s14481_s22] sm:$0x7] }
 0x64a   : > { %6019 = vmatprep.subr.bf16.mxu0 %v10760_v23  ;;  %v3949_v7 = vrot.slane %v3919_v56, %v13192_v63  ;;  %v3953_v4 = vrot.slane %v3919_v56, %v13226_v32  ;;  %v4266_v16 = vld [vmem:[%s12889_s29 + $0x8c0] sm:$0xff]  ;;  %v3957_v28 = vrot.slane %v3919_v56, %v13237_v36 }
 0x64b   : > { %v4282_v23 = vld [vmem:[%s12889_s29 + $0x940] sm:$0xff]  ;;  %v10823_v29 = vcombine.low %v4258_v14, %v4266_v16 }
 0x64c   : > { %v10840_v35 = vcombine.high %v4274_v22, %v4282_v23 }
 0x64d   : > { %6020 = vmatpush1.bf16.msra.mxu0 %v10759_v26  ;;  %v4283_v26 = vld [vmem:[%s12889_s29 + $0x948] sm:$0xff] }
 0x64e   : > { %6021 = vmatprep.subr.bf16.mxu0 %v10776_v38  ;;  %v10842_v38 = vcombine.high %v4275_v25, %v4283_v26  ;;  %v10841_v31 = vcombine.low %v4275_v25, %v4283_v26  ;;  %v4052_v26 = vld [vmem:[%s12889_s29 + $0x210] sm:$0xff] }
 0x651   : > { %6022 = vmatpush1.bf16.msra.mxu0 %v10775_v42  ;;  %v4298_v42 = vld [vmem:[%s12889_s29 + $0x9c0] sm:$0xff] }
 0x652   : > { %6023 = vmatprep.subr.bf16.mxu0 %v10792_v48  ;;  %v10856_v48 = vcombine.high %v4290_v41, %v4298_v42  ;;  %v10855_v57 = vcombine.low %v4290_v41, %v4298_v42  ;;  %v4068_v42 = vld [vmem:[%s12889_s29 + $0x290] sm:$0xff] }
 0x655   : > { %6024 = vmatpush1.bf16.msra.mxu0 %v10791_v39  ;;  %v3988_v39 = vld [vmem:[%s12889_s29 + $0x10] sm:$0xff] }
 0x656   : > { %6034 = vmatprep.subr.bf16.mxu0 %v10808_v58  ;;  %v10556_v53 = vcombine.high %v3988_v39, %v3996_v54 }
 0x6d6   : > { %v3938_v2 = vpop.xlane.xlu1 %3937 }
 0x6d7   : > { %v3939_v3 = vmul.f32 0.003125, %v3938_v2  ;;  %v4005_v2 = vld [vmem:[%s12889_s29 + $0x98] sm:$0xff] }
 0x6d9   : > { %v3940_v24 = vadd.f32 1e-05, %v3939_v3  ;;  %v4013_v3 = vld [vmem:[%s12889_s29 + $0xd8] sm:$0xff] }
 0x6db   : > { %12700 = vrsqrt.f32 %v3940_v24  ;;  %v10555_v24 = vcombine.low %v3988_v39, %v3996_v54  ;;  %v4092_v39 = vld [vmem:[%s12889_s29 + $0x350] sm:$0xff]  ;;  %v4085_v54 = vld [vmem:[%s12889_s29 + $0x318] sm:$0xff] }
 0x6e5   : > { %v12701_v5 = vpop.eup %12700 }
 0x6e6   : > { %v3942_v10 = vmul.f32 %v12701_v5, %v13481_v51  ;;  %v3943_v11 = vmul.f32 %v12701_v5, %v13484_v59  ;;  %v10824_v59 = vcombine.high %v4258_v14, %v4266_v16  ;;  %v3944_v27 = vmul.f32 %v12701_v5, %v13487_v49  ;;  %v4020_v5 = vld [vmem:[%s12889_s29 + $0x110] sm:$0xff] }
 0x6e7   : > { %v10839_v49 = vcombine.low %v4274_v22, %v4282_v23  ;;  %v4036_v16 = vld [vmem:[%s12889_s29 + $0x190] sm:$0xff] }
 0x6e8   : > { %v3961_v12 = vmul.f32 %v3949_v7, %v3942_v10  ;;  %v3962_v13 = vmul.f32 %v3953_v4, %v3943_v11  ;;  %v3963_v47 = vmul.f32 %v3957_v28, %v3944_v27  ;;  %v10574_v4 = vcombine.high %v4005_v2, %v4013_v3  ;;  %v4029_v10 = vld [vmem:[%s12889_s29 + $0x158] sm:$0xff]  ;;  %v4060_v28 = vld [vmem:[%s12889_s29 + $0x250] sm:$0xff] }
 0x6e9   : > { %v10604_v23 = vcombine.high %v4036_v16, %v4044_v18  ;;  %v10603_v27 = vcombine.low %v4036_v16, %v4044_v18  ;;  %v4140_v16 = vld [vmem:[%s12889_s29 + $0x4d0] sm:$0xff]  ;;  %v4133_v18 = vld [vmem:[%s12889_s29 + $0x498] sm:$0xff] }
 0x6ea   : > { %v13541_v15 = vadd.f32 %v3968_v6, %v3961_v12  ;;  %v13543_v9 = vadd.f32 %v3972_v8, %v3962_v13  ;;  %v13578_v58 = vadd.f32 %v3976_v60, %v3963_v47  ;;  %v4028_v6 = vld [vmem:[%s12889_s29 + $0x150] sm:$0xff]  ;;  %v4021_v8 = vld [vmem:[%s12889_s29 + $0x118] sm:$0xff]  ;;  %v10573_v12 = vcombine.low %v4005_v2, %v4013_v3 }
 0x6eb   : > { %v10588_v13 = vcombine.high %v4020_v5, %v4028_v6  ;;  %v10590_v14 = vcombine.high %v4021_v8, %v4029_v10  ;;  %v10589_v22 = vcombine.low %v4021_v8, %v4029_v10  ;;  %v4077_v60 = vld [vmem:[%s12889_s29 + $0x2d8] sm:$0xff]  ;;  %v10636_v47 = vcombine.high %v4068_v42, %v4076_v44 }
 0x6ec   : > { %v13550_v20 = vpack.c.bf16 %v13543_v9, %v13543_v9  ;;  %v13554_v51 = vpack.c.bf16 %v13541_v15, %v13541_v15  ;;  %v13586_v56 = vpack.c.bf16 %v13578_v58, %v13578_v58  ;;  %v4109_v2 = vld [vmem:[%s12889_s29 + $0x3d8] sm:$0xff] }
 0x6ed   : > { %v4125_v8 = vld [vmem:[%s12889_s29 + $0x458] sm:$0xff] }
 0x6ee   : > { %6025 = vmatprep.mubr.bf16.mxu0 %v13550_v20  ;;  %6107 = vmatprep.mubr.bf16.mxu1 %v13550_v20 }
 0x6ef   : > { %6026 = vmatmul.mubr.bf16.vlgmr.msra.gmra.mrb[36].mxu0 %v13554_v51  ;;  %6108 = vmatmul.mubr.bf16.vlgmr.msra.gmra.mrb[36].mxu1 %v13554_v51 }
 0x6f0   : > { %6035 = vmatpush1.bf16.msra.mxu0 %v10807_v34  ;;  %6117 = vmatpush1.bf16.msra.mxu1 %v10809_v61  ;;  %v10558_v34 = vcombine.high %v3989_v55, %v3997_v37  ;;  %v4004_v61 = vld [vmem:[%s12889_s29 + $0x90] sm:$0xff]  ;;  %v4093_v55 = vld [vmem:[%s12889_s29 + $0x358] sm:$0xff]  ;;  %v10635_v37 = vcombine.low %v4068_v42, %v4076_v44 }
 0x6f1   : > { %6036 = vmatprep.subr.bf16.mxu0 %v10824_v59  ;;  %6118 = vmatprep.subr.bf16.mxu1 %v10826_v21  ;;  %v10572_v7 = vcombine.high %v4004_v61, %v4012_v62  ;;  %v10571_v11 = vcombine.low %v4004_v61, %v4012_v62  ;;  %v4045_v59 = vld [vmem:[%s12889_s29 + $0x1d8] sm:$0xff]  ;;  %v10587_v21 = vcombine.low %v4020_v5, %v4028_v6  ;;  %v4108_v61 = vld [vmem:[%s12889_s29 + $0x3d0] sm:$0xff] }
 0x6f2   : > { %6066 = vmatprep.mubr.bf16.mxu0 %v12747_v17  ;;  %6148 = vmatprep.mubr.bf16.mxu1 %v12747_v17  ;;  %v10606_v25 = vcombine.high %v4037_v19, %v4045_v59  ;;  %v4101_v62 = vld [vmem:[%s12889_s29 + $0x398] sm:$0xff]  ;;  %v4124_v5 = vld [vmem:[%s12889_s29 + $0x450] sm:$0xff] }
 0x6f3   : > { %v4117_v6 = vld [vmem:[%s12889_s29 + $0x418] sm:$0xff]  ;;  %v4172_v42 = vld [vmem:[%s12889_s29 + $0x5d0] sm:$0xff] }
 0x6f4   : > { %6037 = vmatpush1.bf16.msra.mxu0 %v10823_v29  ;;  %6119 = vmatpush1.bf16.msra.mxu1 %v10825_v30  ;;  %v4053_v29 = vld [vmem:[%s12889_s29 + $0x218] sm:$0xff] }
 0x6f5   : > { %6038 = vmatprep.subr.bf16.mxu0 %v10840_v35  ;;  %6120 = vmatprep.subr.bf16.mxu1 %v10842_v38  ;;  %v4061_v30 = vld [vmem:[%s12889_s29 + $0x258] sm:$0xff]  ;;  %v10605_v35 = vcombine.low %v4037_v19, %v4045_v59  ;;  %v10620_v38 = vcombine.high %v4052_v26, %v4060_v28 }
 0x6f6   : > { %v10622_v41 = vcombine.high %v4053_v29, %v4061_v30  ;;  %v4141_v19 = vld [vmem:[%s12889_s29 + $0x4d8] sm:$0xff] }
 0x6f7   : > { %v4165_v44 = vld [vmem:[%s12889_s29 + $0x598] sm:$0xff] }
 0x6f8   : > { %6039 = vmatpush1.bf16.msra.mxu0 %v10839_v49  ;;  %6121 = vmatpush1.bf16.msra.mxu1 %v10841_v31  ;;  %v10619_v49 = vcombine.low %v4052_v26, %v4060_v28  ;;  %v10621_v31 = vcombine.low %v4053_v29, %v4061_v30  ;;  %v4156_v26 = vld [vmem:[%s12889_s29 + $0x550] sm:$0xff]  ;;  %v4149_v28 = vld [vmem:[%s12889_s29 + $0x518] sm:$0xff] }
 0x6f9   : > { %6040 = vmatprep.subr.bf16.mxu0 %v10856_v48  ;;  %6122 = vmatprep.subr.bf16.mxu1 %v10858_v50  ;;  %v10638_v48 = vcombine.high %v4069_v45, %v4077_v60  ;;  %v4084_v50 = vld [vmem:[%s12889_s29 + $0x310] sm:$0xff]  ;;  %v4157_v29 = vld [vmem:[%s12889_s29 + $0x558] sm:$0xff] }
 0x6fa   : > { %v10651_v3 = vcombine.low %v4084_v50, %v4092_v39 }
 0x6fc   : > { %6041 = vmatpush1.bf16.msra.mxu0 %v10855_v57  ;;  %6123 = vmatpush1.bf16.msra.mxu1 %v10857_v43  ;;  %v10637_v57 = vcombine.low %v4069_v45, %v4077_v60  ;;  %v10652_v43 = vcombine.high %v4084_v50, %v4092_v39  ;;  %v4173_v45 = vld [vmem:[%s12889_s29 + $0x5d8] sm:$0xff]  ;;  %v4188_v50 = vld [vmem:[%s12889_s29 + $0x650] sm:$0xff] }
 0x6fd   : > { %6157 = vmatprep.subr.bf16.mxu0 %v10556_v53  ;;  %6239 = vmatprep.subr.bf16.mxu1 %v10558_v34  ;;  %v10654_v53 = vcombine.high %v4085_v54, %v4093_v55  ;;  %v4100_v34 = vld [vmem:[%s12889_s29 + $0x390] sm:$0xff]  ;;  %v4181_v39 = vld [vmem:[%s12889_s29 + $0x618] sm:$0xff] }
 0x6fe   : > { %v10667_v10 = vcombine.low %v4100_v34, %v4108_v61 }
 0x6ff   : > { %10871 = vmatmul.mubr.msk.bf16.vlgmr.msra.gmra.mrb[36].mxu0 %vm2191_vm1, %v13586_v56  ;;  %10872 = vmatmul.mubr.msk.bf16.vlgmr.msra.gmra.mrb[36].mxu1 %vm2191_vm1, %v13586_v56 }
 0x700   : > { %6158 = vmatpush1.bf16.msra.mxu0 %v10555_v24  ;;  %6189 = vmatprep.mubr.bf16.mxu0 %v13550_v20  ;;  %v10653_v24 = vcombine.low %v4085_v54, %v4093_v55  ;;  %v4189_v54 = vld [vmem:[%s12889_s29 + $0x658] sm:$0xff] }
 0x701   : > { %6240 = vmatpush1.bf16.msra.mxu1 %v10557_v40  ;;  %6271 = vmatprep.mubr.bf16.mxu1 %v13550_v20  ;;  %v10668_v40 = vcombine.high %v4100_v34, %v4108_v61  ;;  %v4204_v34 = vld [vmem:[%s12889_s29 + $0x6d0] sm:$0xff]  ;;  %v4197_v61 = vld [vmem:[%s12889_s29 + $0x698] sm:$0xff] }
 0x702   : > { %6159 = vmatprep.subr.bf16.mxu0 %v10572_v7  ;;  %6241 = vmatprep.subr.bf16.mxu1 %v10574_v4  ;;  %v10670_v7 = vcombine.high %v4101_v62, %v4109_v2  ;;  %v4116_v4 = vld [vmem:[%s12889_s29 + $0x410] sm:$0xff] }
 0x703   : > { %v10683_v59 = vcombine.low %v4116_v4, %v4124_v5 }
 0x704   : > { %6160 = vmatpush1.bf16.msra.mxu0 %v10571_v11  ;;  %v10669_v11 = vcombine.low %v4101_v62, %v4109_v2  ;;  %v4205_v62 = vld [vmem:[%s12889_s29 + $0x6d8] sm:$0xff] }
 0x705   : > { %6242 = vmatpush1.bf16.msra.mxu1 %v10573_v12  ;;  %6161 = vmatprep.subr.bf16.mxu0 %v10588_v13  ;;  %v10684_v12 = vcombine.high %v4116_v4, %v4124_v5  ;;  %v10686_v13 = vcombine.high %v4117_v6, %v4125_v8  ;;  %v4220_v4 = vld [vmem:[%s12889_s29 + $0x750] sm:$0xff]  ;;  %v4213_v5 = vld [vmem:[%s12889_s29 + $0x718] sm:$0xff] }
 0x706   : > { %6243 = vmatprep.subr.bf16.mxu1 %v10590_v14  ;;  %v4132_v14 = vld [vmem:[%s12889_s29 + $0x490] sm:$0xff] }
 0x707   : > { %v10699_v30 = vcombine.low %v4132_v14, %v4140_v16 }
 0x708   : > { %6162 = vmatpush1.bf16.msra.mxu0 %v10587_v21  ;;  %v10685_v21 = vcombine.low %v4117_v6, %v4125_v8  ;;  %v4221_v6 = vld [vmem:[%s12889_s29 + $0x758] sm:$0xff] }
 0x709   : > { %6244 = vmatpush1.bf16.msra.mxu1 %v10589_v22  ;;  %6163 = vmatprep.subr.bf16.mxu0 %v10604_v23  ;;  %v10700_v22 = vcombine.high %v4132_v14, %v4140_v16  ;;  %v10702_v23 = vcombine.high %v4133_v18, %v4141_v19  ;;  %v4236_v14 = vld [vmem:[%s12889_s29 + $0x7d0] sm:$0xff]  ;;  %v4229_v16 = vld [vmem:[%s12889_s29 + $0x798] sm:$0xff] }
 0x70a   : > { %6245 = vmatprep.subr.bf16.mxu1 %v10606_v25  ;;  %v4148_v25 = vld [vmem:[%s12889_s29 + $0x510] sm:$0xff] }
 0x70b   : > { %v10715_v60 = vcombine.low %v4148_v25, %v4156_v26 }
 0x70c   : > { %6164 = vmatpush1.bf16.msra.mxu0 %v10603_v27  ;;  %v10701_v27 = vcombine.low %v4133_v18, %v4141_v19  ;;  %v4237_v18 = vld [vmem:[%s12889_s29 + $0x7d8] sm:$0xff] }
 0x70d   : > { %6246 = vmatpush1.bf16.msra.mxu1 %v10605_v35  ;;  %6165 = vmatprep.subr.bf16.mxu0 %v10620_v38  ;;  %v10716_v35 = vcombine.high %v4148_v25, %v4156_v26  ;;  %v10718_v38 = vcombine.high %v4149_v28, %v4157_v29  ;;  %v4252_v25 = vld [vmem:[%s12889_s29 + $0x850] sm:$0xff]  ;;  %v4245_v26 = vld [vmem:[%s12889_s29 + $0x818] sm:$0xff] }
 0x70e   : > { %6247 = vmatprep.subr.bf16.mxu1 %v10622_v41  ;;  %v4164_v41 = vld [vmem:[%s12889_s29 + $0x590] sm:$0xff] }
 0x70f   : > { %v10731_v55 = vcombine.low %v4164_v41, %v4172_v42 }
 0x710   : > { %6166 = vmatpush1.bf16.msra.mxu0 %v10619_v49  ;;  %v10717_v49 = vcombine.low %v4149_v28, %v4157_v29  ;;  %v4253_v28 = vld [vmem:[%s12889_s29 + $0x858] sm:$0xff] }
 0x711   : > { %6248 = vmatpush1.bf16.msra.mxu1 %v10621_v31  ;;  %6167 = vmatprep.subr.bf16.mxu0 %v10636_v47  ;;  %v10732_v31 = vcombine.high %v4164_v41, %v4172_v42  ;;  %v10734_v47 = vcombine.high %v4165_v44, %v4173_v45  ;;  %v4268_v41 = vld [vmem:[%s12889_s29 + $0x8d0] sm:$0xff]  ;;  %v4261_v42 = vld [vmem:[%s12889_s29 + $0x898] sm:$0xff] }
 0x712   : > { %6249 = vmatprep.subr.bf16.mxu1 %v10638_v48  ;;  %v4180_v48 = vld [vmem:[%s12889_s29 + $0x610] sm:$0xff] }
 0x713   : > { %v10747_v2 = vcombine.low %v4180_v48, %v4188_v50 }
 0x714   : > { %6168 = vmatpush1.bf16.msra.mxu0 %v10635_v37  ;;  %v10733_v37 = vcombine.low %v4165_v44, %v4173_v45  ;;  %v4269_v44 = vld [vmem:[%s12889_s29 + $0x8d8] sm:$0xff] }
 0x715   : > { %6250 = vmatpush1.bf16.msra.mxu1 %v10637_v57  ;;  %6169 = vmatprep.subr.bf16.mxu0 %v10652_v43  ;;  %v10748_v57 = vcombine.high %v4180_v48, %v4188_v50  ;;  %v10750_v43 = vcombine.high %v4181_v39, %v4189_v54  ;;  %v4284_v48 = vld [vmem:[%s12889_s29 + $0x950] sm:$0xff]  ;;  %v4277_v50 = vld [vmem:[%s12889_s29 + $0x918] sm:$0xff] }
 0x716   : > { %6251 = vmatprep.subr.bf16.mxu1 %v10654_v53  ;;  %v4196_v53 = vld [vmem:[%s12889_s29 + $0x690] sm:$0xff] }
 0x717   : > { %v10763_v8 = vcombine.low %v4196_v53, %v4204_v34 }
 0x718   : > { %6170 = vmatpush1.bf16.msra.mxu0 %v10651_v3  ;;  %v10749_v3 = vcombine.low %v4181_v39, %v4189_v54  ;;  %v4285_v39 = vld [vmem:[%s12889_s29 + $0x958] sm:$0xff] }
 0x719   : > { %6252 = vmatpush1.bf16.msra.mxu1 %v10653_v24  ;;  %6171 = vmatprep.subr.bf16.mxu0 %v10668_v40  ;;  %v10764_v24 = vcombine.high %v4196_v53, %v4204_v34  ;;  %v10766_v40 = vcombine.high %v4197_v61, %v4205_v62  ;;  %v4300_v53 = vld [vmem:[%s12889_s29 + $0x9d0] sm:$0xff]  ;;  %v4293_v34 = vld [vmem:[%s12889_s29 + $0x998] sm:$0xff] }
 0x71a   : > { %6253 = vmatprep.subr.bf16.mxu1 %v10670_v7  ;;  %v4212_v7 = vld [vmem:[%s12889_s29 + $0x710] sm:$0xff] }
 0x71b   : > { %v10779_v19 = vcombine.low %v4212_v7, %v4220_v4 }
 0x71c   : > { %6172 = vmatpush1.bf16.msra.mxu0 %v10667_v10  ;;  %v10765_v10 = vcombine.low %v4197_v61, %v4205_v62  ;;  %v4301_v61 = vld [vmem:[%s12889_s29 + $0x9d8] sm:$0xff] }
 0x71d   : > { %6254 = vmatpush1.bf16.msra.mxu1 %v10669_v11  ;;  %6173 = vmatprep.subr.bf16.mxu0 %v10684_v12  ;;  %v10780_v11 = vcombine.high %v4212_v7, %v4220_v4  ;;  %v10782_v12 = vcombine.high %v4213_v5, %v4221_v6  ;;  %v3998_v7 = vld [vmem:[%s12889_s29 + $0x60] sm:$0xff]  ;;  %v3991_v4 = vld [vmem:[%s12889_s29 + $0x28] sm:$0xff] }
 0x71e   : > { %6255 = vmatprep.subr.bf16.mxu1 %v10686_v13  ;;  %v4228_v13 = vld [vmem:[%s12889_s29 + $0x790] sm:$0xff] }
 0x71f   : > { %v10795_v29 = vcombine.low %v4228_v13, %v4236_v14 }
 0x720   : > { %6174 = vmatpush1.bf16.msra.mxu0 %v10683_v59  ;;  %v10781_v59 = vcombine.low %v4213_v5, %v4221_v6  ;;  %v3999_v5 = vld [vmem:[%s12889_s29 + $0x68] sm:$0xff] }
 0x721   : > { %6256 = vmatpush1.bf16.msra.mxu1 %v10685_v21  ;;  %6175 = vmatprep.subr.bf16.mxu0 %v10700_v22  ;;  %v10796_v21 = vcombine.high %v4228_v13, %v4236_v14  ;;  %v10798_v22 = vcombine.high %v4229_v16, %v4237_v18  ;;  %v4014_v13 = vld [vmem:[%s12889_s29 + $0xe0] sm:$0xff] }
 0x722   : > { %6257 = vmatprep.subr.bf16.mxu1 %v10702_v23  ;;  %v4244_v23 = vld [vmem:[%s12889_s29 + $0x810] sm:$0xff] }
 0x723   : > { %v10811_v45 = vcombine.low %v4244_v23, %v4252_v25 }
 0x724   : > { %6176 = vmatpush1.bf16.msra.mxu0 %v10699_v30  ;;  %v10797_v30 = vcombine.low %v4229_v16, %v4237_v18  ;;  %v4007_v16 = vld [vmem:[%s12889_s29 + $0xa8] sm:$0xff] }
 0x725   : > { %6258 = vmatpush1.bf16.msra.mxu1 %v10701_v27  ;;  %6177 = vmatprep.subr.bf16.mxu0 %v10716_v35  ;;  %v10812_v27 = vcombine.high %v4244_v23, %v4252_v25  ;;  %v10814_v35 = vcombine.high %v4245_v26, %v4253_v28  ;;  %v4015_v18 = vld [vmem:[%s12889_s29 + $0xe8] sm:$0xff] }
 0x726   : > { %6259 = vmatprep.subr.bf16.mxu1 %v10718_v38  ;;  %v4260_v38 = vld [vmem:[%s12889_s29 + $0x890] sm:$0xff]  ;;  %v10578_v23 = vcombine.high %v4007_v16, %v4015_v18  ;;  %v4023_v25 = vld [vmem:[%s12889_s29 + $0x128] sm:$0xff] }
 0x727   : > { %v10827_v54 = vcombine.low %v4260_v38, %v4268_v41 }
 0x728   : > { %6178 = vmatpush1.bf16.msra.mxu0 %v10715_v60  ;;  %v10813_v60 = vcombine.low %v4245_v26, %v4253_v28  ;;  %v4031_v26 = vld [vmem:[%s12889_s29 + $0x168] sm:$0xff] }
 0x729   : > { %6260 = vmatpush1.bf16.msra.mxu1 %v10717_v49  ;;  %6179 = vmatprep.subr.bf16.mxu0 %v10732_v31  ;;  %v10828_v49 = vcombine.high %v4260_v38, %v4268_v41  ;;  %v10830_v31 = vcombine.high %v4261_v42, %v4269_v44  ;;  %v4046_v38 = vld [vmem:[%s12889_s29 + $0x1e0] sm:$0xff]  ;;  %v4039_v41 = vld [vmem:[%s12889_s29 + $0x1a8] sm:$0xff] }
 0x72a   : > { %6261 = vmatprep.subr.bf16.mxu1 %v10734_v47  ;;  %v4276_v47 = vld [vmem:[%s12889_s29 + $0x910] sm:$0xff] }
 0x72b   : > { %v10843_v62 = vcombine.low %v4276_v47, %v4284_v48 }
 0x72c   : > { %6180 = vmatpush1.bf16.msra.mxu0 %v10731_v55  ;;  %v10829_v55 = vcombine.low %v4261_v42, %v4269_v44  ;;  %v4047_v42 = vld [vmem:[%s12889_s29 + $0x1e8] sm:$0xff] }
 0x72d   : > { %6262 = vmatpush1.bf16.msra.mxu1 %v10733_v37  ;;  %6181 = vmatprep.subr.bf16.mxu0 %v10748_v57  ;;  %v10844_v37 = vcombine.high %v4276_v47, %v4284_v48  ;;  %v10846_v57 = vcombine.high %v4277_v50, %v4285_v39  ;;  %v4062_v47 = vld [vmem:[%s12889_s29 + $0x260] sm:$0xff]  ;;  %v4055_v48 = vld [vmem:[%s12889_s29 + $0x228] sm:$0xff] }
 0x72e   : > { %6263 = vmatprep.subr.bf16.mxu1 %v10750_v43  ;;  %v4292_v43 = vld [vmem:[%s12889_s29 + $0x990] sm:$0xff] }
 0x72f   : > { %v10859_v6 = vcombine.low %v4292_v43, %v4300_v53 }
 0x730   : > { %6182 = vmatpush1.bf16.msra.mxu0 %v10747_v2  ;;  %v10845_v2 = vcombine.low %v4277_v50, %v4285_v39  ;;  %v4063_v50 = vld [vmem:[%s12889_s29 + $0x268] sm:$0xff] }
 0x731   : > { %6264 = vmatpush1.bf16.msra.mxu1 %v10749_v3  ;;  %6183 = vmatprep.subr.bf16.mxu0 %v10764_v24  ;;  %v10860_v3 = vcombine.high %v4292_v43, %v4300_v53  ;;  %v10862_v24 = vcombine.high %v4293_v34, %v4301_v61  ;;  %v4078_v43 = vld [vmem:[%s12889_s29 + $0x2e0] sm:$0xff]  ;;  %v4071_v53 = vld [vmem:[%s12889_s29 + $0x2a8] sm:$0xff] }
 0x732   : > { %6265 = vmatprep.subr.bf16.mxu1 %v10766_v40  ;;  %v3990_v40 = vld [vmem:[%s12889_s29 + $0x20] sm:$0xff] }
 0x733   : > { %v10559_v14 = vcombine.low %v3990_v40, %v3998_v7 }
 0x734   : > { %6184 = vmatpush1.bf16.msra.mxu0 %v10763_v8  ;;  %v10861_v8 = vcombine.low %v4293_v34, %v4301_v61  ;;  %v4079_v34 = vld [vmem:[%s12889_s29 + $0x2e8] sm:$0xff] }
 0x735   : > { %6266 = vmatpush1.bf16.msra.mxu1 %v10765_v10  ;;  %6185 = vmatprep.subr.bf16.mxu0 %v10780_v11  ;;  %v10560_v10 = vcombine.high %v3990_v40, %v3998_v7  ;;  %v10562_v11 = vcombine.high %v3991_v4, %v3999_v5  ;;  %v4094_v40 = vld [vmem:[%s12889_s29 + $0x360] sm:$0xff]  ;;  %v4087_v7 = vld [vmem:[%s12889_s29 + $0x328] sm:$0xff] }
 0x736   : > { %6267 = vmatprep.subr.bf16.mxu1 %v10782_v12  ;;  %v4006_v12 = vld [vmem:[%s12889_s29 + $0xa0] sm:$0xff] }
 0x737   : > { %v10575_v28 = vcombine.low %v4006_v12, %v4014_v13 }
 0x738   : > { %6186 = vmatpush1.bf16.msra.mxu0 %v10779_v19  ;;  %v10561_v19 = vcombine.low %v3991_v4, %v3999_v5  ;;  %v4095_v4 = vld [vmem:[%s12889_s29 + $0x368] sm:$0xff] }
 0x739   : > { %6268 = vmatpush1.bf16.msra.mxu1 %v10781_v59  ;;  %6187 = vmatprep.subr.bf16.mxu0 %v10796_v21  ;;  %v10576_v59 = vcombine.high %v4006_v12, %v4014_v13  ;;  %v4022_v21 = vld [vmem:[%s12889_s29 + $0x120] sm:$0xff]  ;;  %v4103_v13 = vld [vmem:[%s12889_s29 + $0x3a8] sm:$0xff] }
 0x73a   : > { %6269 = vmatprep.subr.bf16.mxu1 %v10798_v22  ;;  %v4030_v22 = vld [vmem:[%s12889_s29 + $0x160] sm:$0xff] }
 0x73b   : > { %v10591_v44 = vcombine.low %v4022_v21, %v4030_v22  ;;  %v4110_v12 = vld [vmem:[%s12889_s29 + $0x3e0] sm:$0xff] }
 0x73c   : > { %6188 = vmatpush1.bf16.msra.mxu0 %v10795_v29  ;;  %v10577_v29 = vcombine.low %v4007_v16, %v4015_v18  ;;  %v10657_v18 = vcombine.low %v4087_v7, %v4095_v4 }
 0x73d   : > { %6270 = vmatpush1.bf16.msra.mxu1 %v10797_v30  ;;  %6198 = vmatprep.subr.bf16.mxu0 %v10812_v27  ;;  %v10592_v30 = vcombine.high %v4022_v21, %v4030_v22  ;;  %v10594_v27 = vcombine.high %v4023_v25, %v4031_v26  ;;  %v4118_v21 = vld [vmem:[%s12889_s29 + $0x420] sm:$0xff] }
 0x73e   : > { %6280 = vmatprep.subr.bf16.mxu1 %v10814_v35  ;;  %v4038_v35 = vld [vmem:[%s12889_s29 + $0x1a0] sm:$0xff] }
 0x73f   : > { %6190 = vmatmul.mubr.bf16.vlgmr.msra.gmra.mrb[40].mxu0 %v13554_v51  ;;  %v10607_v39 = vcombine.low %v4038_v35, %v4046_v38  ;;  %v4126_v22 = vld [vmem:[%s12889_s29 + $0x460] sm:$0xff] }
 0x740   : > { %6272 = vmatmul.mubr.bf16.vlgmr.msra.gmra.mrb[40].mxu1 %v13554_v51  ;;  %6199 = vmatpush1.bf16.msra.mxu0 %v10811_v45  ;;  %v10593_v45 = vcombine.low %v4023_v25, %v4031_v26  ;;  %v4127_v25 = vld [vmem:[%s12889_s29 + $0x468] sm:$0xff] }
 0x741   : > { %6281 = vmatpush1.bf16.msra.mxu1 %v10813_v60  ;;  %6200 = vmatprep.subr.bf16.mxu0 %v10828_v49  ;;  %v10608_v60 = vcombine.high %v4038_v35, %v4046_v38  ;;  %v10610_v49 = vcombine.high %v4039_v41, %v4047_v42  ;;  %v4142_v35 = vld [vmem:[%s12889_s29 + $0x4e0] sm:$0xff]  ;;  %v4135_v38 = vld [vmem:[%s12889_s29 + $0x4a8] sm:$0xff] }
 0x742   : > { %6282 = vmatprep.subr.bf16.mxu1 %v10830_v31  ;;  %6230 = vmatprep.mubr.bf16.mxu0 %v12747_v17  ;;  %v4054_v31 = vld [vmem:[%s12889_s29 + $0x220] sm:$0xff] }
 0x743   : > { %6312 = vmatprep.mubr.bf16.mxu1 %v12747_v17  ;;  %v10623_v61 = vcombine.low %v4054_v31, %v4062_v47 }
 0x744   : > { %6201 = vmatpush1.bf16.msra.mxu0 %v10827_v54  ;;  %v10609_v54 = vcombine.low %v4039_v41, %v4047_v42  ;;  %v4143_v41 = vld [vmem:[%s12889_s29 + $0x4e8] sm:$0xff]  ;;  %v10687_v42 = vcombine.low %v4118_v21, %v4126_v22 }
 0x745   : > { %6283 = vmatpush1.bf16.msra.mxu1 %v10829_v55  ;;  %6202 = vmatprep.subr.bf16.mxu0 %v10844_v37  ;;  %v10624_v55 = vcombine.high %v4054_v31, %v4062_v47  ;;  %v10626_v37 = vcombine.high %v4055_v48, %v4063_v50  ;;  %v4158_v31 = vld [vmem:[%s12889_s29 + $0x560] sm:$0xff]  ;;  %v4151_v47 = vld [vmem:[%s12889_s29 + $0x528] sm:$0xff] }
 0x746   : > { %6284 = vmatprep.subr.bf16.mxu1 %v10846_v57  ;;  %v4070_v57 = vld [vmem:[%s12889_s29 + $0x2a0] sm:$0xff] }
 0x747   : > { %v10639_v5 = vcombine.low %v4070_v57, %v4078_v43 }
 0x748   : > { %6203 = vmatpush1.bf16.msra.mxu0 %v10843_v62  ;;  %v10625_v62 = vcombine.low %v4055_v48, %v4063_v50  ;;  %v4159_v48 = vld [vmem:[%s12889_s29 + $0x568] sm:$0xff] }
 0x749   : > { %6285 = vmatpush1.bf16.msra.mxu1 %v10845_v2  ;;  %6204 = vmatprep.subr.bf16.mxu0 %v10860_v3  ;;  %v10640_v2 = vcombine.high %v4070_v57, %v4078_v43  ;;  %v10642_v3 = vcombine.high %v4071_v53, %v4079_v34  ;;  %v4174_v57 = vld [vmem:[%s12889_s29 + $0x5e0] sm:$0xff]  ;;  %v4167_v43 = vld [vmem:[%s12889_s29 + $0x5a8] sm:$0xff] }
 0x74a   : > { %6286 = vmatprep.subr.bf16.mxu1 %v10862_v24  ;;  %v4086_v24 = vld [vmem:[%s12889_s29 + $0x320] sm:$0xff] }
 0x74b   : > { %v10655_v16 = vcombine.low %v4086_v24, %v4094_v40 }
 0x74c   : > { %6205 = vmatpush1.bf16.msra.mxu0 %v10859_v6  ;;  %v10641_v6 = vcombine.low %v4071_v53, %v4079_v34  ;;  %v4175_v53 = vld [vmem:[%s12889_s29 + $0x5e8] sm:$0xff] }
 0x74d   : > { %6287 = vmatpush1.bf16.msra.mxu1 %v10861_v8  ;;  %6321 = vmatprep.subr.bf16.mxu0 %v10560_v10  ;;  %v10656_v8 = vcombine.high %v4086_v24, %v4094_v40  ;;  %v10658_v10 = vcombine.high %v4087_v7, %v4095_v4  ;;  %v4190_v24 = vld [vmem:[%s12889_s29 + $0x660] sm:$0xff]  ;;  %v4183_v40 = vld [vmem:[%s12889_s29 + $0x628] sm:$0xff] }
 0x74e   : > { %6403 = vmatprep.subr.bf16.mxu1 %v10562_v11  ;;  %v4102_v11 = vld [vmem:[%s12889_s29 + $0x3a0] sm:$0xff]  ;;  %v4191_v7 = vld [vmem:[%s12889_s29 + $0x668] sm:$0xff] }
 0x74f   : > { %10873 = vmatmul.mubr.msk.bf16.vlgmr.msra.gmra.mrb[40].mxu0 %vm2191_vm1, %v13586_v56  ;;  %v10671_v26 = vcombine.low %v4102_v11, %v4110_v12 }
 0x750   : > { %10874 = vmatmul.mubr.msk.bf16.vlgmr.msra.gmra.mrb[40].mxu1 %vm2191_vm1, %v13586_v56  ;;  %6322 = vmatpush1.bf16.msra.mxu0 %v10559_v14  ;;  %v4111_v14 = vld [vmem:[%s12889_s29 + $0x3e8] sm:$0xff] }
 0x751   : > { %6353 = vmatprep.mubr.bf16.mxu0 %v13550_v20  ;;  %6404 = vmatpush1.bf16.msra.mxu1 %v10561_v19  ;;  %v10672_v19 = vcombine.high %v4102_v11, %v4110_v12  ;;  %v4206_v11 = vld [vmem:[%s12889_s29 + $0x6e0] sm:$0xff]  ;;  %v4199_v12 = vld [vmem:[%s12889_s29 + $0x6a8] sm:$0xff] }
 0x752   : > { %6435 = vmatprep.mubr.bf16.mxu1 %v13550_v20  ;;  %6323 = vmatprep.subr.bf16.mxu0 %v10576_v59  ;;  %v10674_v59 = vcombine.high %v4103_v13, %v4111_v14 }
 0x753   : > { %6405 = vmatprep.subr.bf16.mxu1 %v10578_v23  ;;  %v4119_v23 = vld [vmem:[%s12889_s29 + $0x428] sm:$0xff] }
 0x754   : > { %6324 = vmatpush1.bf16.msra.mxu0 %v10575_v28  ;;  %v10673_v28 = vcombine.low %v4103_v13, %v4111_v14  ;;  %v4207_v13 = vld [vmem:[%s12889_s29 + $0x6e8] sm:$0xff] }
 0x755   : > { %6406 = vmatpush1.bf16.msra.mxu1 %v10577_v29  ;;  %6325 = vmatprep.subr.bf16.mxu0 %v10592_v30  ;;  %v10688_v29 = vcombine.high %v4118_v21, %v4126_v22  ;;  %v10690_v30 = vcombine.high %v4119_v23, %v4127_v25  ;;  %v4222_v21 = vld [vmem:[%s12889_s29 + $0x760] sm:$0xff]  ;;  %v4215_v22 = vld [vmem:[%s12889_s29 + $0x728] sm:$0xff] }
 0x756   : > { %6407 = vmatprep.subr.bf16.mxu1 %v10594_v27  ;;  %v4134_v27 = vld [vmem:[%s12889_s29 + $0x4a0] sm:$0xff] }
 0x757   : > { %v10703_v50 = vcombine.low %v4134_v27, %v4142_v35 }
 0x758   : > { %6326 = vmatpush1.bf16.msra.mxu0 %v10591_v44  ;;  %v10689_v44 = vcombine.low %v4119_v23, %v4127_v25  ;;  %v4223_v23 = vld [vmem:[%s12889_s29 + $0x768] sm:$0xff] }
 0x759   : > { %6408 = vmatpush1.bf16.msra.mxu1 %v10593_v45  ;;  %6327 = vmatprep.subr.bf16.mxu0 %v10608_v60  ;;  %v10704_v45 = vcombine.high %v4134_v27, %v4142_v35  ;;  %v10706_v60 = vcombine.high %v4135_v38, %v4143_v41  ;;  %v4238_v27 = vld [vmem:[%s12889_s29 + $0x7e0] sm:$0xff]  ;;  %v4231_v35 = vld [vmem:[%s12889_s29 + $0x7a8] sm:$0xff] }
 0x75a   : > { %6409 = vmatprep.subr.bf16.mxu1 %v10610_v49  ;;  %v4150_v49 = vld [vmem:[%s12889_s29 + $0x520] sm:$0xff] }
 0x75b   : > { %v10719_v34 = vcombine.low %v4150_v49, %v4158_v31 }
 0x75c   : > { %6328 = vmatpush1.bf16.msra.mxu0 %v10607_v39  ;;  %v10705_v39 = vcombine.low %v4135_v38, %v4143_v41  ;;  %v4239_v38 = vld [vmem:[%s12889_s29 + $0x7e8] sm:$0xff] }
 0x75d   : > { %6410 = vmatpush1.bf16.msra.mxu1 %v10609_v54  ;;  %6329 = vmatprep.subr.bf16.mxu0 %v10624_v55  ;;  %v10720_v54 = vcombine.high %v4150_v49, %v4158_v31  ;;  %v10722_v55 = vcombine.high %v4151_v47, %v4159_v48  ;;  %v4254_v49 = vld [vmem:[%s12889_s29 + $0x860] sm:$0xff]  ;;  %v4247_v31 = vld [vmem:[%s12889_s29 + $0x828] sm:$0xff] }
 0x75e   : > { %6411 = vmatprep.subr.bf16.mxu1 %v10626_v37  ;;  %v4166_v37 = vld [vmem:[%s12889_s29 + $0x5a0] sm:$0xff] }
 0x75f   : > { %v10735_v4 = vcombine.low %v4166_v37, %v4174_v57 }
 0x760   : > { %6330 = vmatpush1.bf16.msra.mxu0 %v10623_v61  ;;  %v10721_v61 = vcombine.low %v4151_v47, %v4159_v48  ;;  %v4255_v47 = vld [vmem:[%s12889_s29 + $0x868] sm:$0xff] }
 0x761   : > { %6412 = vmatpush1.bf16.msra.mxu1 %v10625_v62  ;;  %6331 = vmatprep.subr.bf16.mxu0 %v10640_v2  ;;  %v10736_v62 = vcombine.high %v4166_v37, %v4174_v57  ;;  %v10738_v2 = vcombine.high %v4167_v43, %v4175_v53  ;;  %v4270_v37 = vld [vmem:[%s12889_s29 + $0x8e0] sm:$0xff]  ;;  %v4263_v57 = vld [vmem:[%s12889_s29 + $0x8a8] sm:$0xff] }
 0x762   : > { %6413 = vmatprep.subr.bf16.mxu1 %v10642_v3  ;;  %v4182_v3 = vld [vmem:[%s12889_s29 + $0x620] sm:$0xff] }
 0x763   : > { %v10751_v14 = vcombine.low %v4182_v3, %v4190_v24 }
 0x764   : > { %6332 = vmatpush1.bf16.msra.mxu0 %v10639_v5  ;;  %v10737_v5 = vcombine.low %v4167_v43, %v4175_v53  ;;  %v4271_v43 = vld [vmem:[%s12889_s29 + $0x8e8] sm:$0xff] }
 0x765   : > { %6414 = vmatpush1.bf16.msra.mxu1 %v10641_v6  ;;  %6333 = vmatprep.subr.bf16.mxu0 %v10656_v8  ;;  %v10752_v6 = vcombine.high %v4182_v3, %v4190_v24  ;;  %v10754_v8 = vcombine.high %v4183_v40, %v4191_v7  ;;  %v4286_v3 = vld [vmem:[%s12889_s29 + $0x960] sm:$0xff]  ;;  %v4279_v24 = vld [vmem:[%s12889_s29 + $0x928] sm:$0xff] }
 0x766   : > { %6415 = vmatprep.subr.bf16.mxu1 %v10658_v10  ;;  %v4198_v10 = vld [vmem:[%s12889_s29 + $0x6a0] sm:$0xff] }
 0x767   : > { %v10767_v25 = vcombine.low %v4198_v10, %v4206_v11 }
 0x768   : > { %6334 = vmatpush1.bf16.msra.mxu0 %v10655_v16  ;;  %v10753_v16 = vcombine.low %v4183_v40, %v4191_v7  ;;  %v4287_v40 = vld [vmem:[%s12889_s29 + $0x968] sm:$0xff] }
 0x769   : > { %6416 = vmatpush1.bf16.msra.mxu1 %v10657_v18  ;;  %6335 = vmatprep.subr.bf16.mxu0 %v10672_v19  ;;  %v10768_v18 = vcombine.high %v4198_v10, %v4206_v11  ;;  %v10770_v19 = vcombine.high %v4199_v12, %v4207_v13  ;;  %v4302_v10 = vld [vmem:[%s12889_s29 + $0x9e0] sm:$0xff]  ;;  %v4295_v11 = vld [vmem:[%s12889_s29 + $0x9a8] sm:$0xff] }
 0x76a   : > { %6417 = vmatprep.subr.bf16.mxu1 %v10674_v59  ;;  %v4214_v59 = vld [vmem:[%s12889_s29 + $0x720] sm:$0xff] }
 0x76b   : > { %v10783_v41 = vcombine.low %v4214_v59, %v4222_v21 }
 0x76c   : > { %6336 = vmatpush1.bf16.msra.mxu0 %v10671_v26  ;;  %v10769_v26 = vcombine.low %v4199_v12, %v4207_v13  ;;  %v4303_v12 = vld [vmem:[%s12889_s29 + $0x9e8] sm:$0xff] }
 0x76d   : > { %6418 = vmatpush1.bf16.msra.mxu1 %v10673_v28  ;;  %6337 = vmatprep.subr.bf16.mxu0 %v10688_v29  ;;  %v10784_v28 = vcombine.high %v4214_v59, %v4222_v21  ;;  %v10786_v29 = vcombine.high %v4215_v22, %v4223_v23  ;;  %v4000_v59 = vld [vmem:[%s12889_s29 + $0x70] sm:$0xff]  ;;  %v3993_v21 = vld [vmem:[%s12889_s29 + $0x38] sm:$0xff] }
 0x76e   : > { %6419 = vmatprep.subr.bf16.mxu1 %v10690_v30  ;;  %v4230_v30 = vld [vmem:[%s12889_s29 + $0x7a0] sm:$0xff] }
 0x76f   : > { %v10799_v48 = vcombine.low %v4230_v30, %v4238_v27 }
 0x770   : > { %6338 = vmatpush1.bf16.msra.mxu0 %v10687_v42  ;;  %v10785_v42 = vcombine.low %v4215_v22, %v4223_v23  ;;  %v4001_v22 = vld [vmem:[%s12889_s29 + $0x78] sm:$0xff] }
 0x771   : > { %6420 = vmatpush1.bf16.msra.mxu1 %v10689_v44  ;;  %6339 = vmatprep.subr.bf16.mxu0 %v10704_v45  ;;  %v10800_v44 = vcombine.high %v4230_v30, %v4238_v27  ;;  %v10802_v45 = vcombine.high %v4231_v35, %v4239_v38  ;;  %v4016_v30 = vld [vmem:[%s12889_s29 + $0xf0] sm:$0xff] }
 0x772   : > { %6421 = vmatprep.subr.bf16.mxu1 %v10706_v60  ;;  %v4246_v60 = vld [vmem:[%s12889_s29 + $0x820] sm:$0xff] }
 0x773   : > { %v10815_v53 = vcombine.low %v4246_v60, %v4254_v49 }
 0x774   : > { %6340 = vmatpush1.bf16.msra.mxu0 %v10703_v50  ;;  %v10801_v50 = vcombine.low %v4231_v35, %v4239_v38  ;;  %v4009_v35 = vld [vmem:[%s12889_s29 + $0xb8] sm:$0xff] }
 0x775   : > { %6422 = vmatpush1.bf16.msra.mxu1 %v10705_v39  ;;  %6341 = vmatprep.subr.bf16.mxu0 %v10720_v54  ;;  %v10816_v39 = vcombine.high %v4246_v60, %v4254_v49  ;;  %v10818_v54 = vcombine.high %v4247_v31, %v4255_v47  ;;  %v4017_v38 = vld [vmem:[%s12889_s29 + $0xf8] sm:$0xff] }
 0x776   : > { %6423 = vmatprep.subr.bf16.mxu1 %v10722_v55  ;;  %v4262_v55 = vld [vmem:[%s12889_s29 + $0x8a0] sm:$0xff]  ;;  %v10582_v60 = vcombine.high %v4009_v35, %v4017_v38  ;;  %v4025_v49 = vld [vmem:[%s12889_s29 + $0x138] sm:$0xff] }
 0x777   : > { %v10831_v7 = vcombine.low %v4262_v55, %v4270_v37 }
 0x778   : > { %6342 = vmatpush1.bf16.msra.mxu0 %v10719_v34  ;;  %v10817_v34 = vcombine.low %v4247_v31, %v4255_v47  ;;  %v4033_v31 = vld [vmem:[%s12889_s29 + $0x178] sm:$0xff] }
 0x779   : > { %6424 = vmatpush1.bf16.msra.mxu1 %v10721_v61  ;;  %6343 = vmatprep.subr.bf16.mxu0 %v10736_v62  ;;  %v10832_v61 = vcombine.high %v4262_v55, %v4270_v37  ;;  %v10834_v62 = vcombine.high %v4263_v57, %v4271_v43  ;;  %v4048_v55 = vld [vmem:[%s12889_s29 + $0x1f0] sm:$0xff]  ;;  %v4041_v37 = vld [vmem:[%s12889_s29 + $0x1b8] sm:$0xff] }
 0x77a   : > { %6425 = vmatprep.subr.bf16.mxu1 %v10738_v2  ;;  %v4278_v2 = vld [vmem:[%s12889_s29 + $0x920] sm:$0xff] }
 0x77b   : > { %v10847_v13 = vcombine.low %v4278_v2, %v4286_v3 }
 0x77c   : > { %6344 = vmatpush1.bf16.msra.mxu0 %v10735_v4  ;;  %v10833_v4 = vcombine.low %v4263_v57, %v4271_v43  ;;  %v4049_v57 = vld [vmem:[%s12889_s29 + $0x1f8] sm:$0xff] }
 0x77d   : > { %6426 = vmatpush1.bf16.msra.mxu1 %v10737_v5  ;;  %6345 = vmatprep.subr.bf16.mxu0 %v10752_v6  ;;  %v10848_v5 = vcombine.high %v4278_v2, %v4286_v3  ;;  %v10850_v6 = vcombine.high %v4279_v24, %v4287_v40  ;;  %v4057_v2 = vld [vmem:[%s12889_s29 + $0x238] sm:$0xff] }
 0x77e   : > { %6427 = vmatprep.subr.bf16.mxu1 %v10754_v8  ;;  %v4294_v8 = vld [vmem:[%s12889_s29 + $0x9a0] sm:$0xff]  ;;  %v4065_v3 = vld [vmem:[%s12889_s29 + $0x278] sm:$0xff] }
 0x77f   : > { %v10863_v23 = vcombine.low %v4294_v8, %v4302_v10 }
 0x780   : > { %6346 = vmatpush1.bf16.msra.mxu0 %v10751_v14  ;;  %v10849_v14 = vcombine.low %v4279_v24, %v4287_v40  ;;  %v10613_v40 = vcombine.low %v4041_v37, %v4049_v57 }
 0x781   : > { %6428 = vmatpush1.bf16.msra.mxu1 %v10753_v16  ;;  %6347 = vmatprep.subr.bf16.mxu0 %v10768_v18  ;;  %v10864_v16 = vcombine.high %v4294_v8, %v4302_v10  ;;  %v10866_v18 = vcombine.high %v4295_v11, %v4303_v12  ;;  %v4073_v8 = vld [vmem:[%s12889_s29 + $0x2b8] sm:$0xff] }
 0x782   : > { %6429 = vmatprep.subr.bf16.mxu1 %v10770_v19  ;;  %v3992_v19 = vld [vmem:[%s12889_s29 + $0x30] sm:$0xff]  ;;  %v4081_v10 = vld [vmem:[%s12889_s29 + $0x2f8] sm:$0xff] }
 0x783   : > { %v10563_v27 = vcombine.low %v3992_v19, %v4000_v59 }
 0x784   : > { %6348 = vmatpush1.bf16.msra.mxu0 %v10767_v25  ;;  %v10865_v25 = vcombine.low %v4295_v11, %v4303_v12  ;;  %v10629_v12 = vcombine.low %v4057_v2, %v4065_v3 }
 0x785   : > { %6430 = vmatpush1.bf16.msra.mxu1 %v10769_v26  ;;  %6349 = vmatprep.subr.bf16.mxu0 %v10784_v28  ;;  %v10564_v26 = vcombine.high %v3992_v19, %v4000_v59  ;;  %v10566_v28 = vcombine.high %v3993_v21, %v4001_v22  ;;  %v4089_v19 = vld [vmem:[%s12889_s29 + $0x338] sm:$0xff] }
 0x786   : > { %6431 = vmatprep.subr.bf16.mxu1 %v10786_v29  ;;  %v4008_v29 = vld [vmem:[%s12889_s29 + $0xb0] sm:$0xff]  ;;  %v4097_v59 = vld [vmem:[%s12889_s29 + $0x378] sm:$0xff] }
 0x787   : > { %v10579_v47 = vcombine.low %v4008_v29, %v4016_v30 }
 0x788   : > { %6350 = vmatpush1.bf16.msra.mxu0 %v10783_v41  ;;  %v10565_v41 = vcombine.low %v3993_v21, %v4001_v22  ;;  %v10645_v22 = vcombine.low %v4073_v8, %v4081_v10 }
 0x789   : > { %6432 = vmatpush1.bf16.msra.mxu1 %v10785_v42  ;;  %6351 = vmatprep.subr.bf16.mxu0 %v10800_v44  ;;  %v10580_v42 = vcombine.high %v4008_v29, %v4016_v30  ;;  %v4024_v44 = vld [vmem:[%s12889_s29 + $0x130] sm:$0xff]  ;;  %v4105_v29 = vld [vmem:[%s12889_s29 + $0x3b8] sm:$0xff] }
 0x78a   : > { %6433 = vmatprep.subr.bf16.mxu1 %v10802_v45  ;;  %v4032_v45 = vld [vmem:[%s12889_s29 + $0x170] sm:$0xff]  ;;  %v4113_v30 = vld [vmem:[%s12889_s29 + $0x3f8] sm:$0xff] }
 0x78b   : > { %v10595_v43 = vcombine.low %v4024_v44, %v4032_v45 }
 0x78c   : > { %6352 = vmatpush1.bf16.msra.mxu0 %v10799_v48  ;;  %v10581_v48 = vcombine.low %v4009_v35, %v4017_v38  ;;  %v10661_v35 = vcombine.low %v4089_v19, %v4097_v59 }
 0x78d   : > { %6434 = vmatpush1.bf16.msra.mxu1 %v10801_v50  ;;  %6362 = vmatprep.subr.bf16.mxu0 %v10816_v39  ;;  %v10596_v50 = vcombine.high %v4024_v44, %v4032_v45  ;;  %v10598_v39 = vcombine.high %v4025_v49, %v4033_v31  ;;  %v4128_v44 = vld [vmem:[%s12889_s29 + $0x470] sm:$0xff]  ;;  %v4121_v45 = vld [vmem:[%s12889_s29 + $0x438] sm:$0xff] }
 0x78e   : > { %6444 = vmatprep.subr.bf16.mxu1 %v10818_v54  ;;  %v4040_v54 = vld [vmem:[%s12889_s29 + $0x1b0] sm:$0xff] }
 0x78f   : > { %6354 = vmatmul.mubr.bf16.vlgmr.msra.gmra.mrb[44].mxu0 %v13554_v51  ;;  %v10611_v24 = vcombine.low %v4040_v54, %v4048_v55 }
 0x790   : > { %6436 = vmatmul.mubr.bf16.vlgmr.msra.gmra.mrb[44].mxu1 %v13554_v51  ;;  %6363 = vmatpush1.bf16.msra.mxu0 %v10815_v53  ;;  %v10597_v53 = vcombine.low %v4025_v49, %v4033_v31  ;;  %v10677_v31 = vcombine.low %v4105_v29, %v4113_v30 }
 0x791   : > { %6445 = vmatpush1.bf16.msra.mxu1 %v10817_v34  ;;  %6364 = vmatprep.subr.bf16.mxu0 %v10832_v61  ;;  %v10612_v34 = vcombine.high %v4040_v54, %v4048_v55  ;;  %v4056_v61 = vld [vmem:[%s12889_s29 + $0x230] sm:$0xff]  ;;  %v4137_v54 = vld [vmem:[%s12889_s29 + $0x4b8] sm:$0xff] }
 0x792   : > { %6446 = vmatprep.subr.bf16.mxu1 %v10834_v62  ;;  %6394 = vmatprep.mubr.bf16.mxu0 %v12747_v17  ;;  %v4064_v62 = vld [vmem:[%s12889_s29 + $0x270] sm:$0xff]  ;;  %v4145_v55 = vld [vmem:[%s12889_s29 + $0x4f8] sm:$0xff] }
 0x793   : > { %6476 = vmatprep.mubr.bf16.mxu1 %v12747_v17  ;;  %v10627_v11 = vcombine.low %v4056_v61, %v4064_v62 }
 0x794   : > { %6365 = vmatpush1.bf16.msra.mxu0 %v10831_v7  ;;  %v10628_v7 = vcombine.high %v4056_v61, %v4064_v62  ;;  %v4153_v61 = vld [vmem:[%s12889_s29 + $0x538] sm:$0xff] }
 0x795   : > { %6447 = vmatpush1.bf16.msra.mxu1 %v10833_v4  ;;  %6366 = vmatprep.subr.bf16.mxu0 %v10848_v5  ;;  %v10630_v4 = vcombine.high %v4057_v2, %v4065_v3  ;;  %v4072_v5 = vld [vmem:[%s12889_s29 + $0x2b0] sm:$0xff]  ;;  %v4161_v62 = vld [vmem:[%s12889_s29 + $0x578] sm:$0xff]  ;;  %v10709_v3 = vcombine.low %v4137_v54, %v4145_v55 }
 0x796   : > { %6448 = vmatprep.subr.bf16.mxu1 %v10850_v6  ;;  %v4080_v6 = vld [vmem:[%s12889_s29 + $0x2f0] sm:$0xff] }
 0x797   : > { %v10643_v21 = vcombine.low %v4072_v5, %v4080_v6 }
 0x798   : > { %6367 = vmatpush1.bf16.msra.mxu0 %v10847_v13  ;;  %v10644_v13 = vcombine.high %v4072_v5, %v4080_v6  ;;  %v4169_v5 = vld [vmem:[%s12889_s29 + $0x5b8] sm:$0xff] }
 0x799   : > { %6449 = vmatpush1.bf16.msra.mxu1 %v10849_v14  ;;  %6368 = vmatprep.subr.bf16.mxu0 %v10864_v16  ;;  %v10646_v14 = vcombine.high %v4073_v8, %v4081_v10  ;;  %v4088_v16 = vld [vmem:[%s12889_s29 + $0x330] sm:$0xff]  ;;  %v4177_v6 = vld [vmem:[%s12889_s29 + $0x5f8] sm:$0xff]  ;;  %v10725_v10 = vcombine.low %v4153_v61, %v4161_v62 }
 0x79a   : > { %6450 = vmatprep.subr.bf16.mxu1 %v10866_v18  ;;  %v4096_v18 = vld [vmem:[%s12889_s29 + $0x370] sm:$0xff] }
 0x79c   : > { %6369 = vmatpush1.bf16.msra.mxu0 %v10863_v23  ;;  %v10660_v23 = vcombine.high %v4088_v16, %v4096_v18 }
 0x79d   : > { %6451 = vmatpush1.bf16.msra.mxu1 %v10865_v25  ;;  %6485 = vmatprep.subr.bf16.mxu0 %v10564_v26  ;;  %v10662_v25 = vcombine.high %v4089_v19, %v4097_v59  ;;  %v4104_v26 = vld [vmem:[%s12889_s29 + $0x3b0] sm:$0xff]  ;;  %v10741_v59 = vcombine.low %v4169_v5, %v4177_v6 }
 0x79e   : > { %6567 = vmatprep.subr.bf16.mxu1 %v10566_v28  ;;  %v4112_v28 = vld [vmem:[%s12889_s29 + $0x3f0] sm:$0xff] }
 0x79f   : > { %10875 = vmatmul.mubr.msk.bf16.vlgmr.msra.gmra.mrb[44].mxu0 %vm2191_vm1, %v13586_v56  ;;  %v10676_v38 = vcombine.high %v4104_v26, %v4112_v28  ;;  %v10675_v49 = vcombine.low %v4104_v26, %v4112_v28  ;;  %v4201_v26 = vld [vmem:[%s12889_s29 + $0x6b8] sm:$0xff] }
 0x7a0   : > { %10876 = vmatmul.mubr.msk.bf16.vlgmr.msra.gmra.mrb[44].mxu1 %vm2191_vm1, %v13586_v56  ;;  %6486 = vmatpush1.bf16.msra.mxu0 %v10563_v27  ;;  %v10659_v27 = vcombine.low %v4088_v16, %v4096_v18  ;;  %v4185_v16 = vld [vmem:[%s12889_s29 + $0x638] sm:$0xff] }
 0x7a1   : > { %6517 = vmatprep.mubr.bf16.mxu0 %v13550_v20  ;;  %6568 = vmatpush1.bf16.msra.mxu1 %v10565_v41  ;;  %v10678_v41 = vcombine.high %v4105_v29, %v4113_v30  ;;  %v4193_v18 = vld [vmem:[%s12889_s29 + $0x678] sm:$0xff] }
 0x7a2   : > { %6599 = vmatprep.mubr.bf16.mxu1 %v13550_v20  ;;  %6487 = vmatprep.subr.bf16.mxu0 %v10580_v42  ;;  %v10614_v20 = vcombine.high %v4041_v37, %v4049_v57  ;;  %v4120_v42 = vld [vmem:[%s12889_s29 + $0x430] sm:$0xff]  ;;  %v4209_v28 = vld [vmem:[%s12889_s29 + $0x6f8] sm:$0xff]  ;;  %v10757_v30 = vcombine.low %v4185_v16, %v4193_v18 }
 0x7a3   : > { %6569 = vmatprep.subr.bf16.mxu1 %v10582_v60  ;;  %v4129_v60 = vld [vmem:[%s12889_s29 + $0x478] sm:$0xff]  ;;  %v10691_v37 = vcombine.low %v4120_v42, %v4128_v44 }
 0x7a4   : > { %6488 = vmatpush1.bf16.msra.mxu0 %v10579_v47  ;;  %v10692_v47 = vcombine.high %v4120_v42, %v4128_v44  ;;  %v10693_v57 = vcombine.low %v4121_v45, %v4129_v60  ;;  %v4217_v42 = vld [vmem:[%s12889_s29 + $0x738] sm:$0xff] }
 0x7a5   : > { %6570 = vmatpush1.bf16.msra.mxu1 %v10581_v48  ;;  %6489 = vmatprep.subr.bf16.mxu0 %v10596_v50  ;;  %v10694_v48 = vcombine.high %v4121_v45, %v4129_v60  ;;  %v4136_v50 = vld [vmem:[%s12889_s29 + $0x4b0] sm:$0xff]  ;;  %v4225_v44 = vld [vmem:[%s12889_s29 + $0x778] sm:$0xff]  ;;  %v10773_v60 = vcombine.low %v4201_v26, %v4209_v28 }
 0x7a6   : > { %6571 = vmatprep.subr.bf16.mxu1 %v10598_v39  ;;  %v4144_v39 = vld [vmem:[%s12889_s29 + $0x4f0] sm:$0xff] }
 0x7a7   : > { %v10707_v2 = vcombine.low %v4136_v50, %v4144_v39 }
 0x7a8   : > { %6490 = vmatpush1.bf16.msra.mxu0 %v10595_v43  ;;  %v10708_v43 = vcombine.high %v4136_v50, %v4144_v39  ;;  %v4232_v50 = vld [vmem:[%s12889_s29 + $0x7b0] sm:$0xff] }
 0x7a9   : > { %6572 = vmatpush1.bf16.msra.mxu1 %v10597_v53  ;;  %6491 = vmatprep.subr.bf16.mxu0 %v10612_v34  ;;  %v10710_v53 = vcombine.high %v4137_v54, %v4145_v55  ;;  %v4152_v34 = vld [vmem:[%s12889_s29 + $0x530] sm:$0xff] }
 0x7aa   : > { %6573 = vmatprep.subr.bf16.mxu1 %v10614_v20  ;;  %v4160_v20 = vld [vmem:[%s12889_s29 + $0x570] sm:$0xff] }
 0x7ab   : > { %v10723_v8 = vcombine.low %v4152_v34, %v4160_v20  ;;  %v4240_v39 = vld [vmem:[%s12889_s29 + $0x7f0] sm:$0xff] }
 0x7ac   : > { %6492 = vmatpush1.bf16.msra.mxu0 %v10611_v24  ;;  %v10724_v24 = vcombine.high %v4152_v34, %v4160_v20 }
 0x7ad   : > { %6574 = vmatpush1.bf16.msra.mxu1 %v10613_v40  ;;  %6493 = vmatprep.subr.bf16.mxu0 %v10628_v7  ;;  %v10726_v40 = vcombine.high %v4153_v61, %v4161_v62  ;;  %v4168_v7 = vld [vmem:[%s12889_s29 + $0x5b0] sm:$0xff]  ;;  %v10789_v62 = vcombine.low %v4217_v42, %v4225_v44 }
 0x7ae   : > { %6575 = vmatprep.subr.bf16.mxu1 %v10630_v4  ;;  %v4176_v4 = vld [vmem:[%s12889_s29 + $0x5f0] sm:$0xff] }
 0x7af   : > { %v10739_v19 = vcombine.low %v4168_v7, %v4176_v4 }
 0x7b0   : > { %6494 = vmatpush1.bf16.msra.mxu0 %v10627_v11  ;;  %v10740_v11 = vcombine.high %v4168_v7, %v4176_v4  ;;  %v4249_v7 = vld [vmem:[%s12889_s29 + $0x838] sm:$0xff] }
 0x7b1   : > { %6576 = vmatpush1.bf16.msra.mxu1 %v10629_v12  ;;  %6495 = vmatprep.subr.bf16.mxu0 %v10644_v13  ;;  %v10742_v12 = vcombine.high %v4169_v5, %v4177_v6  ;;  %v4184_v13 = vld [vmem:[%s12889_s29 + $0x630] sm:$0xff]  ;;  %v4257_v4 = vld [vmem:[%s12889_s29 + $0x878] sm:$0xff]  ;;  %v10803_v5 = vcombine.low %v4232_v50, %v4240_v39 }
 0x7b2   : > { %6577 = vmatprep.subr.bf16.mxu1 %v10646_v14  ;;  %v4192_v14 = vld [vmem:[%s12889_s29 + $0x670] sm:$0xff] }
 0x7b3   : > { %v10755_v29 = vcombine.low %v4184_v13, %v4192_v14 }
 0x7b4   : > { %6496 = vmatpush1.bf16.msra.mxu0 %v10643_v21  ;;  %v10756_v21 = vcombine.high %v4184_v13, %v4192_v14  ;;  %v4265_v13 = vld [vmem:[%s12889_s29 + $0x8b8] sm:$0xff] }
 0x7b5   : > { %6578 = vmatpush1.bf16.msra.mxu1 %v10645_v22  ;;  %6497 = vmatprep.subr.bf16.mxu0 %v10660_v23  ;;  %v10758_v22 = vcombine.high %v4185_v16, %v4193_v18  ;;  %v4200_v23 = vld [vmem:[%s12889_s29 + $0x6b0] sm:$0xff]  ;;  %v4273_v14 = vld [vmem:[%s12889_s29 + $0x8f8] sm:$0xff]  ;;  %v10821_v18 = vcombine.low %v4249_v7, %v4257_v4 }
 0x7b6   : > { %6579 = vmatprep.subr.bf16.mxu1 %v10662_v25  ;;  %v4208_v25 = vld [vmem:[%s12889_s29 + $0x6f0] sm:$0xff] }
 0x7b7   : > { %v10771_v45 = vcombine.low %v4200_v23, %v4208_v25 }
 0x7b8   : > { %6498 = vmatpush1.bf16.msra.mxu0 %v10659_v27  ;;  %v10772_v27 = vcombine.high %v4200_v23, %v4208_v25  ;;  %v4281_v23 = vld [vmem:[%s12889_s29 + $0x938] sm:$0xff] }
 0x7b9   : > { %6580 = vmatpush1.bf16.msra.mxu1 %v10661_v35  ;;  %6499 = vmatprep.subr.bf16.mxu0 %v10676_v38  ;;  %v10774_v35 = vcombine.high %v4201_v26, %v4209_v28  ;;  %v4216_v38 = vld [vmem:[%s12889_s29 + $0x730] sm:$0xff]  ;;  %v4289_v25 = vld [vmem:[%s12889_s29 + $0x978] sm:$0xff]  ;;  %v13852_v26 = vld [vmem:[%s12894_s19] sm:$0xff] }
 0x7ba   : > { %6581 = vmatprep.subr.bf16.mxu1 %v10678_v41  ;;  %v4224_v41 = vld [vmem:[%s12889_s29 + $0x770] sm:$0xff] }
 0x7bb   : > { %v10787_v34 = vcombine.low %v4216_v38, %v4224_v41 }
 0x7bc   : > { %6500 = vmatpush1.bf16.msra.mxu0 %v10675_v49  ;;  %v10788_v49 = vcombine.high %v4216_v38, %v4224_v41  ;;  %v4304_v38 = vld [vmem:[%s12889_s29 + $0x9f0] sm:$0xff]  ;;  %v4317_v41 = vrot.slane %v13852_v26, %v13226_v32 }
 0x7bd   : > { %6582 = vmatpush1.bf16.msra.mxu1 %v10677_v31  ;;  %6501 = vmatprep.subr.bf16.mxu0 %v10692_v47 }
 0x7be   : > { %6583 = vmatprep.subr.bf16.mxu1 %v10694_v48  ;;  %v10790_v48 = vcombine.high %v4217_v42, %v4225_v44  ;;  %v4297_v42 = vld [vmem:[%s12889_s29 + $0x9b8] sm:$0xff] }
 0x7bf   : > { %v4305_v44 = vld [vmem:[%s12889_s29 + $0x9f8] sm:$0xff] }
 0x7c0   : > { %6502 = vmatpush1.bf16.msra.mxu0 %v10691_v37  ;;  %v4233_v37 = vld [vmem:[%s12889_s29 + $0x7b8] sm:$0xff] }
 0x7c1   : > { %6584 = vmatpush1.bf16.msra.mxu1 %v10693_v57  ;;  %6503 = vmatprep.subr.bf16.mxu0 %v10708_v43  ;;  %v4241_v57 = vld [vmem:[%s12889_s29 + $0x7f8] sm:$0xff] }
 0x7c2   : > { %6585 = vmatprep.subr.bf16.mxu1 %v10710_v53  ;;  %v10805_v6 = vcombine.low %v4233_v37, %v4241_v57 }
 0x7c4   : > { %6504 = vmatpush1.bf16.msra.mxu0 %v10707_v2  ;;  %v10804_v2 = vcombine.high %v4232_v50, %v4240_v39 }
 0x7c5   : > { %6586 = vmatpush1.bf16.msra.mxu1 %v10709_v3  ;;  %6505 = vmatprep.subr.bf16.mxu0 %v10724_v24  ;;  %v10806_v3 = vcombine.high %v4233_v37, %v4241_v57  ;;  %v4248_v24 = vld [vmem:[%s12889_s29 + $0x830] sm:$0xff]  ;;  %v10869_v37 = vcombine.low %v4297_v42, %v4305_v44 }
 0x7c6   : > { %6587 = vmatprep.subr.bf16.mxu1 %v10726_v40  ;;  %v4256_v40 = vld [vmem:[%s12889_s29 + $0x870] sm:$0xff] }
 0x7c7   : > { %v10819_v16 = vcombine.low %v4248_v24, %v4256_v40  ;;  %v12174_v57 = vld [vmem:[%s12907_s2 + $0x4] ss:$12 sps:$4 sm:$0xff]  }
 0x7c8   : > { %6506 = vmatpush1.bf16.msra.mxu0 %v10723_v8  ;;  %v10820_v8 = vcombine.high %v4248_v24, %v4256_v40  ;;  %v12181_v24 = vld [vmem:[%s12907_s2 + $0x198] ss:$12 sps:$4 sm:$0xff]   ;;  %v12186_v40 = vld [vmem:[%s12907_s2 + $0x34] ss:$12 sps:$4 sm:$0xff]  }
 0x7c9   : > { %6588 = vmatpush1.bf16.msra.mxu1 %v10725_v10  ;;  %6507 = vmatprep.subr.bf16.mxu0 %v10740_v11  ;;  %v10822_v10 = vcombine.high %v4249_v7, %v4257_v4  ;;  %v4264_v11 = vld [vmem:[%s12889_s29 + $0x8b0] sm:$0xff] }
 0x7ca   : > { %6589 = vmatprep.subr.bf16.mxu1 %v10742_v12  ;;  %v4272_v12 = vld [vmem:[%s12889_s29 + $0x8f0] sm:$0xff] }
 0x7cb   : > { %v10835_v28 = vcombine.low %v4264_v11, %v4272_v12  ;;  %v12189_v7 = vld [vmem:[%s12907_s2 + $0x1b4] ss:$12 sps:$4 sm:$0xff]   ;;  %v12187_v4 = vld [vmem:[%s12907_s2 + $0x1b0] ss:$12 sps:$4 sm:$0xff]  }
 0x7cc   : > { %6508 = vmatpush1.bf16.msra.mxu0 %v10739_v19  ;;  %v10836_v19 = vcombine.high %v4264_v11, %v4272_v12  ;;  %v12198_v11 = vld [vmem:[%s12907_s2 + $0x64] ss:$12 sps:$4 sm:$0xff]  }
 0x7cd   : > { %6590 = vmatpush1.bf16.msra.mxu1 %v10741_v59  ;;  %6509 = vmatprep.subr.bf16.mxu0 %v10756_v21  ;;  %v10838_v59 = vcombine.high %v4265_v13, %v4273_v14  ;;  %v4280_v21 = vld [vmem:[%s12889_s29 + $0x930] sm:$0xff] }
 0x7ce   : > { %6591 = vmatprep.subr.bf16.mxu1 %v10758_v22  ;;  %v4288_v22 = vld [vmem:[%s12889_s29 + $0x970] sm:$0xff] }
 0x7cf   : > { %v12201_v12 = vld [vmem:[%s12907_s2 + $0x1e4] ss:$12 sps:$4 sm:$0xff]  }
 0x7d0   : > { %6510 = vmatpush1.bf16.msra.mxu0 %v10755_v29  ;;  %v10837_v29 = vcombine.low %v4265_v13, %v4273_v14  ;;  %v12196_v13 = vld [vmem:[%s12907_s2 + $0x60] ss:$12 sps:$4 sm:$0xff]  }
 0x7d1   : > { %6592 = vmatpush1.bf16.msra.mxu1 %v10757_v30  ;;  %6511 = vmatprep.subr.bf16.mxu0 %v10772_v27  ;;  %v10852_v30 = vcombine.high %v4280_v21, %v4288_v22  ;;  %v10854_v27 = vcombine.high %v4281_v23, %v4289_v25  ;;  %v12199_v14 = vld [vmem:[%s12907_s2 + $0x1e0] ss:$12 sps:$4 sm:$0xff]  }
 0x7d2   : > { %v13826_v31 = vpop.f32.mrb[36].mxu0  ;;  %v13828_v47 = vpop.f32.mrb[36].mxu1  ;;  %6593 = vmatprep.subr.bf16.mxu1 %v10774_v35  ;;  %v4296_v35 = vld [vmem:[%s12889_s29 + $0x9b0] sm:$0xff] }
 0x7d3   : > { %v13832_v54 = vpop.f32.mrb[37].mxu0  ;;  %v13834_v55 = vpop.f32.mrb[37].mxu1 }
 0x7d4   : > { %v6072_v43 = vpop.f32.mrb[38].mxu0  ;;  %v6154_v53 = vpop.f32.mrb[38].mxu1  ;;  %6512 = vmatpush1.bf16.msra.mxu0 %v10771_v45  ;;  %v10851_v45 = vcombine.low %v4280_v21, %v4288_v22  ;;  %v11563_v50 = vadd.f32 %v13832_v54, %v4317_v41  ;;  %v12175_v54 = vld [vmem:[%s12907_s2 + $0x180] ss:$12 sps:$4 sm:$0xff]  }
 0x7d5   : > { %6594 = vmatpush1.bf16.msra.mxu1 %v10773_v60  ;;  %v6073_v20 = vpop.f32.mrb[39].mxu0  ;;  %v6155_v61 = vpop.f32.mrb[39].mxu1  ;;  %6513 = vmatprep.subr.bf16.mxu0 %v10788_v49  ;;  %v10853_v60 = vcombine.low %v4281_v23, %v4289_v25  ;;  %v10868_v49 = vcombine.high %v4296_v35, %v4304_v38  ;;  %v12177_v43 = vld [vmem:[%s12907_s2 + $0x184] ss:$12 sps:$4 sm:$0xff]   ;;  %v12210_v21 = vld [vmem:[%s12907_s2 + $0x94] ss:$12 sps:$4 sm:$0xff]  }
 0x7d6   : > { %6595 = vmatprep.subr.bf16.mxu1 %v10790_v48  ;;  %v10870_v48 = vcombine.high %v4297_v42, %v4305_v44  ;;  %v6650_v53 = vmax.f32 %v11563_v50, 0.0  ;;  %v12172_v20 = vld [vmem:[%s12907_s2] ss:$12 sps:$4 sm:$0xff]   ;;  %v12208_v23 = vld [vmem:[%s12907_s2 + $0x90] ss:$12 sps:$4 sm:$0xff]  }
 0x7d7   : > { %v12213_v22 = vld [vmem:[%s12907_s2 + $0x214] ss:$12 sps:$4 sm:$0xff]   ;;  %v12211_v25 = vld [vmem:[%s12907_s2 + $0x210] ss:$12 sps:$4 sm:$0xff]  }
 0x7d8   : > { %6514 = vmatpush1.bf16.msra.mxu0 %v10787_v34  ;;  %v13872_v61 = vpack.c.bf16 %v6650_v53, %v6650_v53  ;;  %v12220_v41 = vld [vmem:[%s12907_s2 + $0xc0] ss:$12 sps:$4 sm:$0xff]   ;;  %v12228_v44 = vld [vmem:[%s12907_s2 + $0xdc] ss:$12 sps:$4 sm:$0xff]   ;;  %v12246_v53 = vld [vmem:[%s12907_s2 + $0x124] ss:$12 sps:$4 sm:$0xff]  }
 0x7d9   : > { %6596 = vmatpush1.bf16.msra.mxu1 %v10789_v62  ;;  %6515 = vmatprep.subr.bf16.mxu0 %v10804_v2  ;;  %v12183_v62 = vld [vmem:[%s12907_s2 + $0x19c] ss:$12 sps:$4 sm:$0xff]   ;;  %v12223_v42 = vld [vmem:[%s12907_s2 + $0x240] ss:$12 sps:$4 sm:$0xff]  }
 0x7da   : > { %6597 = vmatprep.subr.bf16.mxu1 %v10806_v3  ;;  %v12178_v3 = vld [vmem:[%s12907_s2 + $0x18] ss:$12 sps:$4 sm:$0xff]   ;;  %v12232_v50 = vld [vmem:[%s12907_s2 + $0xf0] ss:$12 sps:$4 sm:$0xff]  }
 0x7dc   : > { %6516 = vmatpush1.bf16.msra.mxu0 %v10803_v5  ;;  %v12192_v5 = vld [vmem:[%s12907_s2 + $0x4c] ss:$12 sps:$4 sm:$0xff]  }
 0x7dd   : > { %6598 = vmatpush1.bf16.msra.mxu1 %v10805_v6  ;;  %6526 = vmatprep.subr.bf16.mxu0 %v10820_v8  ;;  %v12195_v6 = vld [vmem:[%s12907_s2 + $0x1cc] ss:$12 sps:$4 sm:$0xff]   ;;  %v12190_v8 = vld [vmem:[%s12907_s2 + $0x48] ss:$12 sps:$4 sm:$0xff]  }
 0x7de   : > { %6608 = vmatprep.subr.bf16.mxu1 %v10822_v10  ;;  %v12193_v10 = vld [vmem:[%s12907_s2 + $0x1c8] ss:$12 sps:$4 sm:$0xff]  }
 0x7df   : > { %6518 = vmatmul.mubr.bf16.vlgmr.msra.gmra.mrb[48].mxu0 %v13554_v51 }
 0x7e0   : > { %6600 = vmatmul.mubr.bf16.vlgmr.msra.gmra.mrb[48].mxu1 %v13554_v51  ;;  %6527 = vmatpush1.bf16.msra.mxu0 %v10819_v16  ;;  %v4325_v51 = vrot.slane %v13852_v26, %v13250_v52  ;;  %v12204_v16 = vld [vmem:[%s12907_s2 + $0x7c] ss:$12 sps:$4 sm:$0xff]  }
 0x7e1   : > { %6609 = vmatpush1.bf16.msra.mxu1 %v10821_v18  ;;  %6528 = vmatprep.subr.bf16.mxu0 %v10836_v19  ;;  %v12207_v18 = vld [vmem:[%s12907_s2 + $0x1fc] ss:$12 sps:$4 sm:$0xff]   ;;  %v12202_v19 = vld [vmem:[%s12907_s2 + $0x78] ss:$12 sps:$4 sm:$0xff]  }
 0x7e2   : > { %6610 = vmatprep.subr.bf16.mxu1 %v10838_v59  ;;  %6558 = vmatprep.mubr.bf16.mxu0 %v12747_v17  ;;  %v11565_v39 = vadd.f32 %v13834_v55, %v4325_v51  ;;  %v12180_v55 = vld [vmem:[%s12907_s2 + $0x1c] ss:$12 sps:$4 sm:$0xff]   ;;  %v12205_v59 = vld [vmem:[%s12907_s2 + $0x1f8] ss:$12 sps:$4 sm:$0xff]  }
 0x7e3   : > { %6640 = vmatprep.mubr.bf16.mxu1 %v12747_v17  ;;  %v10867_v17 = vcombine.low %v4296_v35, %v4304_v38  ;;  %v12222_v35 = vld [vmem:[%s12907_s2 + $0xc4] ss:$12 sps:$4 sm:$0xff]   ;;  %v12231_v51 = vld [vmem:[%s12907_s2 + $0x25c] ss:$12 sps:$4 sm:$0xff]  }
 0x7e4   : > { %6529 = vmatpush1.bf16.msra.mxu0 %v10835_v28  ;;  %v6652_v34 = vmax.f32 %v11565_v39, 0.0  ;;  %v12216_v28 = vld [vmem:[%s12907_s2 + $0xac] ss:$12 sps:$4 sm:$0xff]   ;;  %v12225_v38 = vld [vmem:[%s12907_s2 + $0x244] ss:$12 sps:$4 sm:$0xff]  }
 0x7e5   : > { %6611 = vmatpush1.bf16.msra.mxu1 %v10837_v29  ;;  %6530 = vmatprep.subr.bf16.mxu0 %v10852_v30  ;;  %v12219_v29 = vld [vmem:[%s12907_s2 + $0x22c] ss:$12 sps:$4 sm:$0xff]   ;;  %v12214_v30 = vld [vmem:[%s12907_s2 + $0xa8] ss:$12 sps:$4 sm:$0xff]   ;;  %v12235_v39 = vld [vmem:[%s12907_s2 + $0x270] ss:$12 sps:$4 sm:$0xff]  }
 0x7e6   : > { %6612 = vmatprep.subr.bf16.mxu1 %v10854_v27  ;;  %v13877_v2 = vpack.c.bf16 %v6652_v34, %v6652_v34  ;;  %v12217_v27 = vld [vmem:[%s12907_s2 + $0x228] ss:$12 sps:$4 sm:$0xff]   ;;  %v12249_v34 = vld [vmem:[%s12907_s2 + $0x2a4] ss:$12 sps:$4 sm:$0xff]  }
 0x7e8   : > { %6531 = vmatpush1.bf16.msra.mxu0 %v10851_v45  ;;  %v12226_v45 = vld [vmem:[%s12907_s2 + $0xd8] ss:$12 sps:$4 sm:$0xff]  }
 0x7e9   : > { %6613 = vmatpush1.bf16.msra.mxu1 %v10853_v60  ;;  %6532 = vmatprep.subr.bf16.mxu0 %v10868_v49  ;;  %v12229_v60 = vld [vmem:[%s12907_s2 + $0x258] ss:$12 sps:$4 sm:$0xff]   ;;  %v12234_v49 = vld [vmem:[%s12907_s2 + $0xf4] ss:$12 sps:$4 sm:$0xff]  }
 0x7ea   : > { %6614 = vmatprep.subr.bf16.mxu1 %v10870_v48  ;;  %v12237_v48 = vld [vmem:[%s12907_s2 + $0x274] ss:$12 sps:$4 sm:$0xff]  }
 0x7ec   : > { %6533 = vmatpush1.bf16.msra.mxu0 %v10867_v17  ;;  %v12240_v17 = vld [vmem:[%s12907_s2 + $0x10c] ss:$12 sps:$4 sm:$0xff]  }
 0x7ed   : > { %6615 = vmatpush1.bf16.msra.mxu1 %v10869_v37  ;;  %9258 = vmatprep.subr.bf16.mxu0 %v12174_v57  ;;  %v12243_v37 = vld [vmem:[%s12907_s2 + $0x28c] ss:$12 sps:$4 sm:$0xff]   ;;  %v12238_v57 = vld [vmem:[%s12907_s2 + $0x108] ss:$12 sps:$4 sm:$0xff]  }
 0x7ee   : > { %9299 = vmatprep.subr.bf16.mxu1 %v12177_v43  ;;  %v12241_v43 = vld [vmem:[%s12907_s2 + $0x288] ss:$12 sps:$4 sm:$0xff]  }
 0x7ef   : > { %10877 = vmatmul.mubr.msk.bf16.vlgmr.msra.gmra.mrb[48].mxu0 %vm2191_vm1, %v13586_v56 }
 0x7f0   : > { %10878 = vmatmul.mubr.msk.bf16.vlgmr.msra.gmra.mrb[48].mxu1 %vm2191_vm1, %v13586_v56  ;;  %9259 = vmatpush1.bf16.msra.mxu0 %v12172_v20  ;;  %v12184_v56 = vld [vmem:[%s12907_s2 + $0x30] ss:$12 sps:$4 sm:$0xff]   ;;  %v12244_v20 = vld [vmem:[%s12907_s2 + $0x120] ss:$12 sps:$4 sm:$0xff]  }
 0x7f1   : > { %9290 = vmatprep.mubr.bf16.mxu0 %v13872_v61  ;;  %9300 = vmatpush1.bf16.msra.mxu1 %v12175_v54  ;;  %v12247_v54 = vld [vmem:[%s12907_s2 + $0x2a0] ss:$12 sps:$4 sm:$0xff]  }
 0x7f2   : > { %9331 = vmatprep.mubr.bf16.mxu1 %v13877_v2  ;;  %9260 = vmatprep.subr.bf16.mxu0 %v12180_v55  ;;  %v12252_v55 = vld [vmem:[%s12907_s2 + $0x13c] ss:$12 sps:$4 sm:$0xff]  }
 0x7f3   : > { %9301 = vmatprep.subr.bf16.mxu1 %v12183_v62  ;;  %v12255_v62 = vld [vmem:[%s12907_s2 + $0x2bc] ss:$12 sps:$4 sm:$0xff]  }
 0x7f4   : > { %9261 = vmatpush1.bf16.msra.mxu0 %v12178_v3  ;;  %v12250_v3 = vld [vmem:[%s12907_s2 + $0x138] ss:$12 sps:$4 sm:$0xff]  }
 0x7f5   : > { %9302 = vmatpush1.bf16.msra.mxu1 %v12181_v24  ;;  %9262 = vmatprep.subr.bf16.mxu0 %v12186_v40  ;;  %v4313_v24 = vrot.slane %v13852_v26, %v13192_v63  ;;  %v12253_v40 = vld [vmem:[%s12907_s2 + $0x2b8] ss:$12 sps:$4 sm:$0xff]  }
 0x7f6   : > { %9303 = vmatprep.subr.bf16.mxu1 %v12189_v7  ;;  %v12258_v7 = vld [vmem:[%s12907_s2 + $0x154] ss:$12 sps:$4 sm:$0xff]  }
 0x7f8   : > { %9263 = vmatpush1.bf16.msra.mxu0 %v12184_v56  ;;  %v4321_v56 = vrot.slane %v13852_v26, %v13237_v36 }
 0x7f9   : > { %9304 = vmatpush1.bf16.msra.mxu1 %v12187_v4  ;;  %9264 = vmatprep.subr.bf16.mxu0 %v12192_v5  ;;  %v12261_v5 = vld [vmem:[%s12907_s2 + $0x2d4] ss:$12 sps:$4 sm:$0xff]  }
 0x7fa   : > { %9305 = vmatprep.subr.bf16.mxu1 %v12195_v6 }
 0x7fc   : > { %9265 = vmatpush1.bf16.msra.mxu0 %v12190_v8  ;;  %v4333_v8 = vrot.slane %v13852_v26, %v13198_v1 }
 0x7fd   : > { %9306 = vmatpush1.bf16.msra.mxu1 %v12193_v10  ;;  %9266 = vmatprep.subr.bf16.mxu0 %v12198_v11  ;;  %v4341_v11 = vrot.slane %v13852_v26, %v13242_v46 }
 0x7fe   : > { %9307 = vmatprep.subr.bf16.mxu1 %v12201_v12 }
 0x800   : > { %9267 = vmatpush1.bf16.msra.mxu0 %v12196_v13 }
 0x801   : > { %9308 = vmatpush1.bf16.msra.mxu1 %v12199_v14  ;;  %9268 = vmatprep.subr.bf16.mxu0 %v12204_v16  ;;  %v12256_v14 = vld [vmem:[%s12907_s2 + $0x150] ss:$12 sps:$4 sm:$0xff]   ;;  %v11562_v16 = vadd.f32 %v13826_v31, %v4313_v24 }
 0x802   : > { %9309 = vmatprep.subr.bf16.mxu1 %v12207_v18  ;;  %v12297_v24 = vld [vmem:[%s12907_s2 + $0x4e4] ss:$12 sps:$4 sm:$0xff]  }
 0x803   : > { %v6649_v31 = vmax.f32 %v11562_v16, 0.0  ;;  %v12312_v16 = vld [vmem:[%s12907_s2 + $0x3ac] ss:$12 sps:$4 sm:$0xff]  }
 0x804   : > { %9269 = vmatpush1.bf16.msra.mxu0 %v12202_v19 }
 0x805   : > { %9310 = vmatpush1.bf16.msra.mxu1 %v12205_v59  ;;  %9270 = vmatprep.subr.bf16.mxu0 %v12210_v21  ;;  %v12259_v59 = vld [vmem:[%s12907_s2 + $0x2d0] ss:$12 sps:$4 sm:$0xff]   ;;  %v12264_v21 = vld [vmem:[%s12907_s2 + $0x16c] ss:$12 sps:$4 sm:$0xff]  }
 0x806   : > { %9311 = vmatprep.subr.bf16.mxu1 %v12213_v22  ;;  %v11564_v22 = vadd.f32 %v13828_v47, %v4321_v56  ;;  %v12300_v56 = vld [vmem:[%s12907_s2 + $0x37c] ss:$12 sps:$4 sm:$0xff]  }
 0x808   : > { %9271 = vmatpush1.bf16.msra.mxu0 %v12208_v23 }
 0x809   : > { %9312 = vmatpush1.bf16.msra.mxu1 %v12211_v25  ;;  %9272 = vmatprep.subr.bf16.mxu0 %v12216_v28  ;;  %v12267_v25 = vld [vmem:[%s12907_s2 + $0x2ec] ss:$12 sps:$4 sm:$0xff]  }
 0x80a   : > { %9313 = vmatprep.subr.bf16.mxu1 %v12219_v29 }
 0x80c   : > { %9273 = vmatpush1.bf16.msra.mxu0 %v12214_v30  ;;  %v12262_v30 = vld [vmem:[%s12907_s2 + $0x168] ss:$12 sps:$4 sm:$0xff]  }
 0x80d   : > { %9314 = vmatpush1.bf16.msra.mxu1 %v12217_v27  ;;  %9274 = vmatprep.subr.bf16.mxu0 %v12222_v35  ;;  %v12265_v27 = vld [vmem:[%s12907_s2 + $0x2e8] ss:$12 sps:$4 sm:$0xff]   ;;  %v12270_v35 = vld [vmem:[%s12907_s2 + $0x304] ss:$12 sps:$4 sm:$0xff]  }
 0x80e   : > { %9315 = vmatprep.subr.bf16.mxu1 %v12225_v38  ;;  %v6651_v38 = vmax.f32 %v11564_v22, 0.0  ;;  %v12321_v22 = vld [vmem:[%s12907_s2 + $0x544] ss:$12 sps:$4 sm:$0xff]  }
 0x810   : > { %9275 = vmatpush1.bf16.msra.mxu0 %v12220_v41  ;;  %v12273_v41 = vld [vmem:[%s12907_s2 + $0x484] ss:$12 sps:$4 sm:$0xff]  }
 0x811   : > { %9316 = vmatpush1.bf16.msra.mxu1 %v12223_v42  ;;  %9276 = vmatprep.subr.bf16.mxu0 %v12228_v44  ;;  %v12268_v44 = vld [vmem:[%s12907_s2 + $0x300] ss:$12 sps:$4 sm:$0xff]  }
 0x812   : > { %9317 = vmatprep.subr.bf16.mxu1 %v12231_v51  ;;  %v13958_v51 = vpack.c.bf16 %v6649_v31, %v6649_v31  ;;  %v12325_v31 = vld [vmem:[%s12907_s2 + $0x558] ss:$12 sps:$4 sm:$0xff]  }
 0x814   : > { %9277 = vmatpush1.bf16.msra.mxu0 %v12226_v45  ;;  %v12271_v45 = vld [vmem:[%s12907_s2 + $0x480] ss:$12 sps:$4 sm:$0xff]  }
 0x815   : > { %9318 = vmatpush1.bf16.msra.mxu1 %v12229_v60  ;;  %9278 = vmatprep.subr.bf16.mxu0 %v12234_v49  ;;  %v13961_v60 = vpack.c.bf16 %v6651_v38, %v6651_v38  ;;  %v12276_v49 = vld [vmem:[%s12907_s2 + $0x31c] ss:$12 sps:$4 sm:$0xff]  }
 0x816   : > { %9319 = vmatprep.subr.bf16.mxu1 %v12237_v48  ;;  %v12328_v38 = vld [vmem:[%s12907_s2 + $0x3f0] ss:$12 sps:$4 sm:$0xff]  }
 0x818   : > { %9279 = vmatpush1.bf16.msra.mxu0 %v12232_v50  ;;  %v12279_v50 = vld [vmem:[%s12907_s2 + $0x49c] ss:$12 sps:$4 sm:$0xff]  }
 0x819   : > { %9320 = vmatpush1.bf16.msra.mxu1 %v12235_v39  ;;  %9280 = vmatprep.subr.bf16.mxu0 %v12240_v17  ;;  %v12274_v17 = vld [vmem:[%s12907_s2 + $0x318] ss:$12 sps:$4 sm:$0xff]  }
 0x81a   : > { %9321 = vmatprep.subr.bf16.mxu1 %v12243_v37  ;;  %v12277_v37 = vld [vmem:[%s12907_s2 + $0x498] ss:$12 sps:$4 sm:$0xff]  }
 0x81c   : > { %9281 = vmatpush1.bf16.msra.mxu0 %v12238_v57  ;;  %v12282_v57 = vld [vmem:[%s12907_s2 + $0x334] ss:$12 sps:$4 sm:$0xff]  }
 0x81d   : > { %9322 = vmatpush1.bf16.msra.mxu1 %v12241_v43  ;;  %9282 = vmatprep.subr.bf16.mxu0 %v12246_v53  ;;  %v12285_v43 = vld [vmem:[%s12907_s2 + $0x4b4] ss:$12 sps:$4 sm:$0xff]   ;;  %v12280_v53 = vld [vmem:[%s12907_s2 + $0x330] ss:$12 sps:$4 sm:$0xff]  }
 0x81e   : > { %9323 = vmatprep.subr.bf16.mxu1 %v12249_v34  ;;  %v12283_v34 = vld [vmem:[%s12907_s2 + $0x4b0] ss:$12 sps:$4 sm:$0xff]  }
 0x820   : > { %9283 = vmatpush1.bf16.msra.mxu0 %v12244_v20  ;;  %v12288_v20 = vld [vmem:[%s12907_s2 + $0x34c] ss:$12 sps:$4 sm:$0xff]  }
 0x821   : > { %9324 = vmatpush1.bf16.msra.mxu1 %v12247_v54  ;;  %9284 = vmatprep.subr.bf16.mxu0 %v12252_v55  ;;  %v12291_v54 = vld [vmem:[%s12907_s2 + $0x4cc] ss:$12 sps:$4 sm:$0xff]   ;;  %v12286_v55 = vld [vmem:[%s12907_s2 + $0x348] ss:$12 sps:$4 sm:$0xff]  }
 0x822   : > { %v13938_v4 = vpop.f32.mrb[40].mxu0  ;;  %9325 = vmatprep.subr.bf16.mxu1 %v12255_v62  ;;  %v12289_v62 = vld [vmem:[%s12907_s2 + $0x4c8] ss:$12 sps:$4 sm:$0xff]  }
 0x823   : > { %v13941_v6 = vpop.f32.mrb[40].mxu1  ;;  %v6234_v10 = vpop.f32.mrb[41].mxu0 }
 0x824   : > { %v6316_v12 = vpop.f32.mrb[41].mxu1  ;;  %v6236_v13 = vpop.f32.mrb[42].mxu0  ;;  %9285 = vmatpush1.bf16.msra.mxu0 %v12250_v3  ;;  %v11567_v28 = vadd.f32 %v6234_v10, %v4333_v8  ;;  %v12294_v3 = vld [vmem:[%s12907_s2 + $0x364] ss:$12 sps:$4 sm:$0xff]  }
 0x825   : > { %v6318_v18 = vpop.f32.mrb[42].mxu1  ;;  %9326 = vmatpush1.bf16.msra.mxu1 %v12253_v40  ;;  %v6237_v19 = vpop.f32.mrb[43].mxu0  ;;  %9286 = vmatprep.subr.bf16.mxu0 %v12258_v7  ;;  %v11569_v29 = vadd.f32 %v6316_v12, %v4341_v11  ;;  %v12292_v40 = vld [vmem:[%s12907_s2 + $0x360] ss:$12 sps:$4 sm:$0xff]   ;;  %v12298_v8 = vld [vmem:[%s12907_s2 + $0x378] ss:$12 sps:$4 sm:$0xff]  }
 0x826   : > { %v6319_v23 = vpop.f32.mrb[43].mxu1  ;;  %9327 = vmatprep.subr.bf16.mxu1 %v12261_v5  ;;  %v6654_v47 = vmax.f32 %v11567_v28, 0.0  ;;  %v12295_v7 = vld [vmem:[%s12907_s2 + $0x4e0] ss:$12 sps:$4 sm:$0xff]   ;;  %v12303_v5 = vld [vmem:[%s12907_s2 + $0x4fc] ss:$12 sps:$4 sm:$0xff]  }
 0x827   : > { %v6656_v42 = vmax.f32 %v11569_v29, 0.0  ;;  %v12301_v10 = vld [vmem:[%s12907_s2 + $0x4f8] ss:$12 sps:$4 sm:$0xff]   ;;  %v12306_v11 = vld [vmem:[%s12907_s2 + $0x394] ss:$12 sps:$4 sm:$0xff]  }
 0x828   : > { %9287 = vmatpush1.bf16.msra.mxu0 %v12256_v14  ;;  %v13964_v48 = vpack.c.bf16 %v6654_v47, %v6654_v47  ;;  %v12309_v12 = vld [vmem:[%s12907_s2 + $0x514] ss:$12 sps:$4 sm:$0xff]   ;;  %v12304_v13 = vld [vmem:[%s12907_s2 + $0x390] ss:$12 sps:$4 sm:$0xff]   ;;  %v12315_v18 = vld [vmem:[%s12907_s2 + $0x52c] ss:$12 sps:$4 sm:$0xff]  }
 0x829   : > { %9328 = vmatpush1.bf16.msra.mxu1 %v12259_v59  ;;  %9288 = vmatprep.subr.bf16.mxu0 %v12264_v21  ;;  %v13968_v39 = vpack.c.bf16 %v6656_v42, %v6656_v42  ;;  %v12307_v14 = vld [vmem:[%s12907_s2 + $0x510] ss:$12 sps:$4 sm:$0xff]   ;;  %v12310_v19 = vld [vmem:[%s12907_s2 + $0x3a8] ss:$12 sps:$4 sm:$0xff]   ;;  %v12316_v23 = vld [vmem:[%s12907_s2 + $0x3c0] ss:$12 sps:$4 sm:$0xff]  }
 0x82a   : > { %9329 = vmatprep.subr.bf16.mxu1 %v12267_v25  ;;  %v12313_v59 = vld [vmem:[%s12907_s2 + $0x528] ss:$12 sps:$4 sm:$0xff]   ;;  %v12318_v21 = vld [vmem:[%s12907_s2 + $0x3c4] ss:$12 sps:$4 sm:$0xff]   ;;  %v12319_v25 = vld [vmem:[%s12907_s2 + $0x540] ss:$12 sps:$4 sm:$0xff]  }
 0x82b   : > { %v12324_v28 = vld [vmem:[%s12907_s2 + $0x3dc] ss:$12 sps:$4 sm:$0xff]   ;;  %v12336_v47 = vld [vmem:[%s12907_s2 + $0x40c] ss:$12 sps:$4 sm:$0xff]  }
 0x82c   : > { %9289 = vmatpush1.bf16.msra.mxu0 %v12262_v30  ;;  %v12327_v29 = vld [vmem:[%s12907_s2 + $0x55c] ss:$12 sps:$4 sm:$0xff]   ;;  %v12322_v30 = vld [vmem:[%s12907_s2 + $0x3d8] ss:$12 sps:$4 sm:$0xff]  }
 0x82d   : > { %9330 = vmatpush1.bf16.msra.mxu1 %v12265_v27  ;;  %9340 = vmatprep.subr.bf16.mxu0 %v12270_v35  ;;  %v12330_v27 = vld [vmem:[%s12907_s2 + $0x3f4] ss:$12 sps:$4 sm:$0xff]   ;;  %v12339_v42 = vld [vmem:[%s12907_s2 + $0x58c] ss:$12 sps:$4 sm:$0xff]  }
 0x82e   : > { %9381 = vmatprep.subr.bf16.mxu1 %v12273_v41  ;;  %v12333_v35 = vld [vmem:[%s12907_s2 + $0x574] ss:$12 sps:$4 sm:$0xff]   ;;  %v12331_v41 = vld [vmem:[%s12907_s2 + $0x570] ss:$12 sps:$4 sm:$0xff]  }
 0x82f   : > { %9291 = vmatmul.mubr.bf16.vlgmr.msra.gmra.mrb[52].mxu0 %v13958_v51 }
 0x830   : > { %9332 = vmatmul.mubr.bf16.vlgmr.msra.gmra.mrb[52].mxu1 %v13961_v60  ;;  %9341 = vmatpush1.bf16.msra.mxu0 %v12268_v44  ;;  %v12334_v44 = vld [vmem:[%s12907_s2 + $0x408] ss:$12 sps:$4 sm:$0xff]  }
 0x831   : > { %9372 = vmatprep.mubr.bf16.mxu0 %v13964_v48  ;;  %9382 = vmatpush1.bf16.msra.mxu1 %v12271_v45  ;;  %v12337_v45 = vld [vmem:[%s12907_s2 + $0x588] ss:$12 sps:$4 sm:$0xff]  }
 0x832   : > { %9413 = vmatprep.mubr.bf16.mxu1 %v13968_v39  ;;  %9342 = vmatprep.subr.bf16.mxu0 %v12276_v49  ;;  %v12342_v49 = vld [vmem:[%s12907_s2 + $0x424] ss:$12 sps:$4 sm:$0xff]  }
 0x833   : > { %9383 = vmatprep.subr.bf16.mxu1 %v12279_v50  ;;  %v12345_v50 = vld [vmem:[%s12907_s2 + $0x5a4] ss:$12 sps:$4 sm:$0xff]  }
 0x834   : > { %9343 = vmatpush1.bf16.msra.mxu0 %v12274_v17  ;;  %v12340_v17 = vld [vmem:[%s12907_s2 + $0x420] ss:$12 sps:$4 sm:$0xff]  }
 0x835   : > { %9384 = vmatpush1.bf16.msra.mxu1 %v12277_v37  ;;  %9344 = vmatprep.subr.bf16.mxu0 %v12282_v57  ;;  %v12343_v37 = vld [vmem:[%s12907_s2 + $0x5a0] ss:$12 sps:$4 sm:$0xff]   ;;  %v12348_v57 = vld [vmem:[%s12907_s2 + $0x43c] ss:$12 sps:$4 sm:$0xff]  }
 0x836   : > { %9385 = vmatprep.subr.bf16.mxu1 %v12285_v43  ;;  %v12351_v43 = vld [vmem:[%s12907_s2 + $0x5bc] ss:$12 sps:$4 sm:$0xff]  }
 0x838   : > { %9345 = vmatpush1.bf16.msra.mxu0 %v12280_v53  ;;  %v12346_v53 = vld [vmem:[%s12907_s2 + $0x438] ss:$12 sps:$4 sm:$0xff]  }
 0x839   : > { %9386 = vmatpush1.bf16.msra.mxu1 %v12283_v34  ;;  %9346 = vmatprep.subr.bf16.mxu0 %v12288_v20  ;;  %v4329_v34 = vrot.slane %v13852_v26, %v13195_v0  ;;  %v12349_v20 = vld [vmem:[%s12907_s2 + $0x5b8] ss:$12 sps:$4 sm:$0xff]  }
 0x83a   : > { %9387 = vmatprep.subr.bf16.mxu1 %v12291_v54  ;;  %v12354_v54 = vld [vmem:[%s12907_s2 + $0x454] ss:$12 sps:$4 sm:$0xff]  }
 0x83c   : > { %9347 = vmatpush1.bf16.msra.mxu0 %v12286_v55  ;;  %v4337_v55 = vrot.slane %v13852_v26, %v13230_v33  ;;  %v12358_v26 = vld [vmem:[%s12907_s2 + $0x468] ss:$12 sps:$4 sm:$0xff]  }
 0x83d   : > { %9388 = vmatpush1.bf16.msra.mxu1 %v12289_v62  ;;  %9348 = vmatprep.subr.bf16.mxu0 %v12294_v3  ;;  %v12357_v62 = vld [vmem:[%s12907_s2 + $0x5d4] ss:$12 sps:$4 sm:$0xff]   ;;  %v12352_v3 = vld [vmem:[%s12907_s2 + $0x450] ss:$12 sps:$4 sm:$0xff]  }
 0x83e   : > { %9389 = vmatprep.subr.bf16.mxu1 %v12297_v24  ;;  %v11566_v24 = vadd.f32 %v13938_v4, %v4329_v34  ;;  %v12361_v4 = vld [vmem:[%s12907_s2 + $0x5e8] ss:$12 sps:$4 sm:$0xff]  }
 0x840   : > { %9349 = vmatpush1.bf16.msra.mxu0 %v12292_v40  ;;  %v12355_v40 = vld [vmem:[%s12907_s2 + $0x5d0] ss:$12 sps:$4 sm:$0xff]  }
 0x841   : > { %9390 = vmatpush1.bf16.msra.mxu1 %v12295_v7  ;;  %9350 = vmatprep.subr.bf16.mxu0 %v12300_v56  ;;  %v12360_v7 = vld [vmem:[%s12907_s2 + $0x46c] ss:$12 sps:$4 sm:$0xff]   ;;  %v11568_v56 = vadd.f32 %v13941_v6, %v4337_v55  ;;  %v12393_v55 = vld [vmem:[%s12907_s2 + $0x7e4] ss:$12 sps:$4 sm:$0xff]  }
 0x842   : > { %9391 = vmatprep.subr.bf16.mxu1 %v12303_v5  ;;  %v12363_v5 = vld [vmem:[%s12907_s2 + $0x5ec] ss:$12 sps:$4 sm:$0xff]  }
 0x844   : > { %9351 = vmatpush1.bf16.msra.mxu0 %v12298_v8  ;;  %v6653_v8 = vmax.f32 %v11566_v24, 0.0  ;;  %v12396_v24 = vld [vmem:[%s12907_s2 + $0x67c] ss:$12 sps:$4 sm:$0xff]  }
 0x845   : > { %9392 = vmatpush1.bf16.msra.mxu1 %v12301_v10  ;;  %9352 = vmatprep.subr.bf16.mxu0 %v12306_v11  ;;  %v12366_v10 = vld [vmem:[%s12907_s2 + $0x604] ss:$12 sps:$4 sm:$0xff]   ;;  %v6655_v11 = vmax.f32 %v11568_v56, 0.0 }
 0x846   : > { %9393 = vmatprep.subr.bf16.mxu1 %v12309_v12  ;;  %v12369_v12 = vld [vmem:[%s12907_s2 + $0x784] ss:$12 sps:$4 sm:$0xff]   ;;  %v14040_v6 = vpack.c.bf16 %v6653_v8, %v6653_v8 }
 0x847   : > { %v12397_v56 = vld [vmem:[%s12907_s2 + $0x7f8] ss:$12 sps:$4 sm:$0xff]   ;;  %v12400_v8 = vld [vmem:[%s12907_s2 + $0x690] ss:$12 sps:$4 sm:$0xff]  }
 0x848   : > { %9353 = vmatpush1.bf16.msra.mxu0 %v12304_v13  ;;  %v12364_v13 = vld [vmem:[%s12907_s2 + $0x600] ss:$12 sps:$4 sm:$0xff]  }
 0x849   : > { %9394 = vmatpush1.bf16.msra.mxu1 %v12307_v14  ;;  %9354 = vmatprep.subr.bf16.mxu0 %v12312_v16  ;;  %v12367_v14 = vld [vmem:[%s12907_s2 + $0x780] ss:$12 sps:$4 sm:$0xff]  }
 0x84a   : > { %9395 = vmatprep.subr.bf16.mxu1 %v12315_v18  ;;  %v14044_v16 = vld [vmem:[%s12894_s19 + $0x8] sm:$0xff] }
 0x84b   : > { %v12372_v18 = vld [vmem:[%s12907_s2 + $0x61c] ss:$12 sps:$4 sm:$0xff]  }
 0x84c   : > { %9355 = vmatpush1.bf16.msra.mxu0 %v12310_v19  ;;  %v14047_v19 = vpack.c.bf16 %v6655_v11, %v6655_v11  ;;  %v12411_v11 = vld [vmem:[%s12907_s2 + $0x82c] ss:$12 sps:$4 sm:$0xff]  }
 0x84d   : > { %9396 = vmatpush1.bf16.msra.mxu1 %v12313_v59  ;;  %9356 = vmatprep.subr.bf16.mxu0 %v12318_v21  ;;  %v12375_v59 = vld [vmem:[%s12907_s2 + $0x79c] ss:$12 sps:$4 sm:$0xff]   ;;  %v4349_v21 = vrot.slane %v14044_v16, %v13226_v32 }
 0x84e   : > { %9397 = vmatprep.subr.bf16.mxu1 %v12321_v22  ;;  %v12370_v22 = vld [vmem:[%s12907_s2 + $0x618] ss:$12 sps:$4 sm:$0xff]  }
 0x850   : > { %9357 = vmatpush1.bf16.msra.mxu0 %v12316_v23  ;;  %v4357_v23 = vrot.slane %v14044_v16, %v13250_v52 }
 0x851   : > { %9398 = vmatpush1.bf16.msra.mxu1 %v12319_v25  ;;  %9358 = vmatprep.subr.bf16.mxu0 %v12324_v28  ;;  %v12373_v25 = vld [vmem:[%s12907_s2 + $0x798] ss:$12 sps:$4 sm:$0xff]   ;;  %v12378_v28 = vld [vmem:[%s12907_s2 + $0x634] ss:$12 sps:$4 sm:$0xff]  }
 0x852   : > { %9399 = vmatprep.subr.bf16.mxu1 %v12327_v29 }
 0x854   : > { %9359 = vmatpush1.bf16.msra.mxu0 %v12322_v30  ;;  %v12381_v30 = vld [vmem:[%s12907_s2 + $0x7b4] ss:$12 sps:$4 sm:$0xff]  }
 0x855   : > { %9400 = vmatpush1.bf16.msra.mxu1 %v12325_v31  ;;  %9360 = vmatprep.subr.bf16.mxu0 %v12330_v27 }
 0x856   : > { %9401 = vmatprep.subr.bf16.mxu1 %v12333_v35 }
 0x858   : > { %9361 = vmatpush1.bf16.msra.mxu0 %v12328_v38 }
 0x859   : > { %9402 = vmatpush1.bf16.msra.mxu1 %v12331_v41  ;;  %9362 = vmatprep.subr.bf16.mxu0 %v12336_v47  ;;  %v12376_v47 = vld [vmem:[%s12907_s2 + $0x630] ss:$12 sps:$4 sm:$0xff]  }
 0x85a   : > { %9403 = vmatprep.subr.bf16.mxu1 %v12339_v42 }
 0x85c   : > { %9363 = vmatpush1.bf16.msra.mxu0 %v12334_v44 }
 0x85d   : > { %9404 = vmatpush1.bf16.msra.mxu1 %v12337_v45  ;;  %9364 = vmatprep.subr.bf16.mxu0 %v12342_v49  ;;  %v12379_v45 = vld [vmem:[%s12907_s2 + $0x7b0] ss:$12 sps:$4 sm:$0xff]   ;;  %v12384_v49 = vld [vmem:[%s12907_s2 + $0x64c] ss:$12 sps:$4 sm:$0xff]  }
 0x85e   : > { %9405 = vmatprep.subr.bf16.mxu1 %v12345_v50 }
 0x860   : > { %9365 = vmatpush1.bf16.msra.mxu0 %v12340_v17 }
 0x861   : > { %9406 = vmatpush1.bf16.msra.mxu1 %v12343_v37  ;;  %9366 = vmatprep.subr.bf16.mxu0 %v12348_v57  ;;  %v12387_v37 = vld [vmem:[%s12907_s2 + $0x7cc] ss:$12 sps:$4 sm:$0xff]  }
 0x862   : > { %9407 = vmatprep.subr.bf16.mxu1 %v12351_v43 }
 0x864   : > { %9367 = vmatpush1.bf16.msra.mxu0 %v12346_v53  ;;  %v12382_v53 = vld [vmem:[%s12907_s2 + $0x648] ss:$12 sps:$4 sm:$0xff]  }
 0x865   : > { %9408 = vmatpush1.bf16.msra.mxu1 %v12349_v20  ;;  %9368 = vmatprep.subr.bf16.mxu0 %v12354_v54  ;;  %v12385_v20 = vld [vmem:[%s12907_s2 + $0x7c8] ss:$12 sps:$4 sm:$0xff]   ;;  %v12390_v54 = vld [vmem:[%s12907_s2 + $0x664] ss:$12 sps:$4 sm:$0xff]  }
 0x866   : > { %9409 = vmatprep.subr.bf16.mxu1 %v12357_v62  ;;  %v12388_v62 = vld [vmem:[%s12907_s2 + $0x660] ss:$12 sps:$4 sm:$0xff]  }
 0x868   : > { %9369 = vmatpush1.bf16.msra.mxu0 %v12352_v3  ;;  %v12391_v3 = vld [vmem:[%s12907_s2 + $0x7e0] ss:$12 sps:$4 sm:$0xff]  }
 0x869   : > { %9410 = vmatpush1.bf16.msra.mxu1 %v12355_v40  ;;  %9370 = vmatprep.subr.bf16.mxu0 %v12360_v7  ;;  %v12399_v40 = vld [vmem:[%s12907_s2 + $0x7fc] ss:$12 sps:$4 sm:$0xff]   ;;  %v12394_v7 = vld [vmem:[%s12907_s2 + $0x678] ss:$12 sps:$4 sm:$0xff]  }
 0x86a   : > { %9411 = vmatprep.subr.bf16.mxu1 %v12363_v5  ;;  %v12402_v5 = vld [vmem:[%s12907_s2 + $0x694] ss:$12 sps:$4 sm:$0xff]  }
 0x86c   : > { %9371 = vmatpush1.bf16.msra.mxu0 %v12358_v26  ;;  %v12405_v26 = vld [vmem:[%s12907_s2 + $0x814] ss:$12 sps:$4 sm:$0xff]  }
 0x86d   : > { %9412 = vmatpush1.bf16.msra.mxu1 %v12361_v4  ;;  %9422 = vmatprep.subr.bf16.mxu0 %v12366_v10  ;;  %v12403_v4 = vld [vmem:[%s12907_s2 + $0x810] ss:$12 sps:$4 sm:$0xff]   ;;  %v12408_v10 = vld [vmem:[%s12907_s2 + $0x6ac] ss:$12 sps:$4 sm:$0xff]  }
 0x86e   : > { %9463 = vmatprep.subr.bf16.mxu1 %v12369_v12  ;;  %v12406_v12 = vld [vmem:[%s12907_s2 + $0x6a8] ss:$12 sps:$4 sm:$0xff]  }
 0x86f   : > { %9373 = vmatmul.mubr.bf16.vlgmr.msra.gmra.mrb[56].mxu0 %v14040_v6 }
 0x870   : > { %9414 = vmatmul.mubr.bf16.vlgmr.msra.gmra.mrb[56].mxu1 %v14047_v19  ;;  %9423 = vmatpush1.bf16.msra.mxu0 %v12364_v13  ;;  %v12409_v13 = vld [vmem:[%s12907_s2 + $0x828] ss:$12 sps:$4 sm:$0xff]  }
 0x871   : > { %9464 = vmatpush1.bf16.msra.mxu1 %v12367_v14  ;;  %9424 = vmatprep.subr.bf16.mxu0 %v12372_v18  ;;  %v12414_v14 = vld [vmem:[%s12907_s2 + $0x6c4] ss:$12 sps:$4 sm:$0xff]  }
 0x872   : > { %v14059_v29 = vpop.f32.mrb[44].mxu0  ;;  %9465 = vmatprep.subr.bf16.mxu1 %v12375_v59  ;;  %v12417_v18 = vld [vmem:[%s12907_s2 + $0x844] ss:$12 sps:$4 sm:$0xff]   ;;  %v12412_v59 = vld [vmem:[%s12907_s2 + $0x6c0] ss:$12 sps:$4 sm:$0xff]  }
 0x873   : > { %v14062_v31 = vpop.f32.mrb[44].mxu1  ;;  %v6398_v27 = vpop.f32.mrb[45].mxu0 }
 0x874   : > { %v11571_v35 = vadd.f32 %v6398_v27, %v4349_v21  ;;  %v6480_v38 = vpop.f32.mrb[45].mxu1  ;;  %v6400_v41 = vpop.f32.mrb[46].mxu0  ;;  %9425 = vmatpush1.bf16.msra.mxu0 %v12370_v22  ;;  %v12415_v21 = vld [vmem:[%s12907_s2 + $0x840] ss:$12 sps:$4 sm:$0xff]   ;;  %v12420_v22 = vld [vmem:[%s12907_s2 + $0x6dc] ss:$12 sps:$4 sm:$0xff]  }
 0x875   : > { %v11573_v52 = vadd.f32 %v6480_v38, %v4357_v23  ;;  %v6482_v42 = vpop.f32.mrb[46].mxu1  ;;  %9466 = vmatpush1.bf16.msra.mxu1 %v12373_v25  ;;  %v6401_v44 = vpop.f32.mrb[47].mxu0  ;;  %9426 = vmatprep.subr.bf16.mxu0 %v12378_v28  ;;  %v12423_v23 = vld [vmem:[%s12907_s2 + $0x85c] ss:$12 sps:$4 sm:$0xff]   ;;  %v12418_v25 = vld [vmem:[%s12907_s2 + $0x6d8] ss:$12 sps:$4 sm:$0xff]  }
 0x876   : > { %v6658_v50 = vmax.f32 %v11571_v35, 0.0  ;;  %v6483_v17 = vpop.f32.mrb[47].mxu1  ;;  %9467 = vmatprep.subr.bf16.mxu1 %v12381_v30  ;;  %v12421_v28 = vld [vmem:[%s12907_s2 + $0x858] ss:$12 sps:$4 sm:$0xff]   ;;  %v12426_v30 = vld [vmem:[%s12907_s2 + $0x6f4] ss:$12 sps:$4 sm:$0xff]  }
 0x877   : > { %v6660_v57 = vmax.f32 %v11573_v52, 0.0  ;;  %v12429_v27 = vld [vmem:[%s12907_s2 + $0x874] ss:$12 sps:$4 sm:$0xff]   ;;  %v12424_v35 = vld [vmem:[%s12907_s2 + $0x6f0] ss:$12 sps:$4 sm:$0xff]  }
 0x878   : > { %v14068_v43 = vpack.c.bf16 %v6658_v50, %v6658_v50  ;;  %9427 = vmatpush1.bf16.msra.mxu0 %v12376_v47  ;;  %v12427_v38 = vld [vmem:[%s12907_s2 + $0x870] ss:$12 sps:$4 sm:$0xff]   ;;  %v12432_v41 = vld [vmem:[%s12907_s2 + $0x70c] ss:$12 sps:$4 sm:$0xff]   ;;  %v12430_v52 = vld [vmem:[%s12907_s2 + $0x708] ss:$12 sps:$4 sm:$0xff]  }
 0x879   : > { %v14071_v34 = vpack.c.bf16 %v6660_v57, %v6660_v57  ;;  %9468 = vmatpush1.bf16.msra.mxu1 %v12379_v45  ;;  %9428 = vmatprep.subr.bf16.mxu0 %v12384_v49  ;;  %v12435_v47 = vld [vmem:[%s12907_s2 + $0x88c] ss:$12 sps:$4 sm:$0xff]   ;;  %v12433_v42 = vld [vmem:[%s12907_s2 + $0x888] ss:$12 sps:$4 sm:$0xff]   ;;  %v12438_v44 = vld [vmem:[%s12907_s2 + $0x724] ss:$12 sps:$4 sm:$0xff]  }
 0x87a   : > { %9454 = vmatprep.mubr.bf16.mxu0 %v14068_v43  ;;  %9469 = vmatprep.subr.bf16.mxu1 %v12387_v37  ;;  %v12441_v45 = vld [vmem:[%s12907_s2 + $0x8a4] ss:$12 sps:$4 sm:$0xff]   ;;  %v12436_v49 = vld [vmem:[%s12907_s2 + $0x720] ss:$12 sps:$4 sm:$0xff]   ;;  %v12444_v17 = vld [vmem:[%s12907_s2 + $0x73c] ss:$12 sps:$4 sm:$0xff]  }
 0x87b   : > { %9495 = vmatprep.mubr.bf16.mxu1 %v14071_v34  ;;  %v12439_v50 = vld [vmem:[%s12907_s2 + $0x8a0] ss:$12 sps:$4 sm:$0xff]   ;;  %v12447_v37 = vld [vmem:[%s12907_s2 + $0x8bc] ss:$12 sps:$4 sm:$0xff]   ;;  %v12442_v57 = vld [vmem:[%s12907_s2 + $0x738] ss:$12 sps:$4 sm:$0xff]  }
 0x87c   : > { %9429 = vmatpush1.bf16.msra.mxu0 %v12382_v53  ;;  %v4345_v53 = vrot.slane %v14044_v16, %v13192_v63 }
 0x87d   : > { %9470 = vmatpush1.bf16.msra.mxu1 %v12385_v20  ;;  %9430 = vmatprep.subr.bf16.mxu0 %v12390_v54  ;;  %v12445_v20 = vld [vmem:[%s12907_s2 + $0x8b8] ss:$12 sps:$4 sm:$0xff]   ;;  %v12450_v54 = vld [vmem:[%s12907_s2 + $0x754] ss:$12 sps:$4 sm:$0xff]  }
 0x87e   : > { %9471 = vmatprep.subr.bf16.mxu1 %v12393_v55  ;;  %v4353_v55 = vrot.slane %v14044_v16, %v13237_v36 }
 0x880   : > { %9431 = vmatpush1.bf16.msra.mxu0 %v12388_v62  ;;  %v12453_v62 = vld [vmem:[%s12907_s2 + $0x8d4] ss:$12 sps:$4 sm:$0xff]  }
 0x881   : > { %9472 = vmatpush1.bf16.msra.mxu1 %v12391_v3  ;;  %9432 = vmatprep.subr.bf16.mxu0 %v12396_v24  ;;  %v12448_v3 = vld [vmem:[%s12907_s2 + $0x750] ss:$12 sps:$4 sm:$0xff]   ;;  %v11570_v24 = vadd.f32 %v14059_v29, %v4345_v53  ;;  %v12498_v53 = vld [vmem:[%s12907_s2 + $0x994] ss:$12 sps:$4 sm:$0xff]  }
 0x882   : > { %9473 = vmatprep.subr.bf16.mxu1 %v12399_v40  ;;  %v12451_v40 = vld [vmem:[%s12907_s2 + $0x8d0] ss:$12 sps:$4 sm:$0xff]  }
 0x883   : > { %v12462_v29 = vld [vmem:[%s12907_s2 + $0x904] ss:$12 sps:$4 sm:$0xff]  }
 0x884   : > { %9433 = vmatpush1.bf16.msra.mxu0 %v12394_v7  ;;  %v12456_v7 = vld [vmem:[%s12907_s2 + $0x76c] ss:$12 sps:$4 sm:$0xff]  }
 0x885   : > { %9474 = vmatpush1.bf16.msra.mxu1 %v12397_v56  ;;  %9434 = vmatprep.subr.bf16.mxu0 %v12402_v5  ;;  %v11572_v56 = vadd.f32 %v14062_v31, %v4353_v55  ;;  %v12459_v5 = vld [vmem:[%s12907_s2 + $0x8ec] ss:$12 sps:$4 sm:$0xff]  }
 0x886   : > { %9475 = vmatprep.subr.bf16.mxu1 %v12405_v26  ;;  %v12454_v26 = vld [vmem:[%s12907_s2 + $0x768] ss:$12 sps:$4 sm:$0xff]  }
 0x888   : > { %9435 = vmatpush1.bf16.msra.mxu0 %v12400_v8  ;;  %v6657_v8 = vmax.f32 %v11570_v24, 0.0 }
 0x889   : > { %9476 = vmatpush1.bf16.msra.mxu1 %v12403_v4  ;;  %9436 = vmatprep.subr.bf16.mxu0 %v12408_v10  ;;  %v12457_v4 = vld [vmem:[%s12907_s2 + $0x8e8] ss:$12 sps:$4 sm:$0xff]   ;;  %v6659_v10 = vmax.f32 %v11572_v56, 0.0 }
 0x88a   : > { %9477 = vmatprep.subr.bf16.mxu1 %v12411_v11  ;;  %v12465_v11 = vld [vmem:[%s12907_s2 + $0xa84] ss:$12 sps:$4 sm:$0xff]   ;;  %v14133_v31 = vpack.c.bf16 %v6657_v8, %v6657_v8 }
 0x88c   : > { %9437 = vmatpush1.bf16.msra.mxu0 %v12406_v12  ;;  %v12460_v12 = vld [vmem:[%s12907_s2 + $0x900] ss:$12 sps:$4 sm:$0xff]  }
 0x88d   : > { %9478 = vmatpush1.bf16.msra.mxu1 %v12409_v13  ;;  %9438 = vmatprep.subr.bf16.mxu0 %v12414_v14  ;;  %v12463_v13 = vld [vmem:[%s12907_s2 + $0xa80] ss:$12 sps:$4 sm:$0xff]   ;;  %v12468_v14 = vld [vmem:[%s12907_s2 + $0x91c] ss:$12 sps:$4 sm:$0xff]  }
 0x88e   : > { %9479 = vmatprep.subr.bf16.mxu1 %v12417_v18  ;;  %v14137_v18 = vpack.c.bf16 %v6659_v10, %v6659_v10 }
 0x890   : > { %9439 = vmatpush1.bf16.msra.mxu0 %v12412_v59  ;;  %v12471_v59 = vld [vmem:[%s12907_s2 + $0xa9c] ss:$12 sps:$4 sm:$0xff]  }
 0x891   : > { %9480 = vmatpush1.bf16.msra.mxu1 %v12415_v21  ;;  %9440 = vmatprep.subr.bf16.mxu0 %v12420_v22  ;;  %v12466_v21 = vld [vmem:[%s12907_s2 + $0x918] ss:$12 sps:$4 sm:$0xff]  }
 0x892   : > { %9481 = vmatprep.subr.bf16.mxu1 %v12423_v23  ;;  %v12469_v22 = vld [vmem:[%s12907_s2 + $0xa98] ss:$12 sps:$4 sm:$0xff]   ;;  %v12474_v23 = vld [vmem:[%s12907_s2 + $0x934] ss:$12 sps:$4 sm:$0xff]  }
 0x894   : > { %9441 = vmatpush1.bf16.msra.mxu0 %v12418_v25  ;;  %v12477_v25 = vld [vmem:[%s12907_s2 + $0xab4] ss:$12 sps:$4 sm:$0xff]  }
 0x895   : > { %9482 = vmatpush1.bf16.msra.mxu1 %v12421_v28  ;;  %9442 = vmatprep.subr.bf16.mxu0 %v12426_v30  ;;  %v12472_v28 = vld [vmem:[%s12907_s2 + $0x930] ss:$12 sps:$4 sm:$0xff]  }
 0x896   : > { %9483 = vmatprep.subr.bf16.mxu1 %v12429_v27  ;;  %v12475_v30 = vld [vmem:[%s12907_s2 + $0xab0] ss:$12 sps:$4 sm:$0xff]   ;;  %v12480_v27 = vld [vmem:[%s12907_s2 + $0x94c] ss:$12 sps:$4 sm:$0xff]  }
 0x898   : > { %9443 = vmatpush1.bf16.msra.mxu0 %v12424_v35  ;;  %v12483_v35 = vld [vmem:[%s12907_s2 + $0xacc] ss:$12 sps:$4 sm:$0xff]  }
 0x899   : > { %9484 = vmatpush1.bf16.msra.mxu1 %v12427_v38  ;;  %9444 = vmatprep.subr.bf16.mxu0 %v12432_v41  ;;  %v12478_v38 = vld [vmem:[%s12907_s2 + $0x948] ss:$12 sps:$4 sm:$0xff]  }
 0x89a   : > { %9485 = vmatprep.subr.bf16.mxu1 %v12435_v47  ;;  %v12481_v41 = vld [vmem:[%s12907_s2 + $0xac8] ss:$12 sps:$4 sm:$0xff]   ;;  %v12486_v47 = vld [vmem:[%s12907_s2 + $0x964] ss:$12 sps:$4 sm:$0xff]  }
 0x89c   : > { %9445 = vmatpush1.bf16.msra.mxu0 %v12430_v52  ;;  %v12489_v52 = vld [vmem:[%s12907_s2 + $0xae4] ss:$12 sps:$4 sm:$0xff]  }
 0x89d   : > { %9486 = vmatpush1.bf16.msra.mxu1 %v12433_v42  ;;  %9446 = vmatprep.subr.bf16.mxu0 %v12438_v44  ;;  %v12484_v42 = vld [vmem:[%s12907_s2 + $0x960] ss:$12 sps:$4 sm:$0xff]  }
 0x89e   : > { %9487 = vmatprep.subr.bf16.mxu1 %v12441_v45  ;;  %v12487_v44 = vld [vmem:[%s12907_s2 + $0xae0] ss:$12 sps:$4 sm:$0xff]   ;;  %v12492_v45 = vld [vmem:[%s12907_s2 + $0x97c] ss:$12 sps:$4 sm:$0xff]  }
 0x8a0   : > { %9447 = vmatpush1.bf16.msra.mxu0 %v12436_v49  ;;  %v12495_v49 = vld [vmem:[%s12907_s2 + $0xafc] ss:$12 sps:$4 sm:$0xff]  }
 0x8a1   : > { %9488 = vmatpush1.bf16.msra.mxu1 %v12439_v50  ;;  %9448 = vmatprep.subr.bf16.mxu0 %v12444_v17  ;;  %v4365_v50 = vrot.slane %v14044_v16, %v13198_v1  ;;  %v12490_v17 = vld [vmem:[%s12907_s2 + $0x978] ss:$12 sps:$4 sm:$0xff]  }
 0x8a2   : > { %9489 = vmatprep.subr.bf16.mxu1 %v12447_v37  ;;  %v4373_v37 = vrot.slane %v14044_v16, %v13242_v46 }
 0x8a4   : > { %9449 = vmatpush1.bf16.msra.mxu0 %v12442_v57  ;;  %v12493_v57 = vld [vmem:[%s12907_s2 + $0xaf8] ss:$12 sps:$4 sm:$0xff]  }
 0x8a5   : > { %9490 = vmatpush1.bf16.msra.mxu1 %v12445_v20  ;;  %9450 = vmatprep.subr.bf16.mxu0 %v12450_v54  ;;  %v12501_v54 = vld [vmem:[%s12907_s2 + $0xb14] ss:$12 sps:$4 sm:$0xff]  }
 0x8a6   : > { %9491 = vmatprep.subr.bf16.mxu1 %v12453_v62 }
 0x8a8   : > { %9451 = vmatpush1.bf16.msra.mxu0 %v12448_v3 }
 0x8a9   : > { %9492 = vmatpush1.bf16.msra.mxu1 %v12451_v40  ;;  %9452 = vmatprep.subr.bf16.mxu0 %v12456_v7  ;;  %v12496_v40 = vld [vmem:[%s12907_s2 + $0x990] ss:$12 sps:$4 sm:$0xff]  }
 0x8aa   : > { %9493 = vmatprep.subr.bf16.mxu1 %v12459_v5  ;;  %v12499_v5 = vld [vmem:[%s12907_s2 + $0xb10] ss:$12 sps:$4 sm:$0xff]  }
 0x8ac   : > { %9453 = vmatpush1.bf16.msra.mxu0 %v12454_v26  ;;  %v12504_v26 = vld [vmem:[%s12907_s2 + $0x9ac] ss:$12 sps:$4 sm:$0xff]  }
 0x8ad   : > { %9494 = vmatpush1.bf16.msra.mxu1 %v12457_v4  ;;  %9504 = vmatprep.subr.bf16.mxu0 %v12462_v29  ;;  %v12507_v29 = vld [vmem:[%s12907_s2 + $0xb2c] ss:$12 sps:$4 sm:$0xff]  }
 0x8ae   : > { %9545 = vmatprep.subr.bf16.mxu1 %v12465_v11 }
 0x8af   : > { %9455 = vmatmul.mubr.bf16.vlgmr.msra.gmra.mrb[60].mxu0 %v14133_v31 }
 0x8b0   : > { %9496 = vmatmul.mubr.bf16.vlgmr.msra.gmra.mrb[60].mxu1 %v14137_v18  ;;  %9505 = vmatpush1.bf16.msra.mxu0 %v12460_v12  ;;  %v12502_v12 = vld [vmem:[%s12907_s2 + $0x9a8] ss:$12 sps:$4 sm:$0xff]  }
 0x8b1   : > { %9546 = vmatpush1.bf16.msra.mxu1 %v12463_v13  ;;  %9506 = vmatprep.subr.bf16.mxu0 %v12468_v14  ;;  %v12505_v14 = vld [vmem:[%s12907_s2 + $0xb28] ss:$12 sps:$4 sm:$0xff]  }
 0x8b2   : > { %9547 = vmatprep.subr.bf16.mxu1 %v12471_v59  ;;  %v12510_v59 = vld [vmem:[%s12907_s2 + $0x9c4] ss:$12 sps:$4 sm:$0xff]  }
 0x8b4   : > { %9507 = vmatpush1.bf16.msra.mxu0 %v12466_v21  ;;  %v12513_v21 = vld [vmem:[%s12907_s2 + $0xb44] ss:$12 sps:$4 sm:$0xff]  }
 0x8b5   : > { %9548 = vmatpush1.bf16.msra.mxu1 %v12469_v22  ;;  %9508 = vmatprep.subr.bf16.mxu0 %v12474_v23  ;;  %v12508_v22 = vld [vmem:[%s12907_s2 + $0x9c0] ss:$12 sps:$4 sm:$0xff]  }
 0x8b6   : > { %9549 = vmatprep.subr.bf16.mxu1 %v12477_v25  ;;  %v12511_v23 = vld [vmem:[%s12907_s2 + $0xb40] ss:$12 sps:$4 sm:$0xff]   ;;  %v12516_v25 = vld [vmem:[%s12907_s2 + $0x9dc] ss:$12 sps:$4 sm:$0xff]  }
 0x8b8   : > { %9509 = vmatpush1.bf16.msra.mxu0 %v12472_v28  ;;  %v12519_v28 = vld [vmem:[%s12907_s2 + $0xb5c] ss:$12 sps:$4 sm:$0xff]  }
 0x8b9   : > { %9550 = vmatpush1.bf16.msra.mxu1 %v12475_v30  ;;  %9510 = vmatprep.subr.bf16.mxu0 %v12480_v27  ;;  %v12514_v30 = vld [vmem:[%s12907_s2 + $0x9d8] ss:$12 sps:$4 sm:$0xff]  }
 0x8ba   : > { %9551 = vmatprep.subr.bf16.mxu1 %v12483_v35  ;;  %v12517_v27 = vld [vmem:[%s12907_s2 + $0xb58] ss:$12 sps:$4 sm:$0xff]   ;;  %v12522_v35 = vld [vmem:[%s12907_s2 + $0x9f4] ss:$12 sps:$4 sm:$0xff]  }
 0x8bc   : > { %9511 = vmatpush1.bf16.msra.mxu0 %v12478_v38  ;;  %v12525_v38 = vld [vmem:[%s12907_s2 + $0xb74] ss:$12 sps:$4 sm:$0xff]  }
 0x8bd   : > { %9552 = vmatpush1.bf16.msra.mxu1 %v12481_v41  ;;  %9512 = vmatprep.subr.bf16.mxu0 %v12486_v47  ;;  %v12520_v41 = vld [vmem:[%s12907_s2 + $0x9f0] ss:$12 sps:$4 sm:$0xff]  }
 0x8be   : > { %9553 = vmatprep.subr.bf16.mxu1 %v12489_v52  ;;  %v12523_v47 = vld [vmem:[%s12907_s2 + $0xb70] ss:$12 sps:$4 sm:$0xff]   ;;  %v12528_v52 = vld [vmem:[%s12907_s2 + $0xa0c] ss:$12 sps:$4 sm:$0xff]  }
 0x8c0   : > { %9513 = vmatpush1.bf16.msra.mxu0 %v12484_v42  ;;  %v12531_v42 = vld [vmem:[%s12907_s2 + $0xb8c] ss:$12 sps:$4 sm:$0xff]  }
 0x8c1   : > { %9554 = vmatpush1.bf16.msra.mxu1 %v12487_v44  ;;  %9514 = vmatprep.subr.bf16.mxu0 %v12492_v45  ;;  %v12526_v44 = vld [vmem:[%s12907_s2 + $0xa08] ss:$12 sps:$4 sm:$0xff]  }
 0x8c2   : > { %v14165_v20 = vpop.f32.mrb[48].mxu0  ;;  %9555 = vmatprep.subr.bf16.mxu1 %v12495_v49  ;;  %v12529_v45 = vld [vmem:[%s12907_s2 + $0xb88] ss:$12 sps:$4 sm:$0xff]   ;;  %v12534_v49 = vld [vmem:[%s12907_s2 + $0xa24] ss:$12 sps:$4 sm:$0xff]  }
 0x8c3   : > { %v14168_v55 = vpop.f32.mrb[48].mxu1  ;;  %v6562_v62 = vpop.f32.mrb[49].mxu0 }
 0x8c4   : > { %v11575_v1 = vadd.f32 %v6562_v62, %v4365_v50  ;;  %v6644_v3 = vpop.f32.mrb[49].mxu1  ;;  %v6564_v24 = vpop.f32.mrb[50].mxu0  ;;  %9515 = vmatpush1.bf16.msra.mxu0 %v12490_v17  ;;  %v12537_v50 = vld [vmem:[%s12907_s2 + $0xba4] ss:$12 sps:$4 sm:$0xff]   ;;  %v12532_v17 = vld [vmem:[%s12907_s2 + $0xa20] ss:$12 sps:$4 sm:$0xff]   ;;  %v4361_v62 = vrot.slane %v14044_v16, %v13195_v0 }
 0x8c5   : > { %v11577_v46 = vadd.f32 %v6644_v3, %v4373_v37  ;;  %v6646_v7 = vpop.f32.mrb[50].mxu1  ;;  %9556 = vmatpush1.bf16.msra.mxu1 %v12493_v57  ;;  %v6565_v56 = vpop.f32.mrb[51].mxu0  ;;  %9516 = vmatprep.subr.bf16.mxu0 %v12498_v53  ;;  %v12535_v37 = vld [vmem:[%s12907_s2 + $0xba0] ss:$12 sps:$4 sm:$0xff]   ;;  %v12540_v57 = vld [vmem:[%s12907_s2 + $0xa3c] ss:$12 sps:$4 sm:$0xff]   ;;  %v4369_v24 = vrot.slane %v14044_v16, %v13230_v33 }
 0x8c6   : > { %v6662_v8 = vmax.f32 %v11575_v1, 0.0  ;;  %v6647_v4 = vpop.f32.mrb[51].mxu1  ;;  %9557 = vmatprep.subr.bf16.mxu1 %v12501_v54  ;;  %v12543_v53 = vld [vmem:[%s12907_s2 + $0xbbc] ss:$12 sps:$4 sm:$0xff]   ;;  %v12538_v54 = vld [vmem:[%s12907_s2 + $0xa38] ss:$12 sps:$4 sm:$0xff]   ;;  %v11574_v7 = vadd.f32 %v14165_v20, %v4361_v62 }
 0x8c7   : > { %v6664_v10 = vmax.f32 %v11577_v46, 0.0  ;;  %v12541_v1 = vld [vmem:[%s12907_s2 + $0xbb8] ss:$12 sps:$4 sm:$0xff]   ;;  %v12546_v3 = vld [vmem:[%s12907_s2 + $0xa54] ss:$12 sps:$4 sm:$0xff]  }
 0x8c8   : > { %v14174_v11 = vpack.c.bf16 %v6662_v8, %v6662_v8  ;;  %9517 = vmatpush1.bf16.msra.mxu0 %v12496_v40  ;;  %v12549_v40 = vld [vmem:[%s12907_s2 + $0xbd4] ss:$12 sps:$4 sm:$0xff]   ;;  %v12544_v46 = vld [vmem:[%s12907_s2 + $0xa50] ss:$12 sps:$4 sm:$0xff]   ;;  %v12552_v56 = vld [vmem:[%s12907_s2 + $0xa6c] ss:$12 sps:$4 sm:$0xff]  }
 0x8c9   : > { %v14177_v13 = vpack.c.bf16 %v6664_v10, %v6664_v10  ;;  %9558 = vmatpush1.bf16.msra.mxu1 %v12499_v5  ;;  %9518 = vmatprep.subr.bf16.mxu0 %v12504_v26  ;;  %v12547_v0 = vld [vmem:[%s12907_s2 + $0xbd0] ss:$12 sps:$4 sm:$0xff]   ;;  %v11576_v5 = vadd.f32 %v14168_v55, %v4369_v24  ;;  %v12555_v26 = vld [vmem:[%s12907_s2 + $0xbec] ss:$12 sps:$4 sm:$0xff]   ;;  %v12550_v33 = vld [vmem:[%s12907_s2 + $0xa68] ss:$12 sps:$4 sm:$0xff]  }
 0x8ca   : > { %9536 = vmatprep.mubr.bf16.mxu0 %v14174_v11  ;;  %9559 = vmatprep.subr.bf16.mxu1 %v12507_v29  ;;  %v6661_v16 = vmax.f32 %v11574_v7, 0.0  ;;  %v12553_v8 = vld [vmem:[%s12907_s2 + $0xbe8] ss:$12 sps:$4 sm:$0xff]   ;;  %v12581_v62 = vld [vmem:[%s12907_s2 + $0x2d8] ss:$12 sps:$4 sm:$0xff]  }
 0x8cb   : > { %9577 = vmatprep.mubr.bf16.mxu1 %v14177_v13  ;;  %v12556_v20 = vld [vmem:[%s12907_s2 + $0xc8] ss:$12 sps:$4 sm:$0xff]   ;;  %v6663_v4 = vmax.f32 %v11576_v5, 0.0 }
 0x8cc   : > { %9519 = vmatpush1.bf16.msra.mxu0 %v12502_v12  ;;  %v12557_v29 = vld [vmem:[%s12907_s2 + $0x248] ss:$12 sps:$4 sm:$0xff]   ;;  %v14223_v55 = vpack.c.bf16 %v6661_v16, %v6661_v16  ;;  %v12584_v16 = vld [vmem:[%s12907_s2 + $0x170] ss:$12 sps:$4 sm:$0xff]  }
 0x8cd   : > { %9560 = vmatpush1.bf16.msra.mxu1 %v12505_v14  ;;  %9520 = vmatprep.subr.bf16.mxu0 %v12510_v59  ;;  %v12558_v10 = vld [vmem:[%s12907_s2 + $0x8] ss:$12 sps:$4 sm:$0xff]   ;;  %v14226_v14 = vpack.c.bf16 %v6663_v4, %v6663_v4  ;;  %v12560_v59 = vld [vmem:[%s12907_s2 + $0xe0] ss:$12 sps:$4 sm:$0xff]   ;;  %v12585_v4 = vld [vmem:[%s12907_s2 + $0x2f0] ss:$12 sps:$4 sm:$0xff]  }
 0x8ce   : > { %9561 = vmatprep.subr.bf16.mxu1 %v12513_v21  ;;  %v12559_v12 = vld [vmem:[%s12907_s2 + $0x188] ss:$12 sps:$4 sm:$0xff]   ;;  %v12561_v21 = vld [vmem:[%s12907_s2 + $0x260] ss:$12 sps:$4 sm:$0xff]  }
 0x8d0   : > { %9521 = vmatpush1.bf16.msra.mxu0 %v12508_v22  ;;  %v12562_v22 = vld [vmem:[%s12907_s2 + $0x20] ss:$12 sps:$4 sm:$0xff]  }
 0x8d1   : > { %9562 = vmatpush1.bf16.msra.mxu1 %v12511_v23  ;;  %9522 = vmatprep.subr.bf16.mxu0 %v12516_v25  ;;  %v12563_v23 = vld [vmem:[%s12907_s2 + $0x1a0] ss:$12 sps:$4 sm:$0xff]   ;;  %v12564_v25 = vld [vmem:[%s12907_s2 + $0xf8] ss:$12 sps:$4 sm:$0xff]  }
 0x8d2   : > { %9563 = vmatprep.subr.bf16.mxu1 %v12519_v28  ;;  %v12565_v28 = vld [vmem:[%s12907_s2 + $0x278] ss:$12 sps:$4 sm:$0xff]  }
 0x8d4   : > { %9523 = vmatpush1.bf16.msra.mxu0 %v12514_v30  ;;  %v12566_v30 = vld [vmem:[%s12907_s2 + $0x38] ss:$12 sps:$4 sm:$0xff]  }
 0x8d5   : > { %9564 = vmatpush1.bf16.msra.mxu1 %v12517_v27  ;;  %9524 = vmatprep.subr.bf16.mxu0 %v12522_v35  ;;  %v12567_v27 = vld [vmem:[%s12907_s2 + $0x1b8] ss:$12 sps:$4 sm:$0xff]   ;;  %v12569_v35 = vld [vmem:[%s12907_s2 + $0x290] ss:$12 sps:$4 sm:$0xff]  }
 0x8d6   : > { %9565 = vmatprep.subr.bf16.mxu1 %v12525_v38  ;;  %v12571_v38 = vld [vmem:[%s12907_s2 + $0x1d0] ss:$12 sps:$4 sm:$0xff]  }
 0x8d8   : > { %9525 = vmatpush1.bf16.msra.mxu0 %v12520_v41  ;;  %v12572_v41 = vld [vmem:[%s12907_s2 + $0x128] ss:$12 sps:$4 sm:$0xff]  }
 0x8d9   : > { %9566 = vmatpush1.bf16.msra.mxu1 %v12523_v47  ;;  %9526 = vmatprep.subr.bf16.mxu0 %v12528_v52  ;;  %v12573_v47 = vld [vmem:[%s12907_s2 + $0x2a8] ss:$12 sps:$4 sm:$0xff]  }
 0x8da   : > { %9567 = vmatprep.subr.bf16.mxu1 %v12531_v42  ;;  %v12574_v52 = vld [vmem:[%s12907_s2 + $0x68] ss:$12 sps:$4 sm:$0xff]   ;;  %v14252_v42 = vld [vmem:[%s655_s28] sm:$0x7] }
 0x8dc   : > { %9527 = vmatpush1.bf16.msra.mxu0 %v12526_v44  ;;  %v12575_v44 = vld [vmem:[%s12907_s2 + $0x1e8] ss:$12 sps:$4 sm:$0xff]  }
 0x8dd   : > { %9568 = vmatpush1.bf16.msra.mxu1 %v12529_v45  ;;  %9528 = vmatprep.subr.bf16.mxu0 %v12534_v49  ;;  %v12576_v45 = vld [vmem:[%s12907_s2 + $0x140] ss:$12 sps:$4 sm:$0xff]  }
 0x8de   : > { %9569 = vmatprep.subr.bf16.mxu1 %v12537_v50  ;;  %v12577_v49 = vld [vmem:[%s12907_s2 + $0x2c0] ss:$12 sps:$4 sm:$0xff]   ;;  %v7198_v50 = vrot.slane %v14252_v42, %v13192_v63 }
 0x8e0   : > { %9529 = vmatpush1.bf16.msra.mxu0 %v12532_v17  ;;  %v7202_v17 = vrot.slane %v14252_v42, %v13226_v32 }
 0x8e1   : > { %9570 = vmatpush1.bf16.msra.mxu1 %v12535_v37  ;;  %9530 = vmatprep.subr.bf16.mxu0 %v12540_v57  ;;  %v12578_v37 = vld [vmem:[%s12907_s2 + $0x80] ss:$12 sps:$4 sm:$0xff]  }
 0x8e2   : > { %9571 = vmatprep.subr.bf16.mxu1 %v12543_v53  ;;  %v12579_v57 = vld [vmem:[%s12907_s2 + $0x200] ss:$12 sps:$4 sm:$0xff]   ;;  %v12580_v53 = vld [vmem:[%s12907_s2 + $0x158] ss:$12 sps:$4 sm:$0xff]  }
 0x8e4   : > { %9531 = vmatpush1.bf16.msra.mxu0 %v12538_v54 }
 0x8e5   : > { %9572 = vmatpush1.bf16.msra.mxu1 %v12541_v1  ;;  %9532 = vmatprep.subr.bf16.mxu0 %v12546_v3 }
 0x8e6   : > { %9573 = vmatprep.subr.bf16.mxu1 %v12549_v40 }
 0x8e8   : > { %9533 = vmatpush1.bf16.msra.mxu0 %v12544_v46 }
 0x8e9   : > { %9574 = vmatpush1.bf16.msra.mxu1 %v12547_v0  ;;  %9534 = vmatprep.subr.bf16.mxu0 %v12552_v56  ;;  %v12582_v0 = vld [vmem:[%s12907_s2 + $0x98] ss:$12 sps:$4 sm:$0xff]  }
 0x8ea   : > { %9575 = vmatprep.subr.bf16.mxu1 %v12555_v26 }
 0x8ec   : > { %9535 = vmatpush1.bf16.msra.mxu0 %v12550_v33  ;;  %v12583_v33 = vld [vmem:[%s12907_s2 + $0x218] ss:$12 sps:$4 sm:$0xff]  }
 0x8ed   : > { %9576 = vmatpush1.bf16.msra.mxu1 %v12553_v8  ;;  %11326 = vmatprep.subr.bf16.mxu0 %v12556_v20 }
 0x8ee   : > { %11348 = vmatprep.subr.bf16.mxu1 %v12557_v29  ;;  %v12586_v29 = vld [vmem:[%s12907_s2 + $0xb0] ss:$12 sps:$4 sm:$0xff]  }
 0x8ef   : > { %9537 = vmatmul.mubr.bf16.vlgmr.msra.gmra.mrb[64].mxu0 %v14223_v55 }
 0x8f0   : > { %9578 = vmatmul.mubr.bf16.vlgmr.msra.gmra.mrb[64].mxu1 %v14226_v14  ;;  %11327 = vmatpush3.bf16.msra.mxu0 %v12558_v10  ;;  %v12587_v10 = vld [vmem:[%s12907_s2 + $0x230] ss:$12 sps:$4 sm:$0xff]  }
 0x8f1   : > { %9618 = vmatprep.mubr.bf16.mxu0 %v13872_v61  ;;  %11349 = vmatpush3.bf16.msra.mxu1 %v12559_v12  ;;  %v12568_v61 = vld [vmem:[%s12907_s2 + $0x110] ss:$12 sps:$4 sm:$0xff]   ;;  %v12588_v12 = vld [vmem:[%s12907_s2 + $0x3c8] ss:$12 sps:$4 sm:$0xff]  }
 0x8f2   : > { %9658 = vmatprep.mubr.bf16.mxu1 %v13877_v2  ;;  %11328 = vmatprep.subr.bf16.mxu0 %v12560_v59  ;;  %v12570_v2 = vld [vmem:[%s12907_s2 + $0x50] ss:$12 sps:$4 sm:$0xff]   ;;  %v12589_v59 = vld [vmem:[%s12907_s2 + $0x548] ss:$12 sps:$4 sm:$0xff]  }
 0x8f3   : > { %11350 = vmatprep.subr.bf16.mxu1 %v12561_v21  ;;  %v12590_v21 = vld [vmem:[%s12907_s2 + $0x308] ss:$12 sps:$4 sm:$0xff]  }
 0x8f4   : > { %11329 = vmatpush3.bf16.msra.mxu0 %v12562_v22  ;;  %v12591_v22 = vld [vmem:[%s12907_s2 + $0x488] ss:$12 sps:$4 sm:$0xff]  }
 0x8f5   : > { %11351 = vmatpush3.bf16.msra.mxu1 %v12563_v23  ;;  %11330 = vmatprep.subr.bf16.mxu0 %v12564_v25  ;;  %v12592_v23 = vld [vmem:[%s12907_s2 + $0x3e0] ss:$12 sps:$4 sm:$0xff]  }
 0x8f6   : > { %11352 = vmatprep.subr.bf16.mxu1 %v12565_v28  ;;  %v12593_v25 = vld [vmem:[%s12907_s2 + $0x560] ss:$12 sps:$4 sm:$0xff]  }
 0x8f7   : > { %v12594_v28 = vld [vmem:[%s12907_s2 + $0x320] ss:$12 sps:$4 sm:$0xff]  }
 0x8f8   : > { %11331 = vmatpush3.bf16.msra.mxu0 %v12566_v30  ;;  %v12595_v30 = vld [vmem:[%s12907_s2 + $0x4a0] ss:$12 sps:$4 sm:$0xff]  }
 0x8f9   : > { %11353 = vmatpush3.bf16.msra.mxu1 %v12567_v27  ;;  %11332 = vmatprep.subr.bf16.mxu0 %v12568_v61  ;;  %v12596_v27 = vld [vmem:[%s12907_s2 + $0x3f8] ss:$12 sps:$4 sm:$0xff]  }
 0x8fa   : > { %11354 = vmatprep.subr.bf16.mxu1 %v12569_v35  ;;  %v12599_v61 = vld [vmem:[%s12907_s2 + $0x4b8] ss:$12 sps:$4 sm:$0xff]   ;;  %v12601_v35 = vld [vmem:[%s12907_s2 + $0x590] ss:$12 sps:$4 sm:$0xff]  }
 0x8fc   : > { %11333 = vmatpush3.bf16.msra.mxu0 %v12570_v2  ;;  %v12603_v2 = vld [vmem:[%s12907_s2 + $0x4d0] ss:$12 sps:$4 sm:$0xff]  }
 0x8fd   : > { %11355 = vmatpush3.bf16.msra.mxu1 %v12571_v38  ;;  %11334 = vmatprep.subr.bf16.mxu0 %v12572_v41  ;;  %v12604_v38 = vld [vmem:[%s12907_s2 + $0x428] ss:$12 sps:$4 sm:$0xff]  }
 0x8fe   : > { %11356 = vmatprep.subr.bf16.mxu1 %v12573_v47  ;;  %v12605_v41 = vld [vmem:[%s12907_s2 + $0x5a8] ss:$12 sps:$4 sm:$0xff]  }
 0x8ff   : > { %v12606_v47 = vld [vmem:[%s12907_s2 + $0x368] ss:$12 sps:$4 sm:$0xff]  }
 0x900   : > { %11335 = vmatpush3.bf16.msra.mxu0 %v12574_v52  ;;  %v12607_v52 = vld [vmem:[%s12907_s2 + $0x4e8] ss:$12 sps:$4 sm:$0xff]  }
 0x901   : > { %11357 = vmatpush3.bf16.msra.mxu1 %v12575_v44  ;;  %11336 = vmatprep.subr.bf16.mxu0 %v12576_v45  ;;  %v12608_v44 = vld [vmem:[%s12907_s2 + $0x440] ss:$12 sps:$4 sm:$0xff]  }
 0x902   : > { %v9292_v54 = vpop.f32.mrb[52].mxu0  ;;  %11358 = vmatprep.subr.bf16.mxu1 %v12577_v49  ;;  %v12609_v45 = vld [vmem:[%s12907_s2 + $0x5c0] ss:$12 sps:$4 sm:$0xff]  }
 0x903   : > { %v9293_v1 = vadd.f32 %v9292_v54, %v7198_v50  ;;  %v9333_v3 = vpop.f32.mrb[52].mxu1  ;;  %v9294_v24 = vpop.f32.mrb[53].mxu0  ;;  %v12610_v49 = vld [vmem:[%s12907_s2 + $0x380] ss:$12 sps:$4 sm:$0xff]   ;;  %v12616_v54 = vld [vmem:[%s12907_s2 + $0x470] ss:$12 sps:$4 sm:$0xff]  }
 0x904   : > { %v9295_v40 = vadd.f32 %v9294_v24, %v7202_v17  ;;  %v9335_v46 = vpop.f32.mrb[53].mxu1  ;;  %v9296_v7 = vpop.f32.mrb[54].mxu0  ;;  %11337 = vmatpush3.bf16.msra.mxu0 %v12578_v37  ;;  %v12611_v50 = vld [vmem:[%s12907_s2 + $0x500] ss:$12 sps:$4 sm:$0xff]   ;;  %v12612_v17 = vld [vmem:[%s12907_s2 + $0x458] ss:$12 sps:$4 sm:$0xff]  }
 0x905   : > { %v14266_v56 = vadd.f32 %v9333_v3, %v9293_v1  ;;  %v9337_v5 = vpop.f32.mrb[54].mxu1  ;;  %11359 = vmatpush3.bf16.msra.mxu1 %v12579_v57  ;;  %v9297_v26 = vpop.f32.mrb[55].mxu0  ;;  %11338 = vmatprep.subr.bf16.mxu0 %v12580_v53  ;;  %v12613_v37 = vld [vmem:[%s12907_s2 + $0x5d8] ss:$12 sps:$4 sm:$0xff]   ;;  %v12618_v1 = vld [vmem:[%s12907_s2 + $0x3b0] ss:$12 sps:$4 sm:$0xff]  }
 0x906   : > { %v14270_v8 = vadd.f32 %v9335_v46, %v9295_v40  ;;  %v9338_v20 = vpop.f32.mrb[55].mxu1  ;;  %11360 = vmatprep.subr.bf16.mxu1 %v12581_v62  ;;  %v12614_v57 = vld [vmem:[%s12907_s2 + $0x398] ss:$12 sps:$4 sm:$0xff]   ;;  %v12617_v62 = vld [vmem:[%s12907_s2 + $0x5f0] ss:$12 sps:$4 sm:$0xff]  }
 0x907   : > { %v12615_v53 = vld [vmem:[%s12907_s2 + $0x518] ss:$12 sps:$4 sm:$0xff]   ;;  %v12619_v3 = vld [vmem:[%s12907_s2 + $0x530] ss:$12 sps:$4 sm:$0xff]   ;;  %v12620_v24 = vld [vmem:[%s12907_s2 + $0x6c8] ss:$12 sps:$4 sm:$0xff]  }
 0x908   : > { %11339 = vmatpush3.bf16.msra.mxu0 %v12582_v0  ;;  %v12621_v40 = vld [vmem:[%s12907_s2 + $0x848] ss:$12 sps:$4 sm:$0xff]   ;;  %v12624_v0 = vld [vmem:[%s12907_s2 + $0x6e0] ss:$12 sps:$4 sm:$0xff]   ;;  %v12631_v20 = vld [vmem:[%s12907_s2 + $0x7b8] ss:$12 sps:$4 sm:$0xff]  }
 0x909   : > { %11361 = vmatpush3.bf16.msra.mxu1 %v12583_v33  ;;  %11340 = vmatprep.subr.bf16.mxu0 %v12584_v16  ;;  %v12622_v46 = vld [vmem:[%s12907_s2 + $0x608] ss:$12 sps:$4 sm:$0xff]   ;;  %v12625_v5 = vld [vmem:[%s12907_s2 + $0x860] ss:$12 sps:$4 sm:$0xff]   ;;  %v12628_v16 = vld [vmem:[%s12907_s2 + $0x6f8] ss:$12 sps:$4 sm:$0xff]  }
 0x90a   : > { %11362 = vmatprep.subr.bf16.mxu1 %v12585_v4  ;;  %v12623_v7 = vld [vmem:[%s12907_s2 + $0x788] ss:$12 sps:$4 sm:$0xff]   ;;  %v12626_v26 = vld [vmem:[%s12907_s2 + $0x620] ss:$12 sps:$4 sm:$0xff]   ;;  %v12633_v4 = vld [vmem:[%s12907_s2 + $0x890] ss:$12 sps:$4 sm:$0xff]  }
 0x90b   : > { %v12627_v33 = vld [vmem:[%s12907_s2 + $0x7a0] ss:$12 sps:$4 sm:$0xff]  }
 0x90c   : > { %11341 = vmatpush3.bf16.msra.mxu0 %v12586_v29  ;;  %v12635_v29 = vld [vmem:[%s12907_s2 + $0x7d0] ss:$12 sps:$4 sm:$0xff]  }
 0x90d   : > { %11363 = vmatpush3.bf16.msra.mxu1 %v12587_v10  ;;  %11370 = vmatprep.subr.bf16.mxu0 %v12588_v12  ;;  %v12636_v10 = vld [vmem:[%s12907_s2 + $0x728] ss:$12 sps:$4 sm:$0xff]  }
 0x90e   : > { %11392 = vmatprep.subr.bf16.mxu1 %v12589_v59  ;;  %v12637_v12 = vld [vmem:[%s12907_s2 + $0x8a8] ss:$12 sps:$4 sm:$0xff]  }
 0x90f   : > { %9619 = vmatmul.mubr.bf16.vlgmr.msra.gmra.mrb[68].mxu0 %v13958_v51  ;;  %v12597_v51 = vld [vmem:[%s12907_s2 + $0x578] ss:$12 sps:$4 sm:$0xff]   ;;  %v12638_v59 = vld [vmem:[%s12907_s2 + $0x668] ss:$12 sps:$4 sm:$0xff]  }
 0x910   : > { %9659 = vmatmul.mubr.bf16.vlgmr.msra.gmra.mrb[68].mxu1 %v13961_v60  ;;  %11371 = vmatpush3.bf16.msra.mxu0 %v12590_v21  ;;  %v12598_v60 = vld [vmem:[%s12907_s2 + $0x338] ss:$12 sps:$4 sm:$0xff]   ;;  %v12639_v21 = vld [vmem:[%s12907_s2 + $0x7e8] ss:$12 sps:$4 sm:$0xff]  }
 0x911   : > { %9698 = vmatprep.mubr.bf16.mxu0 %v13964_v48  ;;  %11393 = vmatpush3.bf16.msra.mxu1 %v12591_v22  ;;  %v12600_v48 = vld [vmem:[%s12907_s2 + $0x410] ss:$12 sps:$4 sm:$0xff]   ;;  %v12640_v22 = vld [vmem:[%s12907_s2 + $0x740] ss:$12 sps:$4 sm:$0xff]  }
 0x912   : > { %9738 = vmatprep.mubr.bf16.mxu1 %v13968_v39  ;;  %11372 = vmatprep.subr.bf16.mxu0 %v12592_v23  ;;  %v12602_v39 = vld [vmem:[%s12907_s2 + $0x350] ss:$12 sps:$4 sm:$0xff]   ;;  %v12641_v23 = vld [vmem:[%s12907_s2 + $0x8c0] ss:$12 sps:$4 sm:$0xff]  }
 0x913   : > { %11394 = vmatprep.subr.bf16.mxu1 %v12593_v25  ;;  %v12642_v25 = vld [vmem:[%s12907_s2 + $0x680] ss:$12 sps:$4 sm:$0xff]  }
 0x914   : > { %11373 = vmatpush3.bf16.msra.mxu0 %v12594_v28  ;;  %v12643_v28 = vld [vmem:[%s12907_s2 + $0x800] ss:$12 sps:$4 sm:$0xff]  }
 0x915   : > { %11395 = vmatpush3.bf16.msra.mxu1 %v12595_v30  ;;  %11374 = vmatprep.subr.bf16.mxu0 %v12596_v27  ;;  %v12644_v30 = vld [vmem:[%s12907_s2 + $0x758] ss:$12 sps:$4 sm:$0xff]  }
 0x916   : > { %11396 = vmatprep.subr.bf16.mxu1 %v12597_v51  ;;  %v12645_v51 = vld [vmem:[%s12907_s2 + $0x8d8] ss:$12 sps:$4 sm:$0xff]  }
 0x918   : > { %11375 = vmatpush3.bf16.msra.mxu0 %v12598_v60 }
 0x919   : > { %11397 = vmatpush3.bf16.msra.mxu1 %v12599_v61  ;;  %11376 = vmatprep.subr.bf16.mxu0 %v12600_v48 }
 0x91a   : > { %11398 = vmatprep.subr.bf16.mxu1 %v12601_v35 }
 0x91c   : > { %11377 = vmatpush3.bf16.msra.mxu0 %v12602_v39 }
 0x91d   : > { %11399 = vmatpush3.bf16.msra.mxu1 %v12603_v2  ;;  %11378 = vmatprep.subr.bf16.mxu0 %v12604_v38  ;;  %v12646_v38 = vld [vmem:[%s12907_s2 + $0x698] ss:$12 sps:$4 sm:$0xff]  }
 0x91e   : > { %11400 = vmatprep.subr.bf16.mxu1 %v12605_v41 }
 0x920   : > { %11379 = vmatpush3.bf16.msra.mxu0 %v12606_v47 }
 0x921   : > { %11401 = vmatpush3.bf16.msra.mxu1 %v12607_v52  ;;  %11380 = vmatprep.subr.bf16.mxu0 %v12608_v44  ;;  %v12648_v44 = vld [vmem:[%s12907_s2 + $0x770] ss:$12 sps:$4 sm:$0xff]  }
 0x922   : > { %11402 = vmatprep.subr.bf16.mxu1 %v12609_v45 }
 0x924   : > { %11381 = vmatpush3.bf16.msra.mxu0 %v12610_v49  ;;  %v12649_v49 = vld [vmem:[%s12907_s2 + $0x8f0] ss:$12 sps:$4 sm:$0xff]  }
 0x925   : > { %11403 = vmatpush3.bf16.msra.mxu1 %v12611_v50  ;;  %11382 = vmatprep.subr.bf16.mxu0 %v12612_v17  ;;  %v12650_v50 = vld [vmem:[%s12907_s2 + $0x6b0] ss:$12 sps:$4 sm:$0xff]  }
 0x926   : > { %11404 = vmatprep.subr.bf16.mxu1 %v12613_v37  ;;  %v12651_v17 = vld [vmem:[%s12907_s2 + $0x830] ss:$12 sps:$4 sm:$0xff]   ;;  %v12652_v37 = vld [vmem:[%s12907_s2 + $0x9c8] ss:$12 sps:$4 sm:$0xff]  }
 0x928   : > { %11383 = vmatpush3.bf16.msra.mxu0 %v12614_v57  ;;  %v12653_v57 = vld [vmem:[%s12907_s2 + $0xb48] ss:$12 sps:$4 sm:$0xff]  }
 0x929   : > { %11405 = vmatpush3.bf16.msra.mxu1 %v12615_v53  ;;  %11384 = vmatprep.subr.bf16.mxu0 %v12616_v54  ;;  %v12654_v53 = vld [vmem:[%s12907_s2 + $0x908] ss:$12 sps:$4 sm:$0xff]  }
 0x92a   : > { %11406 = vmatprep.subr.bf16.mxu1 %v12617_v62  ;;  %v12655_v54 = vld [vmem:[%s12907_s2 + $0xa88] ss:$12 sps:$4 sm:$0xff]   ;;  %v12656_v62 = vld [vmem:[%s12907_s2 + $0x9e0] ss:$12 sps:$4 sm:$0xff]  }
 0x92c   : > { %11385 = vmatpush3.bf16.msra.mxu0 %v12618_v1  ;;  %v12657_v1 = vld [vmem:[%s12907_s2 + $0xb60] ss:$12 sps:$4 sm:$0xff]  }
 0x92d   : > { %11407 = vmatpush3.bf16.msra.mxu1 %v12619_v3  ;;  %11414 = vmatprep.subr.bf16.mxu0 %v12620_v24  ;;  %v12658_v3 = vld [vmem:[%s12907_s2 + $0x920] ss:$12 sps:$4 sm:$0xff]  }
 0x92e   : > { %11436 = vmatprep.subr.bf16.mxu1 %v12621_v40  ;;  %v12659_v24 = vld [vmem:[%s12907_s2 + $0xaa0] ss:$12 sps:$4 sm:$0xff]   ;;  %v12660_v40 = vld [vmem:[%s12907_s2 + $0x9f8] ss:$12 sps:$4 sm:$0xff]  }
 0x92f   : > { %9699 = vmatmul.mubr.bf16.vlgmr.msra.gmra.mrb[72].mxu0 %v14040_v6  ;;  %v12629_v6 = vld [vmem:[%s12907_s2 + $0x878] ss:$12 sps:$4 sm:$0xff]  }
 0x930   : > { %9739 = vmatmul.mubr.bf16.vlgmr.msra.gmra.mrb[72].mxu1 %v14047_v19  ;;  %11415 = vmatpush3.bf16.msra.mxu0 %v12622_v46  ;;  %v12630_v19 = vld [vmem:[%s12907_s2 + $0x638] ss:$12 sps:$4 sm:$0xff]  }
 0x931   : > { %9778 = vmatprep.mubr.bf16.mxu0 %v14068_v43  ;;  %11437 = vmatpush3.bf16.msra.mxu1 %v12623_v7  ;;  %v12632_v43 = vld [vmem:[%s12907_s2 + $0x710] ss:$12 sps:$4 sm:$0xff]   ;;  %v12663_v46 = vld [vmem:[%s12907_s2 + $0xab8] ss:$12 sps:$4 sm:$0xff]  }
 0x932   : > { %9818 = vmatprep.mubr.bf16.mxu1 %v14071_v34  ;;  %11416 = vmatprep.subr.bf16.mxu0 %v12624_v0  ;;  %v12634_v34 = vld [vmem:[%s12907_s2 + $0x650] ss:$12 sps:$4 sm:$0xff]  }
 0x933   : > { %11438 = vmatprep.subr.bf16.mxu1 %v12625_v5  ;;  %v12665_v7 = vld [vmem:[%s12907_s2 + $0xb90] ss:$12 sps:$4 sm:$0xff]   ;;  %v12668_v5 = vld [vmem:[%s12907_s2 + $0xa28] ss:$12 sps:$4 sm:$0xff]  }
 0x934   : > { %11417 = vmatpush3.bf16.msra.mxu0 %v12626_v26  ;;  %v12667_v0 = vld [vmem:[%s12907_s2 + $0xad0] ss:$12 sps:$4 sm:$0xff]   ;;  %v12669_v26 = vld [vmem:[%s12907_s2 + $0xba8] ss:$12 sps:$4 sm:$0xff]  }
 0x935   : > { %11439 = vmatpush3.bf16.msra.mxu1 %v12627_v33  ;;  %11418 = vmatprep.subr.bf16.mxu0 %v12628_v16  ;;  %v12670_v33 = vld [vmem:[%s12907_s2 + $0x968] ss:$12 sps:$4 sm:$0xff]  }
 0x936   : > { %11440 = vmatprep.subr.bf16.mxu1 %v12629_v6  ;;  %v12671_v16 = vld [vmem:[%s12907_s2 + $0xae8] ss:$12 sps:$4 sm:$0xff]   ;;  %v12672_v6 = vld [vmem:[%s12907_s2 + $0xa40] ss:$12 sps:$4 sm:$0xff]  }
 0x938   : > { %11419 = vmatpush3.bf16.msra.mxu0 %v12630_v19  ;;  %v12673_v19 = vld [vmem:[%s12907_s2 + $0xbc0] ss:$12 sps:$4 sm:$0xff]  }
 0x939   : > { %11441 = vmatpush3.bf16.msra.mxu1 %v12631_v20  ;;  %11420 = vmatprep.subr.bf16.mxu0 %v12632_v43  ;;  %v12674_v20 = vld [vmem:[%s12907_s2 + $0x980] ss:$12 sps:$4 sm:$0xff]  }
 0x93a   : > { %11442 = vmatprep.subr.bf16.mxu1 %v12633_v4  ;;  %v12675_v43 = vld [vmem:[%s12907_s2 + $0xb00] ss:$12 sps:$4 sm:$0xff]   ;;  %v12676_v4 = vld [vmem:[%s12907_s2 + $0xa58] ss:$12 sps:$4 sm:$0xff]  }
 0x93c   : > { %11421 = vmatpush3.bf16.msra.mxu0 %v12634_v34  ;;  %v12677_v34 = vld [vmem:[%s12907_s2 + $0xbd8] ss:$12 sps:$4 sm:$0xff]  }
 0x93d   : > { %11443 = vmatpush3.bf16.msra.mxu1 %v12635_v29  ;;  %11422 = vmatprep.subr.bf16.mxu0 %v12636_v10  ;;  %v12678_v29 = vld [vmem:[%s12907_s2 + $0x998] ss:$12 sps:$4 sm:$0xff]  }
 0x93e   : > { %11444 = vmatprep.subr.bf16.mxu1 %v12637_v12  ;;  %v12679_v10 = vld [vmem:[%s12907_s2 + $0xb18] ss:$12 sps:$4 sm:$0xff]   ;;  %v12680_v12 = vld [vmem:[%s12907_s2 + $0xa70] ss:$12 sps:$4 sm:$0xff]  }
 0x940   : > { %11423 = vmatpush3.bf16.msra.mxu0 %v12638_v59  ;;  %v12681_v59 = vld [vmem:[%s12907_s2 + $0xbf0] ss:$12 sps:$4 sm:$0xff]  }
 0x941   : > { %11445 = vmatpush3.bf16.msra.mxu1 %v12639_v21  ;;  %11424 = vmatprep.subr.bf16.mxu0 %v12640_v22  ;;  %v12682_v21 = vld [vmem:[%s12907_s2 + $0x9b0] ss:$12 sps:$4 sm:$0xff]  }
 0x942   : > { %v9374_v27 = vpop.f32.mrb[56].mxu0  ;;  %11446 = vmatprep.subr.bf16.mxu1 %v12641_v23  ;;  %v12683_v22 = vld [vmem:[%s12907_s2 + $0xb30] ss:$12 sps:$4 sm:$0xff]  }
 0x943   : > { %v9375_v60 = vadd.f32 %v9374_v27, %v14266_v56  ;;  %v9415_v61 = vpop.f32.mrb[56].mxu1  ;;  %v9376_v48 = vpop.f32.mrb[57].mxu0  ;;  %v12647_v56 = vld [vmem:[%s12907_s2 + $0x818] ss:$12 sps:$4 sm:$0xff]  }
 0x944   : > { %v9377_v35 = vadd.f32 %v9376_v48, %v14270_v8  ;;  %v9417_v39 = vpop.f32.mrb[57].mxu1  ;;  %v9378_v2 = vpop.f32.mrb[58].mxu0  ;;  %11425 = vmatpush3.bf16.msra.mxu0 %v12642_v25 }
 0x945   : > { %v14344_v41 = vadd.f32 %v9415_v61, %v9375_v60  ;;  %v9419_v47 = vpop.f32.mrb[58].mxu1  ;;  %11447 = vmatpush3.bf16.msra.mxu1 %v12643_v28  ;;  %v9379_v52 = vpop.f32.mrb[59].mxu0  ;;  %11426 = vmatprep.subr.bf16.mxu0 %v12644_v30 }
 0x946   : > { %v14348_v45 = vadd.f32 %v9417_v39, %v9377_v35  ;;  %v9420_v8 = vpop.f32.mrb[59].mxu1  ;;  %11448 = vmatprep.subr.bf16.mxu1 %v12645_v51 }
 0x948   : > { %11427 = vmatpush3.bf16.msra.mxu0 %v12646_v38 }
 0x949   : > { %11449 = vmatpush3.bf16.msra.mxu1 %v12647_v56  ;;  %11428 = vmatprep.subr.bf16.mxu0 %v12648_v44 }
 0x94a   : > { %11450 = vmatprep.subr.bf16.mxu1 %v12649_v49 }
 0x94c   : > { %11429 = vmatpush3.bf16.msra.mxu0 %v12650_v50 }
 0x94d   : > { %11451 = vmatpush3.bf16.msra.mxu1 %v12651_v17  ;;  %11458 = vmatprep.subr.bf16.mxu0 %v12652_v37  ;;  %v7206_v37 = vrot.slane %v14252_v42, %v13237_v36 }
 0x94e   : > { %11480 = vmatprep.subr.bf16.mxu1 %v12653_v57 }
 0x94f   : > { %9779 = vmatmul.mubr.bf16.vlgmr.msra.gmra.mrb[76].mxu0 %v14133_v31  ;;  %v12661_v31 = vld [vmem:[%s12907_s2 + $0xb78] ss:$12 sps:$4 sm:$0xff]  }
 0x950   : > { %9819 = vmatmul.mubr.bf16.vlgmr.msra.gmra.mrb[76].mxu1 %v14137_v18  ;;  %11459 = vmatpush3.bf16.msra.mxu0 %v12654_v53  ;;  %v12662_v18 = vld [vmem:[%s12907_s2 + $0x938] ss:$12 sps:$4 sm:$0xff]  }
 0x951   : > { %9858 = vmatprep.mubr.bf16.mxu0 %v14174_v11  ;;  %11481 = vmatpush3.bf16.msra.mxu1 %v12655_v54  ;;  %v12664_v11 = vld [vmem:[%s12907_s2 + $0xa10] ss:$12 sps:$4 sm:$0xff]  }
 0x952   : > { %9898 = vmatprep.mubr.bf16.mxu1 %v14177_v13  ;;  %11460 = vmatprep.subr.bf16.mxu0 %v12656_v62  ;;  %v12666_v13 = vld [vmem:[%s12907_s2 + $0x950] ss:$12 sps:$4 sm:$0xff]  }
 0x953   : > { %11482 = vmatprep.subr.bf16.mxu1 %v12657_v1 }
 0x954   : > { %11461 = vmatpush3.bf16.msra.mxu0 %v12658_v3 }
 0x955   : > { %11483 = vmatpush3.bf16.msra.mxu1 %v12659_v24  ;;  %11462 = vmatprep.subr.bf16.mxu0 %v12660_v40 }
 0x956   : > { %11484 = vmatprep.subr.bf16.mxu1 %v12661_v31 }
 0x958   : > { %11463 = vmatpush3.bf16.msra.mxu0 %v12662_v18 }
 0x959   : > { %11485 = vmatpush3.bf16.msra.mxu1 %v12663_v46  ;;  %11464 = vmatprep.subr.bf16.mxu0 %v12664_v11 }
 0x95a   : > { %11486 = vmatprep.subr.bf16.mxu1 %v12665_v7 }
 0x95c   : > { %11465 = vmatpush3.bf16.msra.mxu0 %v12666_v13 }
 0x95d   : > { %11487 = vmatpush3.bf16.msra.mxu1 %v12667_v0  ;;  %11466 = vmatprep.subr.bf16.mxu0 %v12668_v5 }
 0x95e   : > { %11488 = vmatprep.subr.bf16.mxu1 %v12669_v26 }
 0x960   : > { %11467 = vmatpush3.bf16.msra.mxu0 %v12670_v33 }
 0x961   : > { %11489 = vmatpush3.bf16.msra.mxu1 %v12671_v16  ;;  %11468 = vmatprep.subr.bf16.mxu0 %v12672_v6 }
 0x962   : > { %11490 = vmatprep.subr.bf16.mxu1 %v12673_v19 }
 0x964   : > { %11469 = vmatpush3.bf16.msra.mxu0 %v12674_v20 }
 0x965   : > { %11491 = vmatpush3.bf16.msra.mxu1 %v12675_v43  ;;  %11470 = vmatprep.subr.bf16.mxu0 %v12676_v4 }
 0x966   : > { %11492 = vmatprep.subr.bf16.mxu1 %v12677_v34 }
 0x968   : > { %11471 = vmatpush3.bf16.msra.mxu0 %v12678_v29 }
 0x969   : > { %11493 = vmatpush3.bf16.msra.mxu1 %v12679_v10  ;;  %11472 = vmatprep.subr.bf16.mxu0 %v12680_v12 }
 0x96a   : > { %11494 = vmatprep.subr.bf16.mxu1 %v12681_v59 }
 0x96c   : > { %11473 = vmatpush3.bf16.msra.mxu0 %v12682_v21 }
 0x96d   : > { %11495 = vmatpush3.bf16.msra.mxu1 %v12683_v22 }
 0x96f   : > { %9859 = vmatmul.mubr.bf16.vlgmr.msra.gmra.mrb[80].mxu0 %v14223_v55 }
 0x970   : > { %9899 = vmatmul.mubr.bf16.vlgmr.msra.gmra.mrb[80].mxu1 %v14226_v14 }
 0x982   : > { %v9456_v23 = vpop.f32.mrb[60].mxu0 }
 0x983   : > { %v9457_v25 = vadd.f32 %v9456_v23, %v14344_v41  ;;  %v9497_v28 = vpop.f32.mrb[60].mxu1  ;;  %v9458_v30 = vpop.f32.mrb[61].mxu0 }
 0x984   : > { %v9459_v27 = vadd.f32 %v9458_v30, %v14348_v45  ;;  %v9499_v51 = vpop.f32.mrb[61].mxu1  ;;  %v9460_v60 = vpop.f32.mrb[62].mxu0 }
 0x985   : > { %v9498_v61 = vadd.f32 %v9497_v28, %v9457_v25  ;;  %v9501_v48 = vpop.f32.mrb[62].mxu1  ;;  %v9461_v35 = vpop.f32.mrb[63].mxu0 }
 0x986   : > { %v9500_v39 = vadd.f32 %v9499_v51, %v9459_v27  ;;  %v9502_v2 = vpop.f32.mrb[63].mxu1 }
 0x9c2   : > { %v9538_v38 = vpop.f32.mrb[64].mxu0 }
 0x9c3   : > { %v9539_v47 = vadd.f32 %v9538_v38, %v9498_v61  ;;  %v9579_v52 = vpop.f32.mrb[64].mxu1  ;;  %v9540_v55 = vpop.f32.mrb[65].mxu0 }
 0x9c4   : > { %v9541_v56 = vadd.f32 %v9540_v55, %v9500_v39  ;;  %v9581_v14 = vpop.f32.mrb[65].mxu1  ;;  %v9542_v44 = vpop.f32.mrb[66].mxu0 }
 0x9c5   : > { %v9580_v8 = vadd.f32 %v9579_v52, %v9539_v47  ;;  %v9583_v41 = vpop.f32.mrb[66].mxu1  ;;  %v9543_v49 = vpop.f32.mrb[67].mxu0 }
 0x9c6   : > { %v9582_v50 = vadd.f32 %v9581_v14, %v9541_v56  ;;  %v9584_v17 = vpop.f32.mrb[67].mxu1 }
 0x9c7   : > { %v9906_v52 = vadd.f32 %v9580_v8, %v13541_v15 }
 0x9c8   : > { %v9907_v55 = vadd.f32 %v9582_v50, %v13543_v9 }
 0x9ca   : > { %v9911_v44 = vadd.f32 %v9907_v55, %v9906_v52 }
 0x9e2   : > { %v11342_v45 = vpop.f32.mrb[68].mxu0 }
 0x9e3   : > { %v11364_v57 = vpop.f32.mrb[68].mxu1  ;;  %v11343_v53 = vpop.f32.mrb[69].mxu0 }
 0x9e4   : > { %v11344_v54 = vadd.f32 %v11343_v53, %v11342_v45  ;;  %v11365_v62 = vpop.f32.mrb[69].mxu1  ;;  %v11345_v1 = vpop.f32.mrb[70].mxu0 }
 0x9e5   : > { %v11366_v3 = vadd.f32 %v11365_v62, %v11364_v57  ;;  %v11367_v24 = vpop.f32.mrb[70].mxu1  ;;  %v11346_v40 = vpop.f32.mrb[71].mxu0 }
 0x9e6   : > { %v9621_v31 = vadd.f32 %v11344_v54, %v7206_v37  ;;  %v11368_v18 = vpop.f32.mrb[71].mxu1  ;;  %v9909_v24 = vld [vmem:[%s659_s0] sm:$0x7] }
 0x9e7   : > { %v9910_v40 = vld [vmem:[%s663_s3] sm:$0x7]  ;;  %v9942_v18 = vrot.slane %v9909_v24, %v13226_v32 }
 0x9e8   : > { %v9661_v46 = vadd.f32 %v11366_v3, %v9621_v31  ;;  %v9938_v31 = vrot.slane %v9909_v24, %v13192_v63 }
 0xa02   : > { %v11386_v11 = vpop.f32.mrb[72].mxu0 }
 0xa03   : > { %v11408_v7 = vpop.f32.mrb[72].mxu1  ;;  %v11387_v13 = vpop.f32.mrb[73].mxu0 }
 0xa04   : > { %v11388_v0 = vadd.f32 %v11387_v13, %v11386_v11  ;;  %v11409_v5 = vpop.f32.mrb[73].mxu1  ;;  %v11389_v26 = vpop.f32.mrb[74].mxu0  ;;  %v9961_v13 = vrot.slane %v9910_v40, %v13226_v32 }
 0xa05   : > { %v11410_v33 = vadd.f32 %v11409_v5, %v11408_v7  ;;  %v11411_v16 = vpop.f32.mrb[74].mxu1  ;;  %v11390_v42 = vpop.f32.mrb[75].mxu0  ;;  %v9957_v7 = vrot.slane %v9910_v40, %v13192_v63 }
 0xa06   : > { %v9701_v6 = vadd.f32 %v11388_v0, %v9661_v46  ;;  %v11412_v19 = vpop.f32.mrb[75].mxu1  ;;  %v9946_v46 = vrot.slane %v9909_v24, %v13237_v36  ;;  %v9965_v0 = vrot.slane %v9910_v40, %v13237_v36 }
 0xa08   : > { %v9741_v20 = vadd.f32 %v11410_v33, %v9701_v6 }
 0xa22   : > { %v11430_v43 = vpop.f32.mrb[76].mxu0 }
 0xa23   : > { %v11452_v4 = vpop.f32.mrb[76].mxu1  ;;  %v11431_v34 = vpop.f32.mrb[77].mxu0 }
 0xa24   : > { %v11432_v29 = vadd.f32 %v11431_v34, %v11430_v43  ;;  %v11453_v10 = vpop.f32.mrb[77].mxu1  ;;  %v11433_v12 = vpop.f32.mrb[78].mxu0 }
 0xa25   : > { %v11454_v59 = vadd.f32 %v11453_v10, %v11452_v4  ;;  %v11455_v21 = vpop.f32.mrb[78].mxu1  ;;  %v11434_v22 = vpop.f32.mrb[79].mxu0 }
 0xa26   : > { %v9781_v23 = vadd.f32 %v11432_v29, %v9741_v20  ;;  %v11456_v25 = vpop.f32.mrb[79].mxu1 }
 0xa28   : > { %v9821_v28 = vadd.f32 %v11454_v59, %v9781_v23 }
 0xa42   : > { %v11474_v30 = vpop.f32.mrb[80].mxu0 }
 0xa43   : > { %v11496_v27 = vpop.f32.mrb[80].mxu1  ;;  %v11475_v51 = vpop.f32.mrb[81].mxu0 }
 0xa44   : > { %v11476_v60 = vadd.f32 %v11475_v51, %v11474_v30  ;;  %v11497_v61 = vpop.f32.mrb[81].mxu1  ;;  %v11477_v48 = vpop.f32.mrb[82].mxu0 }
 0xa45   : > { %v11498_v35 = vadd.f32 %v11497_v61, %v11496_v27  ;;  %v11499_v39 = vpop.f32.mrb[82].mxu1  ;;  %v11478_v2 = vpop.f32.mrb[83].mxu0 }
 0xa46   : > { %v9861_v38 = vadd.f32 %v11476_v60, %v9821_v28  ;;  %v11500_v47 = vpop.f32.mrb[83].mxu1 }
 0xa48   : > { %v9901_v56 = vadd.f32 %v11498_v35, %v9861_v38 }
 0xa4a   : > { %v9908_v14 = vadd.f32 %v9901_v56, %v13578_v58 }
 0xa4c   : > { %v9912_v41 = vsel %vm2191_vm1, %v9908_v14, 0.0 }
 0xa4d   : > { %v9913_v49 = vadd.f32 %v9912_v41, %v9911_v44 }
 0xa4f   : > { %9914 = vadd.xlane.f32.xlu0 %v9913_v49 }
 0xadc   : > { %v9915_v17 = vpop.xlane.xlu0 %9914 }
 0xadd   : > { %v9916_v45 = vmul.f32 0.003125, %v9915_v17 }
 0xadf   : > { %v9917_v37 = vsub.f32 %v9906_v52, %v9916_v45  ;;  %v9918_v57 = vsub.f32 %v9907_v55, %v9916_v45  ;;  %v9919_v53 = vsub.f32 %v9908_v14, %v9916_v45 }
 0xae1   : > { %v9920_v54 = vmul.f32 %v9917_v37, %v9917_v37  ;;  %v9921_v62 = vmul.f32 %v9918_v57, %v9918_v57  ;;  %v9922_v15 = vmul.f32 %v9919_v53, %v9919_v53 }
 0xae3   : > { %v9923_v8 = vadd.f32 %v9921_v62, %v9920_v54  ;;  %v9924_v9 = vsel %vm2191_vm1, %v9922_v15, 0.0 }
 0xae5   : > { %v9925_v50 = vadd.f32 %v9924_v9, %v9923_v8 }
 0xae7   : > { %9926 = vadd.xlane.f32.xlu1 %v9925_v50 }
 0xb74   : > { %v9927_v58 = vpop.xlane.xlu1 %9926 }
 0xb75   : > { %v9928_v1 = vmul.f32 0.003125, %v9927_v58 }
 0xb77   : > { %v9929_v3 = vadd.f32 1e-05, %v9928_v1 }
 0xb79   : > { %12702 = vrsqrt.f32 %v9929_v3 }
 0xb83   : > { %v12703_v11 = vpop.eup %12702 }
 0xb84   : > { %v9931_v5 = vmul.f32 %v12703_v11, %v9917_v37  ;;  %v9932_v26 = vmul.f32 %v12703_v11, %v9918_v57  ;;  %v9933_v33 = vmul.f32 %v12703_v11, %v9919_v53 }
 0xb85   : > { %9978 = sbr.rel (%p11263_p8) target bundleno = 2957 (0xb8d), region = 80 }
 0xb86   : > { %v9950_v16 = vmul.f32 %v9938_v31, %v9931_v5  ;;  %v9951_v42 = vmul.f32 %v9942_v18, %v9932_v26  ;;  %v9952_v6 = vmul.f32 %v9946_v46, %v9933_v33 }
 0xb88   : > { %v9969_v19 = vadd.f32 %v9957_v7, %v9950_v16  ;;  %v9970_v20 = vadd.f32 %v9961_v13, %v9951_v42  ;;  %v9971_v43 = vadd.f32 %v9965_v0, %v9952_v6 }
 0xb8a   : > { %9972 = vst [vmem:[#allocation2] sm:$0xff] %v9969_v19  ;;  %9973 = vst [vmem:[#allocation2 + $0x8] sm:$0xff] %v9970_v20 }
 0xb8b   : > { %9974 = vst.msk [vmem:[#allocation2 + $0x10] sm:$0xff] %vm2191_vm1, %v9971_v43  ;;  %9979 = vst [vmem:[%s12916_s7] sm:$0xff] (!%p11263_p8), %v9969_v19 }
 0xb8c   : > { %9980 = vst [vmem:[%s12916_s7 + $0x8] sm:$0xff] %v9970_v20  ;;  %9981 = vst.msk [vmem:[%s12916_s7 + $0x10] sm:$0xff] %vm2191_vm1, %v9971_v43 }
 0xb8d PF: > { %s14484_s0 = sld [smem:[#allocation6_spill]]  ;;  %s14485_s25 = sld [smem:[#allocation4_spill]] }
 0xb8e   : > { %s14486_s26 = sld [smem:[#allocation5_spill]]  ;;  %s14487_s27 = sld [smem:[#allocation7_spill]] }
 0xb8f   : > { %s14488_s28 = sld [smem:[#allocation8_spill]] }
 0xb93   : > { %s23_s29 = sadd.s32 1, %s14484_s0  }
 0xb94   : > { %p20_p9 = scmp.ge.s32.totalorder %s23_s29, 6  }
 0xb96   :  { %22 = sbr.rel (!%p20_p9) target bundleno = 7 (0x7), region = 146 }

</bundles_post_ra>
